<compile_context>
chip_gen: v7x
topology: tpu7x:2x2x1
jax: 0.10.0
libtpu: 0.0.40
codegen_flags: <defaults>
</compile_context>

<pallas_src>
import math

import jax
import jax.numpy as jnp
import numpy as np
from jax.experimental import pallas as pl
from jax.experimental.pallas import tpu as pltpu

# ---------------------------------------------------------------------------
# Synthetic cfg['MODEL'] values used by DictBlock (deterministic, in-script).
# ---------------------------------------------------------------------------
MU = 0.1              # cfg['MODEL']['MU']           (ISTA step size)
LMBD = 0.1            # cfg['MODEL']['LAMBDA'][0]    (sparsity weight)
N_DICT = 1            # cfg['MODEL']['EXPANSION_FACTOR']
NON_NEGATIVE = True   # cfg['MODEL']['NONEGATIVE']
N_STEPS = 3           # cfg['MODEL']['NUM_LAYERS']
IS_FISTA = False      # cfg['MODEL']['ISFISTA']
W_NORM = True         # cfg['MODEL']['WNORM']
K = 3                 # kernel_size
PAD = 1               # padding
STRIDE = 1            # only stride=1 supported by this kernel


def _shrink(z, thr):
    """DictBlock.nonlinear: relu(z - thr) if non-negative else soft-shrink."""
    if NON_NEGATIVE:
        return jnp.maximum(z - thr, 0.0)
    return jnp.sign(z) * jnp.maximum(jnp.abs(z) - thr, 0.0)


# ---------------------------------------------------------------------------
# Pallas kernel: full ISTA/FISTA loop for one batch element.
# ---------------------------------------------------------------------------
def dict_block_kernel(x_ref, bf_ref, bt_ref, o_ref, l1_ref, xpad, cpad):
    _, H, WCi = x_ref.shape          # (1, H, W*Cin)
    WCo = o_ref.shape[2]             # W*Cout
    Hp = H + 2 * PAD

    # Zero only the PAD top/bottom rows of the scratch buffers (the interiors
    # are fully overwritten below).  This is done every grid step: it is ~free
    # (2 short rows per buffer) and stays correct when the "parallel" batch
    # axis is sharded across TensorCores (a program_id==0 gate would never run
    # on the second core's shard).
    zx = jnp.zeros((PAD, WCi), xpad.dtype)
    zc = jnp.zeros((PAD, WCo), cpad.dtype)
    xpad[0:PAD, :] = zx
    xpad[PAD + H:Hp, :] = zx
    cpad[0:PAD, :] = zc
    cpad[PAD + H:Hp, :] = zc

    def conv(pad_ref, band_ref):
        # out = sum_dy  pad[dy:dy+H, :] @ band[dy]
        # Three deep bf16 MXU matmuls; accumulator initialized from the first
        # dot (no zeros+add).  Only the leading (H) axis is ever shifted.
        acc = jnp.dot(pad_ref[0:H, :], band_ref[0],
                      preferred_element_type=jnp.float32)
        for dy in range(1, K):
            acc = acc + jnp.dot(pad_ref[dy:dy + H, :], band_ref[dy],
                                preferred_element_type=jnp.float32)
        return acc                                        # (H, W*Co) f32

    thr = LMBD * MU

    # iteration 0:  b = mu * conv2d(xp, W)  (reused every step);  c0 = shrink(b)
    xpad[PAD:PAD + H, :] = x_ref[0]
    b = MU * conv(xpad, bf_ref)                           # (H, W*Cout) f32
    c = _shrink(b, thr)
    c_t, t = c, 1.0

    for _ in range(1, N_STEPS):
        z = c_t if IS_FISTA else c
        # conv_transpose2d(z, W, stride=1, pad=1) == conv2d(z, Wt, pad=1)
        cpad[PAD:PAD + H, :] = z.astype(cpad.dtype)
        xhat = conv(cpad, bt_ref)                         # (H, W*Cin) f32
        # shrink(z + mu*conv(xp - xhat)) == shrink(z + b - mu*conv(xhat))
        xpad[PAD:PAD + H, :] = xhat.astype(xpad.dtype)
        c_new = _shrink(z + b - MU * conv(xpad, bf_ref), thr)
        if IS_FISTA:
            t_prev = t
            t = (1.0 + math.sqrt(1.0 + 4.0 * t_prev * t_prev)) / 2.0
            c_t = c_new + (t_prev - 1.0) / t * (c_new - c)
        c = c_new

    o_ref[0] = c                                          # lane-dense (H, W*Cout)
    # per-sample L1 of the sparse code (c_l1_per_sample in DictConv2d.forward)
    l1_ref[...] = jnp.full(l1_ref.shape, jnp.sum(jnp.abs(c)), jnp.float32)


# ---------------------------------------------------------------------------
# Wrapper (glue): weight normalization, banded-weight build, pallas_call.
# ---------------------------------------------------------------------------
def _band_weights(w_hwio, W_):
    """Fold the K W-direction taps (incl. the W zero-padding) of a stride-1
    conv into a block-banded matrix.

    Returns B of shape (K, W*Ci, W*Co) with
      B[dy, wp*Ci + ci, w*Co + co] = w_hwio[dy, wp - w + PAD, ci, co]
    (zero where the tap falls in the W zero-padding)."""
    Kh, Kw, Ci, Co = w_hwio.shape
    sel = np.zeros((W_, Kw, W_), np.float32)      # sel[wp, dx, w]
    for dx in range(Kw):
        for w in range(W_):
            wp = w + dx - PAD
            if 0 <= wp < W_:
                sel[wp, dx, w] = 1.0
    band = jnp.einsum('pxw,yxio->ypiwo', jnp.asarray(sel), w_hwio)
    return band.reshape(Kh, W_ * Ci, W_ * Co)


def dict_conv2d_forward(x_nchw, weight_oihw):
    assert STRIDE == 1, "kernel implements stride=1 only"
    N, Cin, H, W_ = x_nchw.shape
    Cout = weight_oihw.shape[0]
    Cin_t = Cin * N_DICT

    w = weight_oihw.astype(jnp.float32)
    if W_NORM:  # DictBlock.normalize_weight: unit L2 norm per dictionary atom
        nrm = jnp.sqrt(jnp.sum(w.reshape(Cout, -1) ** 2, axis=1, keepdims=True))
        w = (w.reshape(Cout, -1) / (nrm + 1e-12)).reshape(w.shape)

    # HWIO forward-conv weights: Wf[ky,kx,ci,co] = W[co,ci,ky,kx]
    wf = jnp.transpose(w, (2, 3, 1, 0))                  # (K,K,Cin_t,Cout)
    # conv_transpose weights (stride=1): flip spatially, swap channel roles
    wt = jnp.transpose(wf[::-1, ::-1], (0, 1, 3, 2))     # (K,K,Cout,Cin_t)
    # banded weights (bf16) — W-taps + W-padding folded into the contraction
    bf = _band_weights(wf, W_).astype(jnp.bfloat16)      # (K, W*Cin_t, W*Cout)
    bt = _band_weights(wt, W_).astype(jnp.bfloat16)      # (K, W*Cout, W*Cin_t)

    # xp = torch.cat([x] * n_dict, dim=1); NCHW -> lane-dense (N, H, W*Cin_t)
    xp = jnp.concatenate([x_nchw] * N_DICT, axis=1)
    xp_rows = jnp.transpose(xp, (0, 2, 3, 1)).reshape(N, H, W_ * Cin_t)
    xp_rows = xp_rows.astype(jnp.bfloat16)

    out_rows, l1 = pl.pallas_call(
        dict_block_kernel,
        out_shape=(
            jax.ShapeDtypeStruct((N, H, W_ * Cout), jnp.float32),
            jax.ShapeDtypeStruct((N, 1, 128), jnp.float32),
        ),
        grid_spec=pltpu.PrefetchScalarGridSpec(
            num_scalar_prefetch=0,
            grid=(N,),
            in_specs=[
                pl.BlockSpec((1, H, W_ * Cin_t), lambda n: (n, 0, 0)),
                pl.BlockSpec((K, W_ * Cin_t, W_ * Cout), lambda n: (0, 0, 0)),
                pl.BlockSpec((K, W_ * Cout, W_ * Cin_t), lambda n: (0, 0, 0)),
            ],
            out_specs=(
                pl.BlockSpec((1, H, W_ * Cout), lambda n: (n, 0, 0)),
                pl.BlockSpec((1, 1, 128), lambda n: (n, 0, 0)),
            ),
            scratch_shapes=[
                pltpu.VMEM((H + 2 * PAD, W_ * Cin_t), jnp.bfloat16),  # x / xhat
                pltpu.VMEM((H + 2 * PAD, W_ * Cout), jnp.bfloat16),   # code c
            ],
        ),
        # batch elements are independent -> shard across TensorCores on v7x
        compiler_params=pltpu.CompilerParams(dimension_semantics=("parallel",)),
    )(xp_rows, bf, bt)

    out_nchw = jnp.transpose(out_rows.reshape(N, H, W_, Cout), (0, 3, 1, 2))
    c_l1_per_sample = l1[:, 0, 0]
    # TODO(synk): training-mode EMA updates of running_c_loss / running_c_l1 /
    # running_r_loss (.item() host syncs) and the np.save / torch.save / print
    # of c_l1_per_sample are host-side I/O with no Pallas equivalent.
    return out_nchw, c_l1_per_sample


# ---------------------------------------------------------------------------
# Pure-JAX reference (XLA convs; conv adjoint for conv_transpose), f32.
# ---------------------------------------------------------------------------
def reference_forward(x_nchw, weight_oihw):
    Cout = weight_oihw.shape[0]
    w = weight_oihw.astype(jnp.float32)
    if W_NORM:
        nrm = jnp.sqrt(jnp.sum(w.reshape(Cout, -1) ** 2, axis=1, keepdims=True))
        w = (w.reshape(Cout, -1) / (nrm + 1e-12)).reshape(w.shape)

    xp = jnp.concatenate([x_nchw] * N_DICT, axis=1).astype(jnp.float32)

    def conv(z):
        return jax.lax.conv_general_dilated(
            z, w, (1, 1), ((PAD, PAD), (PAD, PAD)),
            dimension_numbers=("NCHW", "OIHW", "NCHW"))

    def convT(c):  # conv_transpose2d == adjoint of conv2d
        _, vjp = jax.vjp(conv, jnp.zeros_like(xp))
        return vjp(c)[0]

    thr = LMBD * MU
    c = _shrink(MU * conv(xp), thr)
    c_t, t = c, 1.0
    for _ in range(1, N_STEPS):
        z = c_t if IS_FISTA else c
        r = xp - convT(z)
        c_new = _shrink(z + MU * conv(r), thr)
        if IS_FISTA:
            t_prev = t
            t = (1.0 + math.sqrt(1.0 + 4.0 * t_prev * t_prev)) / 2.0
            c_t = c_new + (t_prev - 1.0) / t * (c_new - c)
        c = c_new
    return c


if __name__ == "__main__":
    key = jax.random.PRNGKey(0)
    N, Cin, H, W_, Cout = 2, 8, 16, 16, 32

    kx, kw = jax.random.split(key)
    x = jax.random.normal(kx, (N, Cin, H, W_), dtype=jnp.float32)
    # deterministic kaiming-uniform-like init of the dictionary
    fan_in = Cin * N_DICT * K * K
    bound = (6.0 / fan_in) ** 0.5
    weight = jax.random.uniform(kw, (Cout, Cin * N_DICT, K, K),
                                jnp.float32, -bound, bound)
    # (DictConv2d's bias=True is unused: DictBlock's convs run with bias=None.)

    out, c_l1 = jax.jit(dict_conv2d_forward)(x, weight)
    out = jax.block_until_ready(out)

    ref = reference_forward(x, weight)
    # bf16 matmul operands (f32 accumulate) -> compare at mixed-precision tol.
    np.testing.assert_allclose(np.asarray(out), np.asarray(ref),
                               rtol=2e-2, atol=2e-2)
    np.testing.assert_allclose(np.asarray(c_l1),
                               np.sum(np.abs(np.asarray(ref)), axis=(1, 2, 3)),
                               rtol=2e-2, atol=1e-1)
    # in-kernel L1 must match the kernel's own output exactly (up to f32 accum)
    np.testing.assert_allclose(np.asarray(c_l1),
                               np.sum(np.abs(np.asarray(out)), axis=(1, 2, 3)),
                               rtol=1e-3, atol=1e-3)

    print("KERNEL_OK")
</pallas_src>

<mosaic_0001>
module attributes {stable_mosaic.version = 11 : i64} {
  func.func @dict_block_kernel(%arg0: i32, %arg1: memref<1x16x128xbf16, #tpu.memory_space<vmem>>, %arg2: memref<3x128x512xbf16, #tpu.memory_space<vmem>>, %arg3: memref<3x512x128xbf16, #tpu.memory_space<vmem>>, %arg4: memref<1x16x512xf32, #tpu.memory_space<vmem>>, %arg5: memref<1x1x128xf32, #tpu.memory_space<vmem>>, %arg6: memref<18x128xbf16, #tpu.memory_space<vmem>>, %arg7: memref<18x512xbf16, #tpu.memory_space<vmem>>) attributes {dimension_semantics = [#tpu.dimension_semantics<parallel>], iteration_bounds = array<i64: 2>, scalar_prefetch = 0 : i64, scratch_operands = 2 : i64, tpu.core_type = #tpu.core_type<tc>, window_params = [{transform_indices = @transform_0, window_bounds = array<i64: 1, 16, 128>}, {pipeline_mode = #tpu.pipeline_mode<synchronous>, transform_indices = @transform_1, window_bounds = array<i64: 3, 128, 512>}, {pipeline_mode = #tpu.pipeline_mode<synchronous>, transform_indices = @transform_2, window_bounds = array<i64: 3, 512, 128>}, {transform_indices = @transform_3, window_bounds = array<i64: 1, 16, 512>}, {transform_indices = @transform_4, window_bounds = array<i64: 1, 1, 128>}]} {
    %cst = arith.constant 0.000000e+00 : bf16
    %0 = vector.broadcast %cst : bf16 to vector<1x128xbf16>
    %cst_0 = arith.constant 0.000000e+00 : bf16
    %1 = vector.broadcast %cst_0 : bf16 to vector<1x512xbf16>
    %c0 = arith.constant 0 : index
    %c0_1 = arith.constant 0 : index
    %2 = vector.load %arg6[%c0, %c0_1] : memref<18x128xbf16, #tpu.memory_space<vmem>>, vector<1x128xbf16>
    tpu.vector_store %arg6[%c0, %c0_1], %0 {strides = array<i32>} : memref<18x128xbf16, #tpu.memory_space<vmem>>, vector<1x128xbf16>,
    %c17 = arith.constant 17 : index
    %c0_2 = arith.constant 0 : index
    %3 = vector.load %arg6[%c17, %c0_2] : memref<18x128xbf16, #tpu.memory_space<vmem>>, vector<1x128xbf16>
    tpu.vector_store %arg6[%c17, %c0_2], %0 {strides = array<i32>} : memref<18x128xbf16, #tpu.memory_space<vmem>>, vector<1x128xbf16>,
    %c0_3 = arith.constant 0 : index
    %c0_4 = arith.constant 0 : index
    %4 = vector.load %arg7[%c0_3, %c0_4] : memref<18x512xbf16, #tpu.memory_space<vmem>>, vector<1x512xbf16>
    tpu.vector_store %arg7[%c0_3, %c0_4], %1 {strides = array<i32>} : memref<18x512xbf16, #tpu.memory_space<vmem>>, vector<1x512xbf16>,
    %c17_5 = arith.constant 17 : index
    %c0_6 = arith.constant 0 : index
    %5 = vector.load %arg7[%c17_5, %c0_6] : memref<18x512xbf16, #tpu.memory_space<vmem>>, vector<1x512xbf16>
    tpu.vector_store %arg7[%c17_5, %c0_6], %1 {strides = array<i32>} : memref<18x512xbf16, #tpu.memory_space<vmem>>, vector<1x512xbf16>,
    %c0_7 = arith.constant 0 : index
    %c0_8 = arith.constant 0 : index
    %c0_9 = arith.constant 0 : index
    %6 = vector.load %arg1[%c0_7, %c0_8, %c0_9] : memref<1x16x128xbf16, #tpu.memory_space<vmem>>, vector<1x16x128xbf16>
    %7 = vector.shape_cast %6 : vector<1x16x128xbf16> to vector<16x128xbf16>
    %c1 = arith.constant 1 : index
    %c0_10 = arith.constant 0 : index
    %8 = vector.load %arg6[%c1, %c0_10] : memref<18x128xbf16, #tpu.memory_space<vmem>>, vector<16x128xbf16>
    tpu.vector_store %arg6[%c1, %c0_10], %7 {strides = array<i32>} : memref<18x128xbf16, #tpu.memory_space<vmem>>, vector<16x128xbf16>,
    %c0_11 = arith.constant 0 : index
    %c0_12 = arith.constant 0 : index
    %9 = vector.load %arg6[%c0_11, %c0_12] : memref<18x128xbf16, #tpu.memory_space<vmem>>, vector<16x128xbf16>
    %c0_13 = arith.constant 0 : index
    %c0_14 = arith.constant 0 : index
    %c0_15 = arith.constant 0 : index
    %10 = vector.load %arg2[%c0_13, %c0_14, %c0_15] : memref<3x128x512xbf16, #tpu.memory_space<vmem>>, vector<1x128x512xbf16>
    %11 = vector.shape_cast %10 : vector<1x128x512xbf16> to vector<128x512xbf16>
    %cst_16 = arith.constant dense<0.000000e+00> : vector<16x512xf32>
    %12 = tpu.matmul %9, %11, %cst_16 {dimension_numbers = #tpu.dot_dimension_numbers<[1], [0], [0], [1], [0, 0, 1, 1], [], []>} : vector<16x128xbf16>, vector<128x512xbf16>, vector<16x512xf32> -> vector<16x512xf32>
    %c1_17 = arith.constant 1 : index
    %c0_18 = arith.constant 0 : index
    %13 = vector.load %arg6[%c1_17, %c0_18] : memref<18x128xbf16, #tpu.memory_space<vmem>>, vector<16x128xbf16>
    %c1_19 = arith.constant 1 : index
    %c0_20 = arith.constant 0 : index
    %c0_21 = arith.constant 0 : index
    %14 = vector.load %arg2[%c1_19, %c0_20, %c0_21] : memref<3x128x512xbf16, #tpu.memory_space<vmem>>, vector<1x128x512xbf16>
    %15 = vector.shape_cast %14 : vector<1x128x512xbf16> to vector<128x512xbf16>
    %cst_22 = arith.constant dense<0.000000e+00> : vector<16x512xf32>
    %16 = tpu.matmul %13, %15, %cst_22 {dimension_numbers = #tpu.dot_dimension_numbers<[1], [0], [0], [1], [0, 0, 1, 1], [], []>} : vector<16x128xbf16>, vector<128x512xbf16>, vector<16x512xf32> -> vector<16x512xf32>
    %17 = arith.addf %12, %16 : vector<16x512xf32>
    %c2 = arith.constant 2 : index
    %c0_23 = arith.constant 0 : index
    %18 = vector.load %arg6[%c2, %c0_23] : memref<18x128xbf16, #tpu.memory_space<vmem>>, vector<16x128xbf16>
    %c2_24 = arith.constant 2 : index
    %c0_25 = arith.constant 0 : index
    %c0_26 = arith.constant 0 : index
    %19 = vector.load %arg2[%c2_24, %c0_25, %c0_26] : memref<3x128x512xbf16, #tpu.memory_space<vmem>>, vector<1x128x512xbf16>
    %20 = vector.shape_cast %19 : vector<1x128x512xbf16> to vector<128x512xbf16>
    %cst_27 = arith.constant dense<0.000000e+00> : vector<16x512xf32>
    %21 = tpu.matmul %18, %20, %cst_27 {dimension_numbers = #tpu.dot_dimension_numbers<[1], [0], [0], [1], [0, 0, 1, 1], [], []>} : vector<16x128xbf16>, vector<128x512xbf16>, vector<16x512xf32> -> vector<16x512xf32>
    %22 = arith.addf %17, %21 : vector<16x512xf32>
    %cst_28 = arith.constant 1.000000e-01 : f32
    %23 = vector.broadcast %cst_28 : f32 to vector<16x512xf32>
    %24 = arith.mulf %23, %22 : vector<16x512xf32>
    %cst_29 = arith.constant 0.00999999977 : f32
    %25 = vector.broadcast %cst_29 : f32 to vector<16x512xf32>
    %26 = arith.subf %24, %25 : vector<16x512xf32>
    %cst_30 = arith.constant 0.000000e+00 : f32
    %27 = vector.broadcast %cst_30 : f32 to vector<16x512xf32>
    %28 = arith.maximumf %26, %27 : vector<16x512xf32>
    %29 = arith.truncf %28 : vector<16x512xf32> to vector<16x512xbf16>
    %c1_31 = arith.constant 1 : index
    %c0_32 = arith.constant 0 : index
    %30 = vector.load %arg7[%c1_31, %c0_32] : memref<18x512xbf16, #tpu.memory_space<vmem>>, vector<16x512xbf16>
    tpu.vector_store %arg7[%c1_31, %c0_32], %29 {strides = array<i32>} : memref<18x512xbf16, #tpu.memory_space<vmem>>, vector<16x512xbf16>,
    %c0_33 = arith.constant 0 : index
    %c0_34 = arith.constant 0 : index
    %31 = vector.load %arg7[%c0_33, %c0_34] : memref<18x512xbf16, #tpu.memory_space<vmem>>, vector<16x512xbf16>
    %c0_35 = arith.constant 0 : index
    %c0_36 = arith.constant 0 : index
    %c0_37 = arith.constant 0 : index
    %32 = vector.load %arg3[%c0_35, %c0_36, %c0_37] : memref<3x512x128xbf16, #tpu.memory_space<vmem>>, vector<1x512x128xbf16>
    %33 = vector.shape_cast %32 : vector<1x512x128xbf16> to vector<512x128xbf16>
    %cst_38 = arith.constant dense<0.000000e+00> : vector<16x128xf32>
    %34 = tpu.matmul %31, %33, %cst_38 {dimension_numbers = #tpu.dot_dimension_numbers<[1], [0], [0], [1], [0, 0, 1, 1], [], []>} : vector<16x512xbf16>, vector<512x128xbf16>, vector<16x128xf32> -> vector<16x128xf32>
    %c1_39 = arith.constant 1 : index
    %c0_40 = arith.constant 0 : index
    %35 = vector.load %arg7[%c1_39, %c0_40] : memref<18x512xbf16, #tpu.memory_space<vmem>>, vector<16x512xbf16>
    %c1_41 = arith.constant 1 : index
    %c0_42 = arith.constant 0 : index
    %c0_43 = arith.constant 0 : index
    %36 = vector.load %arg3[%c1_41, %c0_42, %c0_43] : memref<3x512x128xbf16, #tpu.memory_space<vmem>>, vector<1x512x128xbf16>
    %37 = vector.shape_cast %36 : vector<1x512x128xbf16> to vector<512x128xbf16>
    %cst_44 = arith.constant dense<0.000000e+00> : vector<16x128xf32>
    %38 = tpu.matmul %35, %37, %cst_44 {dimension_numbers = #tpu.dot_dimension_numbers<[1], [0], [0], [1], [0, 0, 1, 1], [], []>} : vector<16x512xbf16>, vector<512x128xbf16>, vector<16x128xf32> -> vector<16x128xf32>
    %39 = arith.addf %34, %38 : vector<16x128xf32>
    %c2_45 = arith.constant 2 : index
    %c0_46 = arith.constant 0 : index
    %40 = vector.load %arg7[%c2_45, %c0_46] : memref<18x512xbf16, #tpu.memory_space<vmem>>, vector<16x512xbf16>
    %c2_47 = arith.constant 2 : index
    %c0_48 = arith.constant 0 : index
    %c0_49 = arith.constant 0 : index
    %41 = vector.load %arg3[%c2_47, %c0_48, %c0_49] : memref<3x512x128xbf16, #tpu.memory_space<vmem>>, vector<1x512x128xbf16>
    %42 = vector.shape_cast %41 : vector<1x512x128xbf16> to vector<512x128xbf16>
    %cst_50 = arith.constant dense<0.000000e+00> : vector<16x128xf32>
    %43 = tpu.matmul %40, %42, %cst_50 {dimension_numbers = #tpu.dot_dimension_numbers<[1], [0], [0], [1], [0, 0, 1, 1], [], []>} : vector<16x512xbf16>, vector<512x128xbf16>, vector<16x128xf32> -> vector<16x128xf32>
    %44 = arith.addf %39, %43 : vector<16x128xf32>
    %45 = arith.truncf %44 : vector<16x128xf32> to vector<16x128xbf16>
    %c1_51 = arith.constant 1 : index
    %c0_52 = arith.constant 0 : index
    %46 = vector.load %arg6[%c1_51, %c0_52] : memref<18x128xbf16, #tpu.memory_space<vmem>>, vector<16x128xbf16>
    tpu.vector_store %arg6[%c1_51, %c0_52], %45 {strides = array<i32>} : memref<18x128xbf16, #tpu.memory_space<vmem>>, vector<16x128xbf16>,
    %47 = arith.addf %28, %24 : vector<16x512xf32>
    %c0_53 = arith.constant 0 : index
    %c0_54 = arith.constant 0 : index
    %48 = vector.load %arg6[%c0_53, %c0_54] : memref<18x128xbf16, #tpu.memory_space<vmem>>, vector<16x128xbf16>
    %c0_55 = arith.constant 0 : index
    %c0_56 = arith.constant 0 : index
    %c0_57 = arith.constant 0 : index
    %49 = vector.load %arg2[%c0_55, %c0_56, %c0_57] : memref<3x128x512xbf16, #tpu.memory_space<vmem>>, vector<1x128x512xbf16>
    %50 = vector.shape_cast %49 : vector<1x128x512xbf16> to vector<128x512xbf16>
    %cst_58 = arith.constant dense<0.000000e+00> : vector<16x512xf32>
    %51 = tpu.matmul %48, %50, %cst_58 {dimension_numbers = #tpu.dot_dimension_numbers<[1], [0], [0], [1], [0, 0, 1, 1], [], []>} : vector<16x128xbf16>, vector<128x512xbf16>, vector<16x512xf32> -> vector<16x512xf32>
    %c1_59 = arith.constant 1 : index
    %c0_60 = arith.constant 0 : index
    %52 = vector.load %arg6[%c1_59, %c0_60] : memref<18x128xbf16, #tpu.memory_space<vmem>>, vector<16x128xbf16>
    %c1_61 = arith.constant 1 : index
    %c0_62 = arith.constant 0 : index
    %c0_63 = arith.constant 0 : index
    %53 = vector.load %arg2[%c1_61, %c0_62, %c0_63] : memref<3x128x512xbf16, #tpu.memory_space<vmem>>, vector<1x128x512xbf16>
    %54 = vector.shape_cast %53 : vector<1x128x512xbf16> to vector<128x512xbf16>
    %cst_64 = arith.constant dense<0.000000e+00> : vector<16x512xf32>
    %55 = tpu.matmul %52, %54, %cst_64 {dimension_numbers = #tpu.dot_dimension_numbers<[1], [0], [0], [1], [0, 0, 1, 1], [], []>} : vector<16x128xbf16>, vector<128x512xbf16>, vector<16x512xf32> -> vector<16x512xf32>
    %56 = arith.addf %51, %55 : vector<16x512xf32>
    %c2_65 = arith.constant 2 : index
    %c0_66 = arith.constant 0 : index
    %57 = vector.load %arg6[%c2_65, %c0_66] : memref<18x128xbf16, #tpu.memory_space<vmem>>, vector<16x128xbf16>
    %c2_67 = arith.constant 2 : index
    %c0_68 = arith.constant 0 : index
    %c0_69 = arith.constant 0 : index
    %58 = vector.load %arg2[%c2_67, %c0_68, %c0_69] : memref<3x128x512xbf16, #tpu.memory_space<vmem>>, vector<1x128x512xbf16>
    %59 = vector.shape_cast %58 : vector<1x128x512xbf16> to vector<128x512xbf16>
    %cst_70 = arith.constant dense<0.000000e+00> : vector<16x512xf32>
    %60 = tpu.matmul %57, %59, %cst_70 {dimension_numbers = #tpu.dot_dimension_numbers<[1], [0], [0], [1], [0, 0, 1, 1], [], []>} : vector<16x128xbf16>, vector<128x512xbf16>, vector<16x512xf32> -> vector<16x512xf32>
    %61 = arith.addf %56, %60 : vector<16x512xf32>
    %cst_71 = arith.constant 1.000000e-01 : f32
    %62 = vector.broadcast %cst_71 : f32 to vector<16x512xf32>
    %63 = arith.mulf %62, %61 : vector<16x512xf32>
    %64 = arith.subf %47, %63 : vector<16x512xf32>
    %cst_72 = arith.constant 0.00999999977 : f32
    %65 = vector.broadcast %cst_72 : f32 to vector<16x512xf32>
    %66 = arith.subf %64, %65 : vector<16x512xf32>
    %cst_73 = arith.constant 0.000000e+00 : f32
    %67 = vector.broadcast %cst_73 : f32 to vector<16x512xf32>
    %68 = arith.maximumf %66, %67 : vector<16x512xf32>
    %69 = arith.truncf %68 : vector<16x512xf32> to vector<16x512xbf16>
    %c1_74 = arith.constant 1 : index
    %c0_75 = arith.constant 0 : index
    %70 = vector.load %arg7[%c1_74, %c0_75] : memref<18x512xbf16, #tpu.memory_space<vmem>>, vector<16x512xbf16>
    tpu.vector_store %arg7[%c1_74, %c0_75], %69 {strides = array<i32>} : memref<18x512xbf16, #tpu.memory_space<vmem>>, vector<16x512xbf16>,
    %c0_76 = arith.constant 0 : index
    %c0_77 = arith.constant 0 : index
    %71 = vector.load %arg7[%c0_76, %c0_77] : memref<18x512xbf16, #tpu.memory_space<vmem>>, vector<16x512xbf16>
    %c0_78 = arith.constant 0 : index
    %c0_79 = arith.constant 0 : index
    %c0_80 = arith.constant 0 : index
    %72 = vector.load %arg3[%c0_78, %c0_79, %c0_80] : memref<3x512x128xbf16, #tpu.memory_space<vmem>>, vector<1x512x128xbf16>
    %73 = vector.shape_cast %72 : vector<1x512x128xbf16> to vector<512x128xbf16>
    %cst_81 = arith.constant dense<0.000000e+00> : vector<16x128xf32>
    %74 = tpu.matmul %71, %73, %cst_81 {dimension_numbers = #tpu.dot_dimension_numbers<[1], [0], [0], [1], [0, 0, 1, 1], [], []>} : vector<16x512xbf16>, vector<512x128xbf16>, vector<16x128xf32> -> vector<16x128xf32>
    %c1_82 = arith.constant 1 : index
    %c0_83 = arith.constant 0 : index
    %75 = vector.load %arg7[%c1_82, %c0_83] : memref<18x512xbf16, #tpu.memory_space<vmem>>, vector<16x512xbf16>
    %c1_84 = arith.constant 1 : index
    %c0_85 = arith.constant 0 : index
    %c0_86 = arith.constant 0 : index
    %76 = vector.load %arg3[%c1_84, %c0_85, %c0_86] : memref<3x512x128xbf16, #tpu.memory_space<vmem>>, vector<1x512x128xbf16>
    %77 = vector.shape_cast %76 : vector<1x512x128xbf16> to vector<512x128xbf16>
    %cst_87 = arith.constant dense<0.000000e+00> : vector<16x128xf32>
    %78 = tpu.matmul %75, %77, %cst_87 {dimension_numbers = #tpu.dot_dimension_numbers<[1], [0], [0], [1], [0, 0, 1, 1], [], []>} : vector<16x512xbf16>, vector<512x128xbf16>, vector<16x128xf32> -> vector<16x128xf32>
    %79 = arith.addf %74, %78 : vector<16x128xf32>
    %c2_88 = arith.constant 2 : index
    %c0_89 = arith.constant 0 : index
    %80 = vector.load %arg7[%c2_88, %c0_89] : memref<18x512xbf16, #tpu.memory_space<vmem>>, vector<16x512xbf16>
    %c2_90 = arith.constant 2 : index
    %c0_91 = arith.constant 0 : index
    %c0_92 = arith.constant 0 : index
    %81 = vector.load %arg3[%c2_90, %c0_91, %c0_92] : memref<3x512x128xbf16, #tpu.memory_space<vmem>>, vector<1x512x128xbf16>
    %82 = vector.shape_cast %81 : vector<1x512x128xbf16> to vector<512x128xbf16>
    %cst_93 = arith.constant dense<0.000000e+00> : vector<16x128xf32>
    %83 = tpu.matmul %80, %82, %cst_93 {dimension_numbers = #tpu.dot_dimension_numbers<[1], [0], [0], [1], [0, 0, 1, 1], [], []>} : vector<16x512xbf16>, vector<512x128xbf16>, vector<16x128xf32> -> vector<16x128xf32>
    %84 = arith.addf %79, %83 : vector<16x128xf32>
    %85 = arith.truncf %84 : vector<16x128xf32> to vector<16x128xbf16>
    %c1_94 = arith.constant 1 : index
    %c0_95 = arith.constant 0 : index
    %86 = vector.load %arg6[%c1_94, %c0_95] : memref<18x128xbf16, #tpu.memory_space<vmem>>, vector<16x128xbf16>
    tpu.vector_store %arg6[%c1_94, %c0_95], %85 {strides = array<i32>} : memref<18x128xbf16, #tpu.memory_space<vmem>>, vector<16x128xbf16>,
    %87 = arith.addf %68, %24 : vector<16x512xf32>
    %c0_96 = arith.constant 0 : index
    %c0_97 = arith.constant 0 : index
    %88 = vector.load %arg6[%c0_96, %c0_97] : memref<18x128xbf16, #tpu.memory_space<vmem>>, vector<16x128xbf16>
    %c0_98 = arith.constant 0 : index
    %c0_99 = arith.constant 0 : index
    %c0_100 = arith.constant 0 : index
    %89 = vector.load %arg2[%c0_98, %c0_99, %c0_100] : memref<3x128x512xbf16, #tpu.memory_space<vmem>>, vector<1x128x512xbf16>
    %90 = vector.shape_cast %89 : vector<1x128x512xbf16> to vector<128x512xbf16>
    %cst_101 = arith.constant dense<0.000000e+00> : vector<16x512xf32>
    %91 = tpu.matmul %88, %90, %cst_101 {dimension_numbers = #tpu.dot_dimension_numbers<[1], [0], [0], [1], [0, 0, 1, 1], [], []>} : vector<16x128xbf16>, vector<128x512xbf16>, vector<16x512xf32> -> vector<16x512xf32>
    %c1_102 = arith.constant 1 : index
    %c0_103 = arith.constant 0 : index
    %92 = vector.load %arg6[%c1_102, %c0_103] : memref<18x128xbf16, #tpu.memory_space<vmem>>, vector<16x128xbf16>
    %c1_104 = arith.constant 1 : index
    %c0_105 = arith.constant 0 : index
    %c0_106 = arith.constant 0 : index
    %93 = vector.load %arg2[%c1_104, %c0_105, %c0_106] : memref<3x128x512xbf16, #tpu.memory_space<vmem>>, vector<1x128x512xbf16>
    %94 = vector.shape_cast %93 : vector<1x128x512xbf16> to vector<128x512xbf16>
    %cst_107 = arith.constant dense<0.000000e+00> : vector<16x512xf32>
    %95 = tpu.matmul %92, %94, %cst_107 {dimension_numbers = #tpu.dot_dimension_numbers<[1], [0], [0], [1], [0, 0, 1, 1], [], []>} : vector<16x128xbf16>, vector<128x512xbf16>, vector<16x512xf32> -> vector<16x512xf32>
    %96 = arith.addf %91, %95 : vector<16x512xf32>
    %c2_108 = arith.constant 2 : index
    %c0_109 = arith.constant 0 : index
    %97 = vector.load %arg6[%c2_108, %c0_109] : memref<18x128xbf16, #tpu.memory_space<vmem>>, vector<16x128xbf16>
    %c2_110 = arith.constant 2 : index
    %c0_111 = arith.constant 0 : index
    %c0_112 = arith.constant 0 : index
    %98 = vector.load %arg2[%c2_110, %c0_111, %c0_112] : memref<3x128x512xbf16, #tpu.memory_space<vmem>>, vector<1x128x512xbf16>
    %99 = vector.shape_cast %98 : vector<1x128x512xbf16> to vector<128x512xbf16>
    %cst_113 = arith.constant dense<0.000000e+00> : vector<16x512xf32>
    %100 = tpu.matmul %97, %99, %cst_113 {dimension_numbers = #tpu.dot_dimension_numbers<[1], [0], [0], [1], [0, 0, 1, 1], [], []>} : vector<16x128xbf16>, vector<128x512xbf16>, vector<16x512xf32> -> vector<16x512xf32>
    %101 = arith.addf %96, %100 : vector<16x512xf32>
    %cst_114 = arith.constant 1.000000e-01 : f32
    %102 = vector.broadcast %cst_114 : f32 to vector<16x512xf32>
    %103 = arith.mulf %102, %101 : vector<16x512xf32>
    %104 = arith.subf %87, %103 : vector<16x512xf32>
    %cst_115 = arith.constant 0.00999999977 : f32
    %105 = vector.broadcast %cst_115 : f32 to vector<16x512xf32>
    %106 = arith.subf %104, %105 : vector<16x512xf32>
    %cst_116 = arith.constant 0.000000e+00 : f32
    %107 = vector.broadcast %cst_116 : f32 to vector<16x512xf32>
    %108 = arith.maximumf %106, %107 : vector<16x512xf32>
    %c0_117 = arith.constant 0 : index
    %c0_118 = arith.constant 0 : index
    %c0_119 = arith.constant 0 : index
    %109 = vector.load %arg4[%c0_117, %c0_118, %c0_119] : memref<1x16x512xf32, #tpu.memory_space<vmem>>, vector<1x16x512xf32>
    %110 = vector.shape_cast %109 : vector<1x16x512xf32> to vector<16x512xf32>
    %111 = vector.shape_cast %108 : vector<16x512xf32> to vector<1x16x512xf32>
    tpu.vector_store %arg4[%c0_117, %c0_118, %c0_119], %111 {strides = array<i32>} : memref<1x16x512xf32, #tpu.memory_space<vmem>>, vector<1x16x512xf32>,
    %112 = math.absf %108 : vector<16x512xf32>
    %113 = vector.shape_cast %112 : vector<16x512xf32> to vector<1x16x512xf32>
    %cst_120 = arith.constant dense<0.000000e+00> : vector<1xf32>
    %114 = vector.multi_reduction <add>, %113, %cst_120 [1, 2] : vector<1x16x512xf32> to vector<1xf32>
    %115 = vector.shape_cast %114 : vector<1xf32> to vector<1x1x1xf32>
    %116 = vector.extract %115[0, 0, 0] : f32 from vector<1x1x1xf32>
    %117 = vector.broadcast %116 : f32 to vector<1x1x128xf32>
    %c0_121 = arith.constant 0 : index
    %c0_122 = arith.constant 0 : index
    %c0_123 = arith.constant 0 : index
    %118 = vector.load %arg5[%c0_121, %c0_122, %c0_123] : memref<1x1x128xf32, #tpu.memory_space<vmem>>, vector<1x1x128xf32>
    tpu.vector_store %arg5[%c0_121, %c0_122, %c0_123], %117 {strides = array<i32>} : memref<1x1x128xf32, #tpu.memory_space<vmem>>, vector<1x1x128xf32>,
    return
  }
  func.func @transform_0(%arg0: i32) -> (i32, i32, i32) {
    %c0_i32 = arith.constant 0 : i32
    %c0_i32_0 = arith.constant 0 : i32
    %c0_i32_1 = arith.constant 0 : i32
    return %arg0, %c0_i32, %c0_i32_0 : i32, i32, i32
  }
  func.func @transform_1(%arg0: i32) -> (i32, i32, i32) {
    %c0_i32 = arith.constant 0 : i32
    %c0_i32_0 = arith.constant 0 : i32
    %c0_i32_1 = arith.constant 0 : i32
    %c0_i32_2 = arith.constant 0 : i32
    return %c0_i32, %c0_i32_0, %c0_i32_1 : i32, i32, i32
  }
  func.func @transform_2(%arg0: i32) -> (i32, i32, i32) {
    %c0_i32 = arith.constant 0 : i32
    %c0_i32_0 = arith.constant 0 : i32
    %c0_i32_1 = arith.constant 0 : i32
    %c0_i32_2 = arith.constant 0 : i32
    return %c0_i32, %c0_i32_0, %c0_i32_1 : i32, i32, i32
  }
  func.func @transform_3(%arg0: i32) -> (i32, i32, i32) {
    %c0_i32 = arith.constant 0 : i32
    %c0_i32_0 = arith.constant 0 : i32
    %c0_i32_1 = arith.constant 0 : i32
    return %arg0, %c0_i32, %c0_i32_0 : i32, i32, i32
  }
  func.func @transform_4(%arg0: i32) -> (i32, i32, i32) {
    %c0_i32 = arith.constant 0 : i32
    %c0_i32_0 = arith.constant 0 : i32
    %c0_i32_1 = arith.constant 0 : i32
    return %arg0, %c0_i32, %c0_i32_0 : i32, i32, i32
  }
}

</mosaic_0001>

<bundles_post_ra>
// kernel: dict_conv2d_forward.1
= control target key start
LH: loop header
LB: loop body
LE: loop exit
PB: predicated region body
PF: predicated region fallthrough
CT: control target
= control target key end

     0   :  { %s7621_s15 = smov 0   ;;  %s9510_s0 = inlined_call_operand.vmem [shape: bf16[2,16,128], index: 0, kind: input, shape index: {}]   ;;  %s9511_s1 = inlined_call_operand.vmem [shape: bf16[3,128,512], index: 1, kind: input, shape index: {}]   ;;  %s9512_s2 = inlined_call_operand.vmem [shape: bf16[3,512,128], index: 2, kind: input, shape index: {}]   ;;  %s9513_s3 = inlined_call_operand.vmem [shape: f32[2,16,512], index: 3, kind: output, shape index: {0}]   ;;  %s9514_s4 = inlined_call_operand.vmem [shape: f32[2,1,128], index: 4, kind: output, shape index: {1}]  }
   0x1 LB: > { %s5601_s16 = sadd.s32 4294967295, %s7593_s15   ;;  %p5605_p0 = scmp.ge.s32.totalorder %s7593_s15, 1  ;;  %s7593_s15 = sphi %s7621_s15, %s15_s15  }
   0x2   : > { %p165_p1 = scmp.lt.s32.totalorder %s7593_s15, 3 }
   0x4   : > { %p166_p2 = pnand %p5605_p0, %p165_p1 }
   0x5   : > { %v6946_v0 = vld [vmem:[%s9511_s1 + $0x104] ss:$16 sps:$4 sm:$0xff] (!%p166_p2)   ;;  %v6948_v1 = vld [vmem:[%s9511_s1 + $0x10c] ss:$16 sps:$4 sm:$0xff] (!%p166_p2)   ;;  %v7595_v2 = vmov (!%p166_p2), 0   ;;  %p194_p3 = scmp.lt.s32.totalorder (!%p166_p2), %s5601_s16, 1 }
   0x6   : > { %169 = sbr.rel (%p166_p2) target bundleno = 1800 (0x708), region = 32  ;;  %553 = vmatprep.mubr.bf16.mxu0 (!%p166_p2), %v7595_v2  ;;  %596 = vmatprep.mubr.bf16.mxu1 (!%p166_p2), %v7595_v2  ;;  %v6950_v3 = vld [vmem:[%s9511_s1 + $0x100] ss:$16 sps:$4 sm:$0xff] (!%p166_p2)   ;;  %v6951_v4 = vld [vmem:[%s9511_s1 + $0x108] ss:$16 sps:$4 sm:$0xff] (!%p166_p2)   ;;  %vm208_vm1 = vcmask (!%p166_p2), 1040384  }
   0x7   : > { %521 = vmatprep.subr.bf16.mxu0 (!%p166_p2), %v6946_v0  ;;  %564 = vmatprep.subr.bf16.mxu1 (!%p166_p2), %v6948_v1  ;;  %v6952_v5 = vld [vmem:[%s9511_s1 + $0x124] ss:$16 sps:$4 sm:$0xff] (!%p166_p2)   ;;  %v6954_v6 = vld [vmem:[%s9511_s1 + $0x12c] ss:$16 sps:$4 sm:$0xff] (!%p166_p2)   ;;  %v6956_v7 = vld [vmem:[%s9511_s1 + $0x120] ss:$16 sps:$4 sm:$0xff] (!%p166_p2)  }
   0x8   : > { %522 = vmatpush1.bf16.msra.mxu0 (!%p166_p2), %v6950_v3  ;;  %565 = vmatpush1.bf16.msra.mxu1 (!%p166_p2), %v6951_v4  ;;  %v6957_v8 = vld [vmem:[%s9511_s1 + $0x128] ss:$16 sps:$4 sm:$0xff] (!%p166_p2)   ;;  %v6958_v9 = vld [vmem:[%s9511_s1 + $0x144] ss:$16 sps:$4 sm:$0xff] (!%p166_p2)   ;;  %v6960_v10 = vld [vmem:[%s9511_s1 + $0x14c] ss:$16 sps:$4 sm:$0xff] (!%p166_p2)  }
   0x9   : > { %523 = vmatprep.subr.bf16.mxu0 (!%p166_p2), %v6952_v5  ;;  %566 = vmatprep.subr.bf16.mxu1 (!%p166_p2), %v6954_v6  ;;  %v6962_v11 = vld [vmem:[%s9511_s1 + $0x140] ss:$16 sps:$4 sm:$0xff] (!%p166_p2)   ;;  %v6963_v12 = vld [vmem:[%s9511_s1 + $0x148] ss:$16 sps:$4 sm:$0xff] (!%p166_p2)   ;;  %v6964_v13 = vld [vmem:[%s9511_s1 + $0x164] ss:$16 sps:$4 sm:$0xff] (!%p166_p2)  }
   0xa   : > { %v6966_v14 = vld [vmem:[%s9511_s1 + $0x16c] ss:$16 sps:$4 sm:$0xff] (!%p166_p2)   ;;  %v6968_v15 = vld [vmem:[%s9511_s1 + $0x160] ss:$16 sps:$4 sm:$0xff] (!%p166_p2)   ;;  %v6969_v16 = vld [vmem:[%s9511_s1 + $0x168] ss:$16 sps:$4 sm:$0xff] (!%p166_p2)  }
   0xb   : > { %v6970_v17 = vld [vmem:[%s9511_s1 + $0x184] ss:$16 sps:$4 sm:$0xff] (!%p166_p2)   ;;  %v6972_v18 = vld [vmem:[%s9511_s1 + $0x18c] ss:$16 sps:$4 sm:$0xff] (!%p166_p2)   ;;  %v6974_v19 = vld [vmem:[%s9511_s1 + $0x180] ss:$16 sps:$4 sm:$0xff] (!%p166_p2)  }
   0xc   : > { %524 = vmatpush1.bf16.msra.mxu0 (!%p166_p2), %v6956_v7  ;;  %567 = vmatpush1.bf16.msra.mxu1 (!%p166_p2), %v6957_v8  ;;  %v6975_v20 = vld [vmem:[%s9511_s1 + $0x188] ss:$16 sps:$4 sm:$0xff] (!%p166_p2)   ;;  %v6976_v21 = vld [vmem:[%s9511_s1 + $0x1a4] ss:$16 sps:$4 sm:$0xff] (!%p166_p2)   ;;  %v6978_v22 = vld [vmem:[%s9511_s1 + $0x1ac] ss:$16 sps:$4 sm:$0xff] (!%p166_p2)  }
   0xd   : > { %525 = vmatprep.subr.bf16.mxu0 %v6958_v9  ;;  %568 = vmatprep.subr.bf16.mxu1 %v6960_v10  ;;  %s9550_s16 = smov (!%p194_p3, %s5601_s16), 1  ;;  %vm209_vm0 = vsmask.f32 256  ;;  %v6980_v23 = vld [vmem:[%s9511_s1 + $0x1a0] ss:$16 sps:$4 sm:$0xff]   ;;  %vm262_vm6 = vcmask 1043456  }
   0xe   : > { %s6609_s13 = sshll.u32 %s9550_s16, 3  ;;  %v6981_v24 = vld [vmem:[%s9511_s1 + $0x1a8] ss:$16 sps:$4 sm:$0xff]   ;;  %v6982_v25 = vld [vmem:[%s9511_s1 + $0x1c4] ss:$16 sps:$4 sm:$0xff]   ;;  %vm7733_vm3 = vmand %vm208_vm1, %vm209_vm0  ;;  %vm891_vm10 = vcmask 1046528   ;;  %s206_s27 = scalar_lea.vmem %s9514_s4, %s9550_s16 }
   0xf   : > { %v6984_v26 = vld [vmem:[%s9511_s1 + $0x1cc] ss:$16 sps:$4 sm:$0xff]   ;;  %vm214_vm2 = vsmask.f32 7938  ;;  %v6986_v27 = vld [vmem:[%s9511_s1 + $0x1c0] ss:$16 sps:$4 sm:$0xff]   ;;  %s198_s28 = scalar_lea.vmem %s9510_s0, %s6609_s13 }
  0x10   : > { %526 = vmatpush1.bf16.msra.mxu0 %v6962_v11  ;;  %569 = vmatpush1.bf16.msra.mxu1 %v6963_v12  ;;  %v6987_v28 = vld [vmem:[%s9511_s1 + $0x1c8] ss:$16 sps:$4 sm:$0xff]   ;;  %v6988_v29 = vld [vmem:[%s9511_s1 + $0x1e4] ss:$16 sps:$4 sm:$0xff]   ;;  %v6990_v30 = vld [vmem:[%s9511_s1 + $0x1ec] ss:$16 sps:$4 sm:$0xff]  }
  0x11   : > { %527 = vmatprep.subr.bf16.mxu0 %v6964_v13  ;;  %570 = vmatprep.subr.bf16.mxu1 %v6966_v14  ;;  %v211_v32 = vld [vmem:[#allocation2] sm:$0x1]  ;;  %v216_v33 = vld [vmem:[#allocation2 + $0x8] sm:$0x1]  ;;  %vm240_vm4 = vsmask.f32 4368  ;;  %vm7741_vm5 = vmand %vm208_vm1, %vm214_vm2 }
  0x12   : > { %v212_v34 = vsel %vm7733_vm3, 0, %v211_v32  ;;  %v238_v36 = vld [vmem:[%s198_s28] sm:$0xf]  ;;  %v239_v37 = vld [vmem:[%s198_s28 + $0x4] sm:$0xf]  ;;  %v217_v39 = vsel %vm7741_vm5, 0, %v216_v33  ;;  %vm7761_vm7 = vmor %vm209_vm0, %vm240_vm4 }
  0x13   : > { %v6992_v38 = vld [vmem:[%s9511_s1 + $0x1e0] ss:$16 sps:$4 sm:$0xff]   ;;  %213 = vst [vmem:[#allocation2] sm:$0x1] %v212_v34  ;;  %v243_v40 = vshrl.u32 %v238_v36, 16  ;;  %v246_v41 = vshll.u32 %v238_v36, 16  ;;  %vm7766_vm8 = vmand %vm262_vm6, %vm214_vm2 }
  0x14   : > { %528 = vmatpush1.bf16.msra.mxu0 %v6968_v15  ;;  %571 = vmatpush1.bf16.msra.mxu1 %v6969_v16  ;;  %v251_v42 = vshrl.u32 %v239_v37, 16  ;;  %v6993_v43 = vld [vmem:[%s9511_s1 + $0x1e8] ss:$16 sps:$4 sm:$0xff]   ;;  %v6996_v44 = vld [vmem:[%s9511_s1 + $0x4] ss:$16 sps:$4 sm:$0xff]   ;;  %v254_v45 = vshll.u32 %v239_v37, 16 }
  0x15   : > { %529 = vmatprep.subr.bf16.mxu0 %v6970_v17  ;;  %572 = vmatprep.subr.bf16.mxu1 %v6972_v18  ;;  %218 = vst [vmem:[#allocation2 + $0x8] sm:$0x1] %v217_v39  ;;  %v6999_v46 = vld [vmem:[%s9511_s1 + $0xc] ss:$16 sps:$4 sm:$0xff]   ;;  %v245_v47 = vrot.slane %v243_v40, 7  ;;  %vm219_vm11 = vcmask 1044484  }
  0x16   : > { %v253_v48 = vrot.slane %v251_v42, 7  ;;  %v6994_v6 = vld [vmem:[%s9511_s1] ss:$16 sps:$4 sm:$0xff]   ;;  %vm347_vm9 = vsmask.f32 7424  ;;  %vm1234_vm2 = vcmask 1047556  }
  0x17   : > { %v248_v50 = vor.u32 %v246_v41, %v245_v47  ;;  %v249_v51 = vrot.slane %v245_v47, 4  ;;  %v6997_v7 = vld [vmem:[%s9511_s1 + $0x8] ss:$16 sps:$4 sm:$0xff]   ;;  %v7004_v9 = vld [vmem:[%s9511_s1 + $0x24] ss:$16 sps:$4 sm:$0xff]   ;;  %s6610_s21 = sshll.u32 %s9550_s16, 6 }
  0x18   : > { %530 = vmatpush1.bf16.msra.mxu0 %v6974_v19  ;;  %573 = vmatpush1.bf16.msra.mxu1 %v6975_v20  ;;  %v256_v52 = vor.u32 %v254_v45, %v253_v48  ;;  %v258_v53 = vrot.slane %v253_v48, 4  ;;  %v7007_v10 = vld [vmem:[%s9511_s1 + $0x2c] ss:$16 sps:$4 sm:$0xff]   ;;  %v7002_v12 = vld [vmem:[%s9511_s1 + $0x20] ss:$16 sps:$4 sm:$0xff]   ;;  %s203_s24 = scalar_lea.vmem %s9513_s3, %s6610_s21 }
  0x19   : > { %531 = vmatprep.subr.bf16.mxu0 %v6976_v21  ;;  %574 = vmatprep.subr.bf16.mxu1 %v6978_v22  ;;  %v7005_v13 = vld [vmem:[%s9511_s1 + $0x28] ss:$16 sps:$4 sm:$0xff]   ;;  %v7010_v14 = vld [vmem:[%s9511_s1 + $0x44] ss:$16 sps:$4 sm:$0xff]   ;;  %v7013_v15 = vld [vmem:[%s9511_s1 + $0x4c] ss:$16 sps:$4 sm:$0xff]  }
  0x1a   : > { %v257_v55 = vsel %vm7761_vm7, %v249_v51, %v256_v52  ;;  %v264_v56 = vld [vmem:[#allocation2] sm:$0xf]  ;;  %v7011_v17 = vld [vmem:[%s9511_s1 + $0x48] ss:$16 sps:$4 sm:$0xff]   ;;  %v7016_v18 = vld [vmem:[%s9511_s1 + $0x64] ss:$16 sps:$4 sm:$0xff]  }
  0x1b   : > { %267 = vst [vmem:[#allocation2 + $0x4] sm:$0xf] %v257_v55  ;;  %v265_v57 = vsel %vm7766_vm8, %v248_v50, %v264_v56  ;;  %v7008_v16 = vld [vmem:[%s9511_s1 + $0x40] ss:$16 sps:$4 sm:$0xff]   ;;  %v7019_v19 = vld [vmem:[%s9511_s1 + $0x6c] ss:$16 sps:$4 sm:$0xff]  }
  0x1c   : > { %532 = vmatpush1.bf16.msra.mxu0 %v6980_v23  ;;  %575 = vmatpush1.bf16.msra.mxu1 %v6981_v24  ;;  %v268_v58 = vld [vmem:[#allocation2 + $0x8] sm:$0x1]  ;;  %266 = vst [vmem:[#allocation2] sm:$0xf] %v265_v57  ;;  %v7014_v20 = vld [vmem:[%s9511_s1 + $0x60] ss:$16 sps:$4 sm:$0xff]  }
  0x1d   : > { %533 = vmatprep.subr.bf16.mxu0 %v6982_v25  ;;  %576 = vmatprep.subr.bf16.mxu1 %v6984_v26  ;;  %v269_v59 = vsel %vm7733_vm3, %v258_v53, %v268_v58  ;;  %v7017_v21 = vld [vmem:[%s9511_s1 + $0x68] ss:$16 sps:$4 sm:$0xff]   ;;  %v7022_v22 = vld [vmem:[%s9511_s1 + $0x84] ss:$16 sps:$4 sm:$0xff]   ;;  %v7025_v23 = vld [vmem:[%s9511_s1 + $0x8c] ss:$16 sps:$4 sm:$0xff]  }
  0x1e   : > { %270 = vst [vmem:[#allocation2 + $0x8] sm:$0x1] %v269_v59  ;;  %v7020_v24 = vld [vmem:[%s9511_s1 + $0x80] ss:$16 sps:$4 sm:$0xff]   ;;  %v7023_v25 = vld [vmem:[%s9511_s1 + $0x88] ss:$16 sps:$4 sm:$0xff]  }
  0x1f   : > { %v7028_v26 = vld [vmem:[%s9511_s1 + $0xa4] ss:$16 sps:$4 sm:$0xff]   ;;  %v7037_v32 = vld [vmem:[%s9511_s1 + $0xcc] ss:$16 sps:$4 sm:$0xff]   ;;  %v7032_v37 = vld [vmem:[%s9511_s1 + $0xc0] ss:$16 sps:$4 sm:$0xff]  }
  0x20   : > { %534 = vmatpush1.bf16.msra.mxu0 %v6986_v27  ;;  %577 = vmatpush1.bf16.msra.mxu1 %v6987_v28  ;;  %v7031_v27 = vld [vmem:[%s9511_s1 + $0xac] ss:$16 sps:$4 sm:$0xff]   ;;  %v7026_v28 = vld [vmem:[%s9511_s1 + $0xa0] ss:$16 sps:$4 sm:$0xff]   ;;  %v7040_v39 = vld [vmem:[%s9511_s1 + $0xe4] ss:$16 sps:$4 sm:$0xff]  }
  0x21   : > { %535 = vmatprep.subr.bf16.mxu0 %v6988_v29  ;;  %578 = vmatprep.subr.bf16.mxu1 %v6990_v30  ;;  %v7029_v29 = vld [vmem:[%s9511_s1 + $0xa8] ss:$16 sps:$4 sm:$0xff]   ;;  %v7034_v30 = vld [vmem:[%s9511_s1 + $0xc4] ss:$16 sps:$4 sm:$0xff]   ;;  %v7043_v40 = vld [vmem:[%s9511_s1 + $0xec] ss:$16 sps:$4 sm:$0xff]  }
  0x22   : > { %v7776_v60 = vld [vmem:[#allocation2 + $0x4] sm:$0xf]  ;;  %v7038_v42 = vld [vmem:[%s9511_s1 + $0xe0] ss:$16 sps:$4 sm:$0xff]   ;;  %v7049_v45 = vld [vmem:[%s9511_s1 + $0x20c] ss:$16 sps:$4 sm:$0xff]  }
  0x23   : > { %v271_v61 = vld [vmem:[#allocation2] sm:$0xf]  ;;  %v7047_v47 = vld [vmem:[%s9511_s1 + $0x208] ss:$16 sps:$4 sm:$0xff]   ;;  %v7052_v48 = vld [vmem:[%s9511_s1 + $0x224] ss:$16 sps:$4 sm:$0xff]  }
  0x24   : > { %536 = vmatpush1.bf16.msra.mxu0 %v6992_v38  ;;  %579 = vmatpush1.bf16.msra.mxu1 %v6993_v43  ;;  %v7779_v62 = vcombine.low %v271_v61, %v7776_v60  ;;  %v854_v33 = vld [vmem:[#allocation2] sm:$0xe]  ;;  %v7035_v38 = vld [vmem:[%s9511_s1 + $0xc8] ss:$16 sps:$4 sm:$0xff]   ;;  %v7055_v50 = vld [vmem:[%s9511_s1 + $0x22c] ss:$16 sps:$4 sm:$0xff]  }
  0x25   : > { %768 = vmatprep.subr.bf16.mxu0 %v6996_v44  ;;  %811 = vmatprep.subr.bf16.mxu1 %v6999_v46  ;;  %v7781_v63 = vld [vmem:[#allocation2 + $0x8] ss:$0 sps:$4 sm:$0x11]   ;;  %v5740_v36 = vcombine.low %v854_v33, %v7776_v60  ;;  %v7046_v44 = vld [vmem:[%s9511_s1 + $0x204] ss:$16 sps:$4 sm:$0xff]  }
  0x26   : > { %v349_v0 = vshrl.u32 %v7779_v62, 16  ;;  %v351_v1 = vshll.u32 %v7779_v62, 16  ;;  %v356_v3 = vshll.u32 %v7781_v63, 16  ;;  %v893_v34 = vrot.slane %v7781_v63, 1  ;;  %v7041_v43 = vld [vmem:[%s9511_s1 + $0xe8] ss:$16 sps:$4 sm:$0xff]  }
  0x27   : > { %v7875_v41 = vrot.slane %v5740_v36, 1  ;;  %v7044_v46 = vld [vmem:[%s9511_s1 + $0x200] ss:$16 sps:$4 sm:$0xff]   ;;  %v7053_v52 = vld [vmem:[%s9511_s1 + $0x228] ss:$16 sps:$4 sm:$0xff]  }
  0x28   : > { %v353_v4 = vrot.slane %v351_v1, 1  ;;  %v358_v5 = vrot.slane %v356_v3, 1  ;;  %v7050_v51 = vld [vmem:[%s9511_s1 + $0x220] ss:$16 sps:$4 sm:$0xff]   ;;  %v7058_v53 = vld [vmem:[%s9511_s1 + $0x244] ss:$16 sps:$4 sm:$0xff]  }
  0x29   : > { %v7061_v55 = vld [vmem:[%s9511_s1 + $0x24c] ss:$16 sps:$4 sm:$0xff]   ;;  %v7056_v56 = vld [vmem:[%s9511_s1 + $0x240] ss:$16 sps:$4 sm:$0xff]   ;;  %v7059_v57 = vld [vmem:[%s9511_s1 + $0x248] ss:$16 sps:$4 sm:$0xff]  }
  0x2a   : > { %v354_v8 = vor.u32 %v353_v4, %v349_v0  ;;  %v7064_v58 = vld [vmem:[%s9511_s1 + $0x264] ss:$16 sps:$4 sm:$0xff]   ;;  %v7067_v59 = vld [vmem:[%s9511_s1 + $0x26c] ss:$16 sps:$4 sm:$0xff]   ;;  %v7062_v60 = vld [vmem:[%s9511_s1 + $0x260] ss:$16 sps:$4 sm:$0xff]  }
  0x2b   : > { %v7065_v61 = vld [vmem:[%s9511_s1 + $0x268] ss:$16 sps:$4 sm:$0xff]   ;;  %v7073_v0 = vld [vmem:[%s9511_s1 + $0x28c] ss:$16 sps:$4 sm:$0xff]   ;;  %v7068_v1 = vld [vmem:[%s9511_s1 + $0x280] ss:$16 sps:$4 sm:$0xff]  }
  0x2c   : > { %v359_v11 = vsel %vm347_vm9, %v354_v8, %v358_v5  ;;  %v7071_v3 = vld [vmem:[%s9511_s1 + $0x288] ss:$16 sps:$4 sm:$0xff]   ;;  %v7076_v4 = vld [vmem:[%s9511_s1 + $0x2a4] ss:$16 sps:$4 sm:$0xff]   ;;  %v7079_v5 = vld [vmem:[%s9511_s1 + $0x2ac] ss:$16 sps:$4 sm:$0xff]  }
  0x2d   : > { %554 = vmatmul.mubr.bf16.vlgmr.msra.gmra.mrb[0].mxu0 %v359_v11  ;;  %597 = vmatmul.mubr.bf16.vlgmr.msra.gmra.mrb[0].mxu1 %v359_v11  ;;  %v7082_v8 = vld [vmem:[%s9511_s1 + $0x2c4] ss:$16 sps:$4 sm:$0xff]   ;;  %v7083_v11 = vld [vmem:[%s9511_s1 + $0x2c8] ss:$16 sps:$4 sm:$0xff]   ;;  %vm220_vm12 = vsmask.f32 4352 }
  0x2e   : > { %769 = vmatpush1.bf16.msra.mxu0 %v6994_v6  ;;  %812 = vmatpush1.bf16.msra.mxu1 %v6997_v7  ;;  %v7074_v6 = vld [vmem:[%s9511_s1 + $0x2a0] ss:$16 sps:$4 sm:$0xff]   ;;  %v7077_v7 = vld [vmem:[%s9511_s1 + $0x2a8] ss:$16 sps:$4 sm:$0xff]   ;;  %vm221_vm13 = vmand %vm219_vm11, %vm220_vm12  ;;  %vm229_vm14 = vsmask.f32 7954 }
  0x2f   : > { %770 = vmatprep.subr.bf16.mxu0 %v7004_v9  ;;  %813 = vmatprep.subr.bf16.mxu1 %v7007_v10  ;;  %v7085_v9 = vld [vmem:[%s9511_s1 + $0x2cc] ss:$16 sps:$4 sm:$0xff]   ;;  %v7080_v10 = vld [vmem:[%s9511_s1 + $0x2c0] ss:$16 sps:$4 sm:$0xff]   ;;  %vm8001_vm15 = vmor %vm221_vm13, %vm7733_vm3 }
  0x30   : > { %800 = vmatprep.mubr.bf16.mxu0 %v7595_v2  ;;  %843 = vmatprep.mubr.bf16.mxu1 %v7595_v2  ;;  %v7096_v63 = vld [vmem:[%s9512_s2 + $0x180] sm:$0xff]   ;;  %vm8008_vm0 = vmand %vm219_vm11, %vm229_vm14  ;;  %v235_v35 = vld [vmem:[#allocation3 + $0x28] sm:$0x11] }
  0x31   : > { %vm231_vm1 = vmor %vm8008_vm0, %vm7741_vm5  ;;  %v7101_v33 = vld [vmem:[%s9512_s2 + $0x150] sm:$0xff]  }
  0x32   : > { %771 = vmatpush1.bf16.msra.mxu0 %v7002_v12  ;;  %814 = vmatpush1.bf16.msra.mxu1 %v7005_v13  ;;  %v7088_v12 = vld [vmem:[%s9511_s1 + $0x2e4] ss:$16 sps:$4 sm:$0xff]   ;;  %v7091_v13 = vld [vmem:[%s9511_s1 + $0x2ec] ss:$16 sps:$4 sm:$0xff]   ;;  %v236_v36 = vsel %vm231_vm1, 0, %v235_v35  ;;  %vm1235_vm4 = vmand %vm1234_vm2, %vm229_vm14 }
  0x33   : > { %772 = vmatprep.subr.bf16.mxu0 %v7010_v14  ;;  %815 = vmatprep.subr.bf16.mxu1 %v7013_v15  ;;  %v7086_v14 = vld [vmem:[%s9511_s1 + $0x2e0] ss:$16 sps:$4 sm:$0xff]   ;;  %v7089_v15 = vld [vmem:[%s9511_s1 + $0x2e8] ss:$16 sps:$4 sm:$0xff]   ;;  %237 = vst [vmem:[#allocation3 + $0x28] sm:$0x11] %v236_v36  ;;  %vm8167_vm5 = vmor %vm1235_vm4, %vm7766_vm8 }
  0x36   : > { %773 = vmatpush1.bf16.msra.mxu0 %v7008_v16  ;;  %816 = vmatpush1.bf16.msra.mxu1 %v7011_v17  ;;  %v894_v16 = vsel %vm891_vm10, %v7875_v41, %v893_v34  ;;  %v7093_v17 = vld [vmem:[%s9512_s2 + $0x140] sm:$0xff]   ;;  %v7102_v34 = vld [vmem:[%s9512_s2 + $0x1d0] sm:$0xff]   ;;  %v7107_v41 = vld [vmem:[%s9512_s2 + $0x118] sm:$0xff]  }
  0x37   : > { %774 = vmatprep.subr.bf16.mxu0 %v7016_v18  ;;  %817 = vmatprep.subr.bf16.mxu1 %v7019_v19  ;;  %v7094_v18 = vld [vmem:[%s9512_s2 + $0x1c0] sm:$0xff]  }
  0x38   : > { %v7095_v19 = vld [vmem:[%s9512_s2 + $0x100] sm:$0xff]  }
  0x3a   : > { %775 = vmatpush1.bf16.msra.mxu0 %v7014_v20  ;;  %818 = vmatpush1.bf16.msra.mxu1 %v7017_v21  ;;  %v223_v20 = vld [vmem:[#allocation3] sm:$0x11] }
  0x3b   : > { %776 = vmatprep.subr.bf16.mxu0 %v7022_v22  ;;  %819 = vmatprep.subr.bf16.mxu1 %v7025_v23  ;;  %v226_v22 = vld [vmem:[#allocation3 + $0x8] sm:$0x11]  ;;  %v224_v23 = vsel %vm8001_vm15, 0, %v223_v20 }
  0x3c   : > { %225 = vst [vmem:[#allocation3] sm:$0x11] %v224_v23 }
  0x3e   : > { %777 = vmatpush1.bf16.msra.mxu0 %v7020_v24  ;;  %820 = vmatpush1.bf16.msra.mxu1 %v7023_v25  ;;  %v227_v25 = vsel %vm8001_vm15, 0, %v226_v22 }
  0x3f   : > { %778 = vmatprep.subr.bf16.mxu0 %v7028_v26  ;;  %821 = vmatprep.subr.bf16.mxu1 %v7031_v27  ;;  %v7097_v26 = vld [vmem:[%s9512_s2 + $0x148] sm:$0xff]   ;;  %228 = vst [vmem:[#allocation3 + $0x8] sm:$0x11] %v227_v25 }
  0x40   : > { %v7098_v27 = vld [vmem:[%s9512_s2 + $0x1c8] sm:$0xff]  }
  0x42   : > { %779 = vmatpush1.bf16.msra.mxu0 %v7026_v28  ;;  %822 = vmatpush1.bf16.msra.mxu1 %v7029_v29  ;;  %v7099_v28 = vld [vmem:[%s9512_s2 + $0x108] sm:$0xff]  }
  0x43   : > { %780 = vmatprep.subr.bf16.mxu0 %v7034_v30  ;;  %823 = vmatprep.subr.bf16.mxu1 %v7037_v32  ;;  %v7100_v29 = vld [vmem:[%s9512_s2 + $0x188] sm:$0xff]  }
  0x44   : > { %v232_v30 = vld [vmem:[#allocation3 + $0x20] sm:$0x11] }
  0x45   : > { %v233_v32 = vsel %vm231_vm1, 0, %v232_v30 }
  0x46   : > { %781 = vmatpush1.bf16.msra.mxu0 %v7032_v37  ;;  %824 = vmatpush1.bf16.msra.mxu1 %v7035_v38  ;;  %234 = vst [vmem:[#allocation3 + $0x20] sm:$0x11] %v233_v32  ;;  %v7103_v37 = vld [vmem:[%s9512_s2 + $0x110] sm:$0xff]  }
  0x47   : > { %782 = vmatprep.subr.bf16.mxu0 %v7040_v39  ;;  %825 = vmatprep.subr.bf16.mxu1 %v7043_v40  ;;  %v7104_v38 = vld [vmem:[%s9512_s2 + $0x190] sm:$0xff]   ;;  %v7105_v39 = vld [vmem:[%s9512_s2 + $0x158] sm:$0xff]  }
  0x48   : > { %v7106_v40 = vld [vmem:[%s9512_s2 + $0x1d8] sm:$0xff]  }
  0x4a   : > { %783 = vmatpush1.bf16.msra.mxu0 %v7038_v42  ;;  %826 = vmatpush1.bf16.msra.mxu1 %v7041_v43  ;;  %v7108_v42 = vld [vmem:[%s9512_s2 + $0x198] sm:$0xff]   ;;  %v7109_v43 = vld [vmem:[%s9512_s2 + $0x160] sm:$0xff]  }
  0x4b   : > { %1056 = vmatprep.subr.bf16.mxu0 %v7046_v44  ;;  %1099 = vmatprep.subr.bf16.mxu1 %v7049_v45  ;;  %v7110_v44 = vld [vmem:[%s9512_s2 + $0x1e0] sm:$0xff]  }
  0x4c   : > { %v7111_v45 = vld [vmem:[%s9512_s2 + $0x120] sm:$0xff]  }
  0x4d   : > { %801 = vmatmul.mubr.bf16.vlgmr.msra.gmra.mrb[0].mxu0 %v7779_v62  ;;  %844 = vmatmul.mubr.bf16.vlgmr.msra.gmra.mrb[0].mxu1 %v7779_v62  ;;  %v7070_v62 = vld [vmem:[%s9511_s1 + $0x284] ss:$16 sps:$4 sm:$0xff]  }
  0x4e   : > { %1057 = vmatpush1.bf16.msra.mxu0 %v7044_v46  ;;  %1100 = vmatpush1.bf16.msra.mxu1 %v7047_v47  ;;  %v7112_v46 = vld [vmem:[%s9512_s2 + $0x1a0] sm:$0xff]   ;;  %v7113_v47 = vld [vmem:[%s9512_s2 + $0x168] sm:$0xff]  }
  0x4f   : > { %1058 = vmatprep.subr.bf16.mxu0 %v7052_v48  ;;  %1101 = vmatprep.subr.bf16.mxu1 %v7055_v50  ;;  %v7114_v48 = vld [vmem:[%s9512_s2 + $0x1e8] sm:$0xff]  }
  0x50   : > { %1088 = vmatprep.mubr.bf16.mxu0 %v7595_v2  ;;  %1131 = vmatprep.mubr.bf16.mxu1 %v7595_v2  ;;  %v7115_v50 = vld [vmem:[%s9512_s2 + $0x128] sm:$0xff]  }
  0x52   : > { %1059 = vmatpush1.bf16.msra.mxu0 %v7050_v51  ;;  %1102 = vmatpush1.bf16.msra.mxu1 %v7053_v52  ;;  %v7116_v51 = vld [vmem:[%s9512_s2 + $0x1a8] sm:$0xff]   ;;  %v7117_v52 = vld [vmem:[%s9512_s2 + $0x170] sm:$0xff]  }
  0x53   : > { %1060 = vmatprep.subr.bf16.mxu0 %v7058_v53  ;;  %1103 = vmatprep.subr.bf16.mxu1 %v7061_v55  ;;  %v7118_v53 = vld [vmem:[%s9512_s2 + $0x1f0] sm:$0xff]  }
  0x54   : > { %v7119_v55 = vld [vmem:[%s9512_s2 + $0x130] sm:$0xff]  }
  0x56   : > { %1061 = vmatpush1.bf16.msra.mxu0 %v7056_v56  ;;  %1104 = vmatpush1.bf16.msra.mxu1 %v7059_v57  ;;  %v7120_v56 = vld [vmem:[%s9512_s2 + $0x1b0] sm:$0xff]   ;;  %v7121_v57 = vld [vmem:[%s9512_s2 + $0x178] sm:$0xff]  }
  0x57   : > { %1062 = vmatprep.subr.bf16.mxu0 %v7064_v58  ;;  %1105 = vmatprep.subr.bf16.mxu1 %v7067_v59  ;;  %v7122_v58 = vld [vmem:[%s9512_s2 + $0x1f8] sm:$0xff]  }
  0x58   : > { %v7123_v59 = vld [vmem:[%s9512_s2 + $0x138] sm:$0xff]  }
  0x5a   : > { %1063 = vmatpush1.bf16.msra.mxu0 %v7062_v60  ;;  %1106 = vmatpush1.bf16.msra.mxu1 %v7065_v61  ;;  %v7124_v60 = vld [vmem:[%s9512_s2 + $0x1b8] sm:$0xff]   ;;  %v7127_v61 = vld [vmem:[%s9512_s2 + $0x40] sm:$0xff]  }
  0x5b   : > { %1064 = vmatprep.subr.bf16.mxu0 %v7070_v62  ;;  %1107 = vmatprep.subr.bf16.mxu1 %v7073_v0  ;;  %v7128_v62 = vld [vmem:[%s9512_s2 + $0xc0] sm:$0xff]  }
  0x5e   : > { %1065 = vmatpush1.bf16.msra.mxu0 %v7068_v1  ;;  %1108 = vmatpush1.bf16.msra.mxu1 %v7071_v3 }
  0x5f   : > { %1066 = vmatprep.subr.bf16.mxu0 %v7076_v4  ;;  %1109 = vmatprep.subr.bf16.mxu1 %v7079_v5 }
  0x62   : > { %1067 = vmatpush1.bf16.msra.mxu0 %v7074_v6  ;;  %1110 = vmatpush1.bf16.msra.mxu1 %v7077_v7 }
  0x63   : > { %1068 = vmatprep.subr.bf16.mxu0 %v7082_v8  ;;  %1111 = vmatprep.subr.bf16.mxu1 %v7085_v9 }
  0x66   : > { %1069 = vmatpush1.bf16.msra.mxu0 %v7080_v10  ;;  %1112 = vmatpush1.bf16.msra.mxu1 %v7083_v11 }
  0x67   : > { %1070 = vmatprep.subr.bf16.mxu0 %v7088_v12  ;;  %1113 = vmatprep.subr.bf16.mxu1 %v7091_v13 }
  0x6a   : > { %1071 = vmatpush1.bf16.msra.mxu0 %v7086_v14  ;;  %1114 = vmatpush1.bf16.msra.mxu1 %v7089_v15 }
  0x6b   : > { %6623 = vmatprep.subr.bf16.mxu0 %v7093_v17  ;;  %6645 = vmatprep.subr.bf16.mxu1 %v7094_v18 }
  0x6d   : > { %1089 = vmatmul.mubr.bf16.vlgmr.msra.gmra.mrb[0].mxu0 %v894_v16  ;;  %1132 = vmatmul.mubr.bf16.vlgmr.msra.gmra.mrb[0].mxu1 %v894_v16 }
  0x6e   : > { %6624 = vmatpush3.bf16.msra.mxu0 %v7095_v19  ;;  %6646 = vmatpush3.bf16.msra.mxu1 %v7096_v63 }
  0x6f   : > { %6625 = vmatprep.subr.bf16.mxu0 %v7097_v26  ;;  %6647 = vmatprep.subr.bf16.mxu1 %v7098_v27 }
  0x72   : > { %6626 = vmatpush3.bf16.msra.mxu0 %v7099_v28  ;;  %6648 = vmatpush3.bf16.msra.mxu1 %v7100_v29 }
  0x73   : > { %6627 = vmatprep.subr.bf16.mxu0 %v7101_v33  ;;  %6649 = vmatprep.subr.bf16.mxu1 %v7102_v34 }
  0x76   : > { %6628 = vmatpush3.bf16.msra.mxu0 %v7103_v37  ;;  %6650 = vmatpush3.bf16.msra.mxu1 %v7104_v38 }
  0x77   : > { %6629 = vmatprep.subr.bf16.mxu0 %v7105_v39  ;;  %6651 = vmatprep.subr.bf16.mxu1 %v7106_v40 }
  0x7a   : > { %6630 = vmatpush3.bf16.msra.mxu0 %v7107_v41  ;;  %6652 = vmatpush3.bf16.msra.mxu1 %v7108_v42 }
  0x7b   : > { %6631 = vmatprep.subr.bf16.mxu0 %v7109_v43  ;;  %6653 = vmatprep.subr.bf16.mxu1 %v7110_v44  ;;  %v1237_v43 = vld [vmem:[#allocation3] sm:$0xff]  ;;  %v1240_v44 = vld [vmem:[#allocation3 + $0x8] sm:$0xff] }
  0x7e   : > { %6632 = vmatpush3.bf16.msra.mxu0 %v7111_v45  ;;  %6654 = vmatpush3.bf16.msra.mxu1 %v7112_v46 }
  0x7f   : > { %6633 = vmatprep.subr.bf16.mxu0 %v7113_v47  ;;  %6655 = vmatprep.subr.bf16.mxu1 %v7114_v48 }
  0x82   : > { %6634 = vmatpush3.bf16.msra.mxu0 %v7115_v50  ;;  %6656 = vmatpush3.bf16.msra.mxu1 %v7116_v51 }
  0x83   : > { %6635 = vmatprep.subr.bf16.mxu0 %v7117_v52  ;;  %6657 = vmatprep.subr.bf16.mxu1 %v7118_v53 }
  0x86   : > { %6636 = vmatpush3.bf16.msra.mxu0 %v7119_v55  ;;  %6658 = vmatpush3.bf16.msra.mxu1 %v7120_v56 }
  0x87   : > { %6637 = vmatprep.subr.bf16.mxu0 %v7121_v57  ;;  %6659 = vmatprep.subr.bf16.mxu1 %v7122_v58 }
  0x8a   : > { %6638 = vmatpush3.bf16.msra.mxu0 %v7123_v59  ;;  %6660 = vmatpush3.bf16.msra.mxu1 %v7124_v60 }
  0x8b   : > { %6667 = vmatprep.subr.bf16.mxu0 %v7127_v61  ;;  %6689 = vmatprep.subr.bf16.mxu1 %v7128_v62  ;;  %v1245_v61 = vld [vmem:[#allocation3 + $0x20] sm:$0x11]  ;;  %v1248_v62 = vld [vmem:[#allocation3 + $0x28] sm:$0x11] }
 0x140   : > { %v1090_v0 = vpop.f32.mrb[0].mxu0  ;;  %v1133_v1 = vpop.f32.mrb[0].mxu1 }
 0x141   : > { %v8108_v3 = vmul.f32 0.1, %v1090_v0  ;;  %v8110_v4 = vmul.f32 0.1, %v1133_v1  ;;  %v1092_v5 = vpop.f32.mrb[1].mxu0  ;;  %v1135_v6 = vpop.f32.mrb[1].mxu1 }
 0x142   : > { %v8112_v7 = vmul.f32 0.1, %v1092_v5  ;;  %v8114_v8 = vmul.f32 0.1, %v1135_v6  ;;  %v1094_v9 = vpop.f32.mrb[2].mxu0  ;;  %v1137_v10 = vpop.f32.mrb[2].mxu1 }
 0x143   : > { %v8117_v11 = vadd.f32 -0.01, %v8108_v3  ;;  %v8120_v12 = vadd.f32 -0.01, %v8110_v4  ;;  %v8122_v13 = vmul.f32 0.1, %v1094_v9 }
 0x144   : > { %v8125_v14 = vadd.f32 -0.01, %v8112_v7  ;;  %v8128_v15 = vadd.f32 -0.01, %v8114_v8  ;;  %v8130_v16 = vmul.f32 0.1, %v1137_v10 }
 0x145   : > { %v1166_v17 = vmax.f32 %v8117_v11, 0.0  ;;  %v1168_v18 = vmax.f32 %v8120_v12, 0.0  ;;  %v8135_v19 = vadd.f32 -0.01, %v8122_v13  ;;  %v1096_v63 = vpop.f32.mrb[3].mxu0  ;;  %v1139_v20 = vpop.f32.mrb[3].mxu1 }
 0x146   : > { %v9520_v22 = vmax.f32 %v8125_v14, 0.0  ;;  %v9519_v23 = vmax.f32 %v8128_v15, 0.0  ;;  %v8140_v24 = vadd.f32 -0.01, %v8130_v16  ;;  %v8142_v25 = vmul.f32 0.1, %v1096_v63 }
 0x147   : > { %v8144_v26 = vmul.f32 0.1, %v1139_v20  ;;  %v9518_v30 = vmax.f32 %v8135_v19, 0.0  ;;  %v9541_v11 = vmax.f32 %v8135_v19, 0.0 }
 0x148   : > { %v6611_v27 = vpack.c.bf16 %v9520_v22, %v1166_v17  ;;  %v6612_v28 = vpack.c.bf16 %v9519_v23, %v1168_v18  ;;  %v8155_v29 = vadd.f32 -0.01, %v8142_v25  ;;  %v9517_v32 = vmax.f32 %v8140_v24, 0.0 }
 0x149   : > { %v8160_v35 = vadd.f32 -0.01, %v8144_v26  ;;  %v9542_v12 = vmax.f32 %v8140_v24, 0.0 }
 0x14a   : > { %v1195_v33 = vshrl.u32 %v6611_v27, 16  ;;  %v1202_v34 = vshrl.u32 %v6612_v28, 16  ;;  %v9516_v36 = vmax.f32 %v8155_v29, 0.0  ;;  %v1198_v39 = vshll.u32 %v6611_v27, 16 }
 0x14b   : > { %v9515_v37 = vmax.f32 %v8160_v35, 0.0  ;;  %v1205_v41 = vshll.u32 %v6612_v28, 16 }
 0x14c   : > { %v1197_v38 = vrot.slane %v1195_v33, 7  ;;  %v1204_v40 = vrot.slane %v1202_v34, 7  ;;  %v6613_v45 = vpack.c.bf16 %v9516_v36, %v9518_v30 }
 0x14d   : > { %v6614_v46 = vpack.c.bf16 %v9515_v37, %v9517_v32 }
 0x14e   : > { %v1200_v47 = vor.u32 %v1198_v39, %v1197_v38  ;;  %v1207_v48 = vor.u32 %v1205_v41, %v1204_v40  ;;  %v1210_v50 = vshrl.u32 %v6613_v45, 16  ;;  %v1213_v56 = vshll.u32 %v6613_v45, 16 }
 0x14f   : > { %v1219_v51 = vshrl.u32 %v6614_v46, 16  ;;  %v1222_v58 = vshll.u32 %v6614_v46, 16  ;;  %v1208_v59 = vrot.slane %v1197_v38, 4  ;;  %v1217_v60 = vrot.slane %v1204_v40, 4 }
 0x150   : > { %v1238_v52 = vsel %vm8167_vm5, %v1200_v47, %v1237_v43  ;;  %v1241_v53 = vsel %vm8167_vm5, %v1207_v48, %v1240_v44  ;;  %v1212_v55 = vrot.slane %v1210_v50, 7 }
 0x151   : > { %1239 = vst [vmem:[#allocation3] sm:$0xff] %v1238_v52  ;;  %1242 = vst [vmem:[#allocation3 + $0x8] sm:$0xff] %v1241_v53  ;;  %v1221_v57 = vrot.slane %v1219_v51, 7 }
 0x152   : > { %v1215_v0 = vor.u32 %v1213_v56, %v1212_v55  ;;  %v1226_v1 = vrot.slane %v1212_v55, 4 }
 0x153   : > { %v1224_v5 = vor.u32 %v1222_v58, %v1221_v57  ;;  %v1227_v6 = vrot.slane %v1221_v57, 4 }
 0x154   : > { %v8185_v9 = vsel %vm7761_vm7, %v1208_v59, %v1215_v0  ;;  %v1246_v10 = vsel %vm8001_vm15, %v1226_v1, %v1245_v61 }
 0x155   : > { %v8191_v63 = vsel %vm7761_vm7, %v1217_v60, %v1224_v5  ;;  %v1249_v20 = vsel %vm8001_vm15, %v1227_v6, %v1248_v62  ;;  %1247 = vst [vmem:[#allocation3 + $0x20] sm:$0x11] %v1246_v10  ;;  %v5850_v27 = vcombine.high %v1238_v52, %v8185_v9  ;;  %v8198_v33 = vcombine.low %v1238_v52, %v8185_v9 }
 0x156   : > { %1250 = vst [vmem:[#allocation3 + $0x28] sm:$0x11] %v1249_v20  ;;  %v5852_v28 = vcombine.high %v1241_v53, %v8191_v63  ;;  %v8201_v34 = vcombine.low %v1241_v53, %v8191_v63 }
 0x157   : > { %v1427_v38 = vshll.u32 %v5850_v27, 16  ;;  %v1415_v40 = vshll.u32 %v8198_v33, 16  ;;  %v1425_v50 = vshrl.u32 %v5850_v27, 16  ;;  %v1413_v53 = vshrl.u32 %v8198_v33, 16 }
 0x158   : > { %v1451_v39 = vshll.u32 %v5852_v28, 16  ;;  %v1439_v41 = vshll.u32 %v8201_v34, 16  ;;  %v8205_v43 = vld [vmem:[#allocation3] sm:$0xee]  ;;  %v8207_v44 = vld [vmem:[#allocation3 + $0x8] sm:$0xee] }
 0x159   : > { %v1429_v45 = vrot.slane %v1427_v38, 1  ;;  %v1417_v47 = vrot.slane %v1415_v40, 1  ;;  %v1449_v51 = vshrl.u32 %v5852_v28, 16  ;;  %v1437_v56 = vshrl.u32 %v8201_v34, 16 }
 0x15a   : > { %v1453_v46 = vrot.slane %v1451_v39, 1  ;;  %v1441_v48 = vrot.slane %v1439_v41, 1  ;;  %v5985_v57 = vcombine.low %v8205_v43, %v8185_v9  ;;  %v5987_v58 = vcombine.low %v8207_v44, %v8191_v63 }
 0x15b   : > { %v1430_v0 = vor.u32 %v1429_v45, %v1425_v50  ;;  %v1418_v5 = vor.u32 %v1417_v47, %v1413_v53  ;;  %v7131_v45 = vld [vmem:[%s9512_s2] sm:$0xff]   ;;  %v7133_v53 = vld [vmem:[%s9512_s2 + $0x48] sm:$0xff]  }
 0x15c   : > { %v1319_v52 = vld [vmem:[#allocation3 + $0x20] sm:$0x11]  ;;  %v1454_v1 = vor.u32 %v1453_v46, %v1449_v51  ;;  %v1442_v6 = vor.u32 %v1441_v48, %v1437_v56  ;;  %v2093_v40 = vrot.slane %v5985_v57, 1  ;;  %v2099_v37 = vrot.slane %v5987_v58, 1  ;;  %v7132_v46 = vld [vmem:[%s9512_s2 + $0x80] sm:$0xff]   ;;  %v7143_v57 = vld [vmem:[%s9512_s2 + $0x18] sm:$0xff]  }
 0x15d   : > { %v1320_v55 = vld [vmem:[#allocation3 + $0x28] sm:$0x11]  ;;  %v8215_v59 = vcombine.high %v1319_v52, %v1319_v52  ;;  %v5853_v61 = vcombine.low %v1319_v52, %v1319_v52  ;;  %v7134_v56 = vld [vmem:[%s9512_s2 + $0xc8] sm:$0xff]  }
 0x15e   : > { %v8217_v60 = vcombine.high %v1320_v55, %v1320_v55  ;;  %v5855_v62 = vcombine.low %v1320_v55, %v1320_v55  ;;  %v7144_v58 = vld [vmem:[%s9512_s2 + $0x98] sm:$0xff]  }
 0x15f   : > { %v1432_v10 = vshll.u32 %v8215_v59, 16  ;;  %v1420_v38 = vshll.u32 %v5853_v61, 16  ;;  %v2094_v41 = vrot.slane %v5853_v61, 1  ;;  %v7145_v61 = vld [vmem:[%s9512_s2 + $0x60] sm:$0xff]  }
 0x160   : > { %v1456_v20 = vshll.u32 %v8217_v60, 16  ;;  %v1444_v39 = vshll.u32 %v5855_v62, 16  ;;  %v2100_v36 = vrot.slane %v5855_v62, 1  ;;  %v7146_v62 = vld [vmem:[%s9512_s2 + $0xe0] sm:$0xff]  }
 0x161   : > { %v1434_v32 = vrot.slane %v1432_v10, 1  ;;  %v1422_v23 = vrot.slane %v1420_v38, 1  ;;  %v8228_v47 = vsel %vm891_vm10, %v2093_v40, %v2094_v41  ;;  %v7151_v10 = vld [vmem:[%s9512_s2 + $0x28] sm:$0xff]   ;;  %v7153_v38 = vld [vmem:[%s9512_s2 + $0x70] sm:$0xff]  }
 0x162   : > { %v1458_v30 = vrot.slane %v1456_v20, 1  ;;  %v1446_v22 = vrot.slane %v1444_v39, 1  ;;  %v8231_v48 = vsel %vm891_vm10, %v2099_v37, %v2100_v36  ;;  %v7139_v36 = vld [vmem:[%s9512_s2 + $0x10] sm:$0xff]   ;;  %v7152_v20 = vld [vmem:[%s9512_s2 + $0xa8] sm:$0xff]  }
 0x163   : > { %v1435_v50 = vsel %vm347_vm9, %v1430_v0, %v1434_v32  ;;  %v1423_v52 = vsel %vm347_vm9, %v1418_v5, %v1422_v23  ;;  %v7135_v23 = vld [vmem:[%s9512_s2 + $0x8] sm:$0xff]   ;;  %v7138_v32 = vld [vmem:[%s9512_s2 + $0xd0] sm:$0xff]   ;;  %v7147_v0 = vld [vmem:[%s9512_s2 + $0x20] sm:$0xff]  }
 0x164   : > { %v1459_v51 = vsel %vm347_vm9, %v1454_v1, %v1458_v30  ;;  %v1447_v55 = vsel %vm347_vm9, %v1442_v6, %v1446_v22  ;;  %1688 = vmatprep.mubr.bf16.mxu0 %v1435_v50  ;;  %v7136_v22 = vld [vmem:[%s9512_s2 + $0x88] sm:$0xff]   ;;  %v7137_v30 = vld [vmem:[%s9512_s2 + $0x50] sm:$0xff]   ;;  %v7148_v1 = vld [vmem:[%s9512_s2 + $0xa0] sm:$0xff]  }
 0x165   : > { %1729 = vmatprep.mubr.bf16.mxu1 %v1459_v51  ;;  %1689 = vmatmul.mubr.bf16.vlgmr.msra.gmra.mrb[4].mxu0 %v1423_v52  ;;  %v7140_v37 = vld [vmem:[%s9512_s2 + $0x90] sm:$0xff]   ;;  %v7149_v5 = vld [vmem:[%s9512_s2 + $0x68] sm:$0xff]   ;;  %v7159_v50 = vld [vmem:[%s9512_s2 + $0x38] sm:$0xff]  }
 0x166   : > { %1730 = vmatmul.mubr.bf16.vlgmr.msra.gmra.mrb[4].mxu1 %v1447_v55  ;;  %6668 = vmatpush3.bf16.msra.mxu0 %v7131_v45  ;;  %v7150_v6 = vld [vmem:[%s9512_s2 + $0xe8] sm:$0xff]   ;;  %v7154_v39 = vld [vmem:[%s9512_s2 + $0xf0] sm:$0xff]   ;;  %v7157_v45 = vld [vmem:[%s9512_s2 + $0x78] sm:$0xff]  }
 0x167   : > { %6690 = vmatpush3.bf16.msra.mxu1 %v7132_v46  ;;  %1966 = vmatprep.mubr.bf16.mxu0 %v5850_v27  ;;  %v7141_v27 = vld [vmem:[%s9512_s2 + $0x58] sm:$0xff]   ;;  %v7155_v40 = vld [vmem:[%s9512_s2 + $0x30] sm:$0xff]   ;;  %v7161_v52 = vld [vmem:[%s9512_s2 + $0x240] sm:$0xff]  }
 0x168   : > { %2007 = vmatprep.mubr.bf16.mxu1 %v5852_v28  ;;  %6669 = vmatprep.subr.bf16.mxu0 %v7133_v53  ;;  %v7142_v28 = vld [vmem:[%s9512_s2 + $0xd8] sm:$0xff]   ;;  %v7156_v41 = vld [vmem:[%s9512_s2 + $0xb0] sm:$0xff]   ;;  %v7162_v55 = vld [vmem:[%s9512_s2 + $0x2c0] sm:$0xff]   ;;  %v5986_v53 = vcombine.high %v8205_v43, %v8185_v9 }
 0x169   : > { %6691 = vmatprep.subr.bf16.mxu1 %v7134_v56  ;;  %v7158_v46 = vld [vmem:[%s9512_s2 + $0xf8] sm:$0xff]   ;;  %v5988_v56 = vcombine.high %v8207_v44, %v8191_v63  ;;  %v7164_v9 = vld [vmem:[%s9512_s2 + $0x280] sm:$0xff]   ;;  %v7165_v63 = vld [vmem:[%s9512_s2 + $0x248] sm:$0xff]  }
 0x16a   : > { %6670 = vmatpush3.bf16.msra.mxu0 %v7135_v23  ;;  %v7160_v51 = vld [vmem:[%s9512_s2 + $0xb8] sm:$0xff]   ;;  %v2097_v23 = vrot.slane %v8215_v59, 1  ;;  %v7166_v44 = vld [vmem:[%s9512_s2 + $0x2c8] sm:$0xff]  }
 0x16b   : > { %6692 = vmatpush3.bf16.msra.mxu1 %v7136_v22  ;;  %6671 = vmatprep.subr.bf16.mxu0 %v7137_v30  ;;  %v7163_v22 = vld [vmem:[%s9512_s2 + $0x200] sm:$0xff]   ;;  %v2103_v30 = vrot.slane %v8217_v60, 1  ;;  %v2102_v43 = vrot.slane %v5988_v56, 1  ;;  %v7198_v56 = vld [vmem:[%s9511_s1 + $0x10c] ss:$16 sps:$4 sm:$0xff]  }
 0x16c   : > { %6693 = vmatprep.subr.bf16.mxu1 %v7138_v32  ;;  %v2096_v32 = vrot.slane %v5986_v53, 1  ;;  %v7195_v53 = vld [vmem:[%s9511_s1 + $0x104] ss:$16 sps:$4 sm:$0xff]  }
 0x16d   : > { %v2104_v60 = vsel %vm891_vm10, %v2102_v43, %v2103_v30  ;;  %v7199_v30 = vld [vmem:[%s9511_s1 + $0x120] ss:$16 sps:$4 sm:$0xff]   ;;  %v7210_v43 = vld [vmem:[%s9511_s1 + $0x14c] ss:$16 sps:$4 sm:$0xff]  }
 0x16e   : > { %6672 = vmatpush3.bf16.msra.mxu0 %v7139_v36  ;;  %v2098_v59 = vsel %vm891_vm10, %v2096_v32, %v2097_v23  ;;  %v7167_v36 = vld [vmem:[%s9512_s2 + $0x208] sm:$0xff]   ;;  %v7193_v23 = vld [vmem:[%s9511_s1 + $0x100] ss:$16 sps:$4 sm:$0xff]  }
 0x16f   : > { %6694 = vmatpush3.bf16.msra.mxu1 %v7140_v37  ;;  %6673 = vmatprep.subr.bf16.mxu0 %v7141_v27  ;;  %v7168_v37 = vld [vmem:[%s9512_s2 + $0x288] sm:$0xff]   ;;  %v7171_v27 = vld [vmem:[%s9512_s2 + $0x210] sm:$0xff]  }
 0x170   : > { %6695 = vmatprep.subr.bf16.mxu1 %v7142_v28  ;;  %v7172_v28 = vld [vmem:[%s9512_s2 + $0x290] sm:$0xff]   ;;  %v7202_v32 = vld [vmem:[%s9511_s1 + $0x128] ss:$16 sps:$4 sm:$0xff]  }
 0x172   : > { %6674 = vmatpush3.bf16.msra.mxu0 %v7143_v57  ;;  %v7173_v57 = vld [vmem:[%s9512_s2 + $0x258] sm:$0xff]  }
 0x173   : > { %6696 = vmatpush3.bf16.msra.mxu1 %v7144_v58  ;;  %6675 = vmatprep.subr.bf16.mxu0 %v7145_v61  ;;  %v7174_v58 = vld [vmem:[%s9512_s2 + $0x2d8] sm:$0xff]  }
 0x174   : > { %6697 = vmatprep.subr.bf16.mxu1 %v7146_v62  ;;  %v7175_v61 = vld [vmem:[%s9512_s2 + $0x218] sm:$0xff]  }
 0x175   : > { %v7176_v62 = vld [vmem:[%s9512_s2 + $0x298] sm:$0xff]  }
 0x176   : > { %6676 = vmatpush3.bf16.msra.mxu0 %v7147_v0  ;;  %v7177_v0 = vld [vmem:[%s9512_s2 + $0x260] sm:$0xff]  }
 0x177   : > { %6698 = vmatpush3.bf16.msra.mxu1 %v7148_v1  ;;  %6677 = vmatprep.subr.bf16.mxu0 %v7149_v5  ;;  %v7178_v1 = vld [vmem:[%s9512_s2 + $0x2e0] sm:$0xff]  }
 0x178   : > { %6699 = vmatprep.subr.bf16.mxu1 %v7150_v6  ;;  %v7179_v5 = vld [vmem:[%s9512_s2 + $0x220] sm:$0xff]  }
 0x179   : > { %v7180_v6 = vld [vmem:[%s9512_s2 + $0x2a0] sm:$0xff]  }
 0x17a   : > { %6678 = vmatpush3.bf16.msra.mxu0 %v7151_v10  ;;  %v7181_v10 = vld [vmem:[%s9512_s2 + $0x268] sm:$0xff]  }
 0x17b   : > { %6700 = vmatpush3.bf16.msra.mxu1 %v7152_v20  ;;  %6679 = vmatprep.subr.bf16.mxu0 %v7153_v38  ;;  %v7182_v20 = vld [vmem:[%s9512_s2 + $0x2e8] sm:$0xff]  }
 0x17c   : > { %6701 = vmatprep.subr.bf16.mxu1 %v7154_v39  ;;  %v7183_v38 = vld [vmem:[%s9512_s2 + $0x228] sm:$0xff]  }
 0x17d   : > { %v7184_v39 = vld [vmem:[%s9512_s2 + $0x2a8] sm:$0xff]  }
 0x17e   : > { %6680 = vmatpush3.bf16.msra.mxu0 %v7155_v40  ;;  %v7185_v40 = vld [vmem:[%s9512_s2 + $0x270] sm:$0xff]  }
 0x17f   : > { %6702 = vmatpush3.bf16.msra.mxu1 %v7156_v41  ;;  %6681 = vmatprep.subr.bf16.mxu0 %v7157_v45  ;;  %v7186_v41 = vld [vmem:[%s9512_s2 + $0x2f0] sm:$0xff]  }
 0x180   : > { %6703 = vmatprep.subr.bf16.mxu1 %v7158_v46  ;;  %v7187_v45 = vld [vmem:[%s9512_s2 + $0x230] sm:$0xff]  }
 0x181   : > { %v7188_v46 = vld [vmem:[%s9512_s2 + $0x2b0] sm:$0xff]  }
 0x182   : > { %6682 = vmatpush3.bf16.msra.mxu0 %v7159_v50  ;;  %v7189_v50 = vld [vmem:[%s9512_s2 + $0x278] sm:$0xff]  }
 0x183   : > { %6704 = vmatpush3.bf16.msra.mxu1 %v7160_v51  ;;  %6711 = vmatprep.subr.bf16.mxu0 %v7161_v52  ;;  %v7190_v51 = vld [vmem:[%s9512_s2 + $0x2f8] sm:$0xff]  }
 0x184   : > { %6733 = vmatprep.subr.bf16.mxu1 %v7162_v55  ;;  %v7191_v52 = vld [vmem:[%s9512_s2 + $0x238] sm:$0xff]  }
 0x185   : > { %1967 = vmatmul.mubr.bf16.vlgmr.msra.gmra.mrb[8].mxu0 %v8198_v33  ;;  %v7169_v33 = vld [vmem:[%s9512_s2 + $0x250] sm:$0xff]   ;;  %v7192_v55 = vld [vmem:[%s9512_s2 + $0x2b8] sm:$0xff]  }
 0x186   : > { %2008 = vmatmul.mubr.bf16.vlgmr.msra.gmra.mrb[8].mxu1 %v8201_v34  ;;  %6712 = vmatpush3.bf16.msra.mxu0 %v7163_v22  ;;  %v7170_v34 = vld [vmem:[%s9512_s2 + $0x2d0] sm:$0xff]   ;;  %v7204_v22 = vld [vmem:[%s9511_s1 + $0x12c] ss:$16 sps:$4 sm:$0xff]  }
 0x187   : > { %2333 = vmatprep.mubr.bf16.mxu0 %v2098_v59  ;;  %6734 = vmatpush3.bf16.msra.mxu1 %v7164_v9  ;;  %v7207_v9 = vld [vmem:[%s9511_s1 + $0x144] ss:$16 sps:$4 sm:$0xff]  }
 0x188   : > { %2374 = vmatprep.mubr.bf16.mxu1 %v2104_v60  ;;  %6713 = vmatprep.subr.bf16.mxu0 %v7165_v63  ;;  %v7205_v63 = vld [vmem:[%s9511_s1 + $0x140] ss:$16 sps:$4 sm:$0xff]   ;;  %v7213_v59 = vld [vmem:[%s9511_s1 + $0x164] ss:$16 sps:$4 sm:$0xff]   ;;  %v7216_v60 = vld [vmem:[%s9511_s1 + $0x16c] ss:$16 sps:$4 sm:$0xff]  }
 0x189   : > { %6735 = vmatprep.subr.bf16.mxu1 %v7166_v44  ;;  %v7208_v44 = vld [vmem:[%s9511_s1 + $0x148] ss:$16 sps:$4 sm:$0xff]  }
 0x18a   : > { %6714 = vmatpush3.bf16.msra.mxu0 %v7167_v36  ;;  %v7211_v36 = vld [vmem:[%s9511_s1 + $0x160] ss:$16 sps:$4 sm:$0xff]  }
 0x18b   : > { %6736 = vmatpush3.bf16.msra.mxu1 %v7168_v37  ;;  %6715 = vmatprep.subr.bf16.mxu0 %v7169_v33  ;;  %v7214_v37 = vld [vmem:[%s9511_s1 + $0x168] ss:$16 sps:$4 sm:$0xff]   ;;  %v7219_v33 = vld [vmem:[%s9511_s1 + $0x184] ss:$16 sps:$4 sm:$0xff]  }
 0x18c   : > { %6737 = vmatprep.subr.bf16.mxu1 %v7170_v34  ;;  %v7222_v34 = vld [vmem:[%s9511_s1 + $0x18c] ss:$16 sps:$4 sm:$0xff]  }
 0x18e   : > { %6716 = vmatpush3.bf16.msra.mxu0 %v7171_v27  ;;  %v7217_v27 = vld [vmem:[%s9511_s1 + $0x180] ss:$16 sps:$4 sm:$0xff]  }
 0x18f   : > { %6738 = vmatpush3.bf16.msra.mxu1 %v7172_v28  ;;  %6717 = vmatprep.subr.bf16.mxu0 %v7173_v57  ;;  %v7220_v28 = vld [vmem:[%s9511_s1 + $0x188] ss:$16 sps:$4 sm:$0xff]   ;;  %v7225_v57 = vld [vmem:[%s9511_s1 + $0x1a4] ss:$16 sps:$4 sm:$0xff]  }
 0x190   : > { %6739 = vmatprep.subr.bf16.mxu1 %v7174_v58  ;;  %v7223_v58 = vld [vmem:[%s9511_s1 + $0x1a0] ss:$16 sps:$4 sm:$0xff]  }
 0x192   : > { %6718 = vmatpush3.bf16.msra.mxu0 %v7175_v61  ;;  %v7226_v61 = vld [vmem:[%s9511_s1 + $0x1a8] ss:$16 sps:$4 sm:$0xff]  }
 0x193   : > { %6740 = vmatpush3.bf16.msra.mxu1 %v7176_v62  ;;  %6719 = vmatprep.subr.bf16.mxu0 %v7177_v0  ;;  %v7228_v62 = vld [vmem:[%s9511_s1 + $0x1ac] ss:$16 sps:$4 sm:$0xff]   ;;  %v7231_v0 = vld [vmem:[%s9511_s1 + $0x1c4] ss:$16 sps:$4 sm:$0xff]  }
 0x194   : > { %6741 = vmatprep.subr.bf16.mxu1 %v7178_v1  ;;  %v7234_v1 = vld [vmem:[%s9511_s1 + $0x1cc] ss:$16 sps:$4 sm:$0xff]  }
 0x196   : > { %6720 = vmatpush3.bf16.msra.mxu0 %v7179_v5  ;;  %v7229_v5 = vld [vmem:[%s9511_s1 + $0x1c0] ss:$16 sps:$4 sm:$0xff]  }
 0x197   : > { %6742 = vmatpush3.bf16.msra.mxu1 %v7180_v6  ;;  %6721 = vmatprep.subr.bf16.mxu0 %v7181_v10  ;;  %v7232_v6 = vld [vmem:[%s9511_s1 + $0x1c8] ss:$16 sps:$4 sm:$0xff]   ;;  %v7237_v10 = vld [vmem:[%s9511_s1 + $0x1e4] ss:$16 sps:$4 sm:$0xff]  }
 0x198   : > { %6743 = vmatprep.subr.bf16.mxu1 %v7182_v20  ;;  %v7240_v20 = vld [vmem:[%s9511_s1 + $0x1ec] ss:$16 sps:$4 sm:$0xff]  }
 0x19a   : > { %6722 = vmatpush3.bf16.msra.mxu0 %v7183_v38  ;;  %v7235_v38 = vld [vmem:[%s9511_s1 + $0x1e0] ss:$16 sps:$4 sm:$0xff]  }
 0x19b   : > { %6744 = vmatpush3.bf16.msra.mxu1 %v7184_v39  ;;  %6723 = vmatprep.subr.bf16.mxu0 %v7185_v40  ;;  %v7238_v39 = vld [vmem:[%s9511_s1 + $0x1e8] ss:$16 sps:$4 sm:$0xff]   ;;  %v7243_v40 = vld [vmem:[%s9511_s1 + $0x4] ss:$16 sps:$4 sm:$0xff]  }
 0x19c   : > { %6745 = vmatprep.subr.bf16.mxu1 %v7186_v41  ;;  %v7246_v41 = vld [vmem:[%s9511_s1 + $0xc] ss:$16 sps:$4 sm:$0xff]  }
 0x19e   : > { %6724 = vmatpush3.bf16.msra.mxu0 %v7187_v45 }
 0x19f   : > { %6746 = vmatpush3.bf16.msra.mxu1 %v7188_v46  ;;  %6725 = vmatprep.subr.bf16.mxu0 %v7189_v50 }
 0x1a0   : > { %6747 = vmatprep.subr.bf16.mxu1 %v7190_v51 }
 0x1a2   : > { %6726 = vmatpush3.bf16.msra.mxu0 %v7191_v52 }
 0x1a3   : > { %6748 = vmatpush3.bf16.msra.mxu1 %v7192_v55  ;;  %2674 = vmatprep.subr.bf16.mxu0 %v7195_v53 }
 0x1a4   : > { %2717 = vmatprep.subr.bf16.mxu1 %v7198_v56 }
 0x1a5   : > { %2334 = vmatmul.mubr.bf16.vlgmr.msra.gmra.mrb[12].mxu0 %v8228_v47  ;;  %v7196_v47 = vld [vmem:[%s9511_s1 + $0x108] ss:$16 sps:$4 sm:$0xff]  }
 0x1a6   : > { %2375 = vmatmul.mubr.bf16.vlgmr.msra.gmra.mrb[12].mxu1 %v8231_v48  ;;  %2706 = vmatprep.mubr.bf16.mxu0 %v7595_v2  ;;  %v7201_v48 = vld [vmem:[%s9511_s1 + $0x124] ss:$16 sps:$4 sm:$0xff]  }
 0x1a7   : > { %2749 = vmatprep.mubr.bf16.mxu1 %v7595_v2  ;;  %2675 = vmatpush1.bf16.msra.mxu0 %v7193_v23 }
 0x1a8   : > { %2718 = vmatpush1.bf16.msra.mxu1 %v7196_v47  ;;  %2676 = vmatprep.subr.bf16.mxu0 %v7201_v48 }
 0x1a9   : > { %2719 = vmatprep.subr.bf16.mxu1 %v7204_v22 }
 0x1ab   : > { %2677 = vmatpush1.bf16.msra.mxu0 %v7199_v30 }
 0x1ac   : > { %2720 = vmatpush1.bf16.msra.mxu1 %v7202_v32  ;;  %2678 = vmatprep.subr.bf16.mxu0 %v7207_v9 }
 0x1ad   : > { %2721 = vmatprep.subr.bf16.mxu1 %v7210_v43 }
 0x1af   : > { %2679 = vmatpush1.bf16.msra.mxu0 %v7205_v63 }
 0x1b0   : > { %2722 = vmatpush1.bf16.msra.mxu1 %v7208_v44  ;;  %2680 = vmatprep.subr.bf16.mxu0 %v7213_v59 }
 0x1b1   : > { %2723 = vmatprep.subr.bf16.mxu1 %v7216_v60 }
 0x1b3   : > { %2681 = vmatpush1.bf16.msra.mxu0 %v7211_v36 }
 0x1b4   : > { %2724 = vmatpush1.bf16.msra.mxu1 %v7214_v37  ;;  %2682 = vmatprep.subr.bf16.mxu0 %v7219_v33 }
 0x1b5   : > { %2725 = vmatprep.subr.bf16.mxu1 %v7222_v34 }
 0x1b7   : > { %2683 = vmatpush1.bf16.msra.mxu0 %v7217_v27 }
 0x1b8   : > { %2726 = vmatpush1.bf16.msra.mxu1 %v7220_v28  ;;  %2684 = vmatprep.subr.bf16.mxu0 %v7225_v57 }
 0x1b9   : > { %2727 = vmatprep.subr.bf16.mxu1 %v7228_v62 }
 0x1bb   : > { %2685 = vmatpush1.bf16.msra.mxu0 %v7223_v58 }
 0x1bc   : > { %2728 = vmatpush1.bf16.msra.mxu1 %v7226_v61  ;;  %2686 = vmatprep.subr.bf16.mxu0 %v7231_v0 }
 0x1bd   : > { %2729 = vmatprep.subr.bf16.mxu1 %v7234_v1 }
 0x1bf   : > { %2687 = vmatpush1.bf16.msra.mxu0 %v7229_v5 }
 0x1c0   : > { %2730 = vmatpush1.bf16.msra.mxu1 %v7232_v6  ;;  %2688 = vmatprep.subr.bf16.mxu0 %v7237_v10 }
 0x1c1   : > { %2731 = vmatprep.subr.bf16.mxu1 %v7240_v20 }
 0x1c3   : > { %2689 = vmatpush1.bf16.msra.mxu0 %v7235_v38 }
 0x1c4   : > { %2732 = vmatpush1.bf16.msra.mxu1 %v7238_v39  ;;  %2921 = vmatprep.subr.bf16.mxu0 %v7243_v40 }
 0x1c5   : > { %2964 = vmatprep.subr.bf16.mxu1 %v7246_v41 }
 0x238   : > { %v6639_v45 = vpop.f32.mrb[4].mxu0 }
 0x239   : > { %v6661_v46 = vpop.f32.mrb[4].mxu1  ;;  %v6640_v50 = vpop.f32.mrb[5].mxu0 }
 0x23a   : > { %v6662_v51 = vpop.f32.mrb[5].mxu1  ;;  %v6641_v52 = vadd.f32 %v6640_v50, %v6639_v45  ;;  %v6642_v53 = vpop.f32.mrb[6].mxu0 }
 0x23b   : > { %v6663_v55 = vadd.f32 %v6662_v51, %v6661_v46  ;;  %v6664_v56 = vpop.f32.mrb[6].mxu1  ;;  %v6643_v23 = vpop.f32.mrb[7].mxu0 }
 0x23c   : > { %v6665_v47 = vpop.f32.mrb[7].mxu1  ;;  %v6644_v22 = vadd.f32 %v6643_v23, %v6642_v53 }
 0x23d   : > { %v1732_v48 = vadd.f32 %v6663_v55, %v6641_v52  ;;  %v6666_v30 = vadd.f32 %v6665_v47, %v6664_v56 }
 0x23f   : > { %v1735_v32 = vadd.f32 %v6666_v30, %v6644_v22  ;;  %v2411_v30 = vld [vmem:[#allocation2] sm:$0xf] }
 0x258   : > { %v6683_v9 = vpop.f32.mrb[8].mxu0 }
 0x259   : > { %v6705_v43 = vpop.f32.mrb[8].mxu1  ;;  %v6684_v63 = vpop.f32.mrb[9].mxu0 }
 0x25a   : > { %v6706_v44 = vpop.f32.mrb[9].mxu1  ;;  %v6685_v59 = vadd.f32 %v6684_v63, %v6683_v9  ;;  %v6686_v36 = vpop.f32.mrb[10].mxu0  ;;  %v2415_v63 = vld [vmem:[#allocation2 + $0x8] sm:$0x1] }
 0x25b   : > { %v6707_v60 = vadd.f32 %v6706_v44, %v6705_v43  ;;  %v6708_v37 = vpop.f32.mrb[10].mxu1  ;;  %v6687_v33 = vpop.f32.mrb[11].mxu0 }
 0x25c   : > { %v6709_v34 = vpop.f32.mrb[11].mxu1  ;;  %v1969_v27 = vadd.f32 %v6685_v59, %v1732_v48  ;;  %v6688_v28 = vadd.f32 %v6687_v33, %v6686_v36 }
 0x25d   : > { %v6710_v57 = vadd.f32 %v6709_v34, %v6708_v37 }
 0x25e   : > { %v2010_v58 = vadd.f32 %v6707_v60, %v1969_v27  ;;  %v1972_v61 = vadd.f32 %v6688_v28, %v1735_v32 }
 0x260   : > { %v2013_v62 = vadd.f32 %v6710_v57, %v1972_v61 }
 0x278   : > { %v6727_v0 = vpop.f32.mrb[12].mxu0 }
 0x279   : > { %v6749_v1 = vpop.f32.mrb[12].mxu1  ;;  %v6728_v5 = vpop.f32.mrb[13].mxu0 }
 0x27a   : > { %v6729_v6 = vadd.f32 %v6728_v5, %v6727_v0  ;;  %v6750_v10 = vpop.f32.mrb[13].mxu1  ;;  %v6730_v20 = vpop.f32.mrb[14].mxu0  ;;  %v7244_v5 = vld [vmem:[%s9511_s1 + $0x8] ss:$16 sps:$4 sm:$0xff]  }
 0x27b   : > { %v6751_v38 = vadd.f32 %v6750_v10, %v6749_v1  ;;  %v6752_v39 = vpop.f32.mrb[14].mxu1  ;;  %v6731_v40 = vpop.f32.mrb[15].mxu0  ;;  %v7241_v1 = vld [vmem:[%s9511_s1] ss:$16 sps:$4 sm:$0xff]  }
 0x27c   : > { %v6732_v41 = vadd.f32 %v6731_v40, %v6730_v20  ;;  %v6753_v45 = vpop.f32.mrb[15].mxu1  ;;  %v7251_v20 = vld [vmem:[%s9511_s1 + $0x24] ss:$16 sps:$4 sm:$0xff]   ;;  %v7249_v40 = vld [vmem:[%s9511_s1 + $0x20] ss:$16 sps:$4 sm:$0xff]  }
 0x27d   : > { %v2377_v46 = vadd.f32 %v6751_v38, %v6729_v6  ;;  %v6754_v50 = vadd.f32 %v6753_v45, %v6752_v39  ;;  %v7254_v38 = vld [vmem:[%s9511_s1 + $0x2c] ss:$16 sps:$4 sm:$0xff]   ;;  %v7257_v45 = vld [vmem:[%s9511_s1 + $0x44] ss:$16 sps:$4 sm:$0xff]  }
 0x27f   : > { %v2383_v51 = vadd.f32 %v2377_v46, %v2010_v58  ;;  %v2380_v52 = vadd.f32 %v6754_v50, %v6732_v41  ;;  %v7252_v41 = vld [vmem:[%s9511_s1 + $0x28] ss:$16 sps:$4 sm:$0xff]   ;;  %v7260_v46 = vld [vmem:[%s9511_s1 + $0x4c] ss:$16 sps:$4 sm:$0xff]   ;;  %v7255_v50 = vld [vmem:[%s9511_s1 + $0x40] ss:$16 sps:$4 sm:$0xff]  }
 0x281   : > { %v6615_v55 = vpack.c.bf16 %v2383_v51, %v2383_v51  ;;  %v2384_v53 = vadd.f32 %v2380_v52, %v2013_v62  ;;  %v7258_v51 = vld [vmem:[%s9511_s1 + $0x48] ss:$16 sps:$4 sm:$0xff]   ;;  %v7263_v52 = vld [vmem:[%s9511_s1 + $0x64] ss:$16 sps:$4 sm:$0xff]  }
 0x283   : > { %v2392_v56 = vshrl.u32 %v6615_v55, 16  ;;  %v6616_v23 = vpack.c.bf16 %v2384_v53, %v2384_v53  ;;  %v2395_v48 = vshll.u32 %v6615_v55, 16  ;;  %v7266_v55 = vld [vmem:[%s9511_s1 + $0x6c] ss:$16 sps:$4 sm:$0xff]   ;;  %v7261_v53 = vld [vmem:[%s9511_s1 + $0x60] ss:$16 sps:$4 sm:$0xff]  }
 0x285   : > { %v2394_v47 = vrot.slane %v2392_v56, 7  ;;  %v2400_v22 = vshrl.u32 %v6616_v23, 16  ;;  %v2403_v43 = vshll.u32 %v6616_v23, 16  ;;  %v7264_v56 = vld [vmem:[%s9511_s1 + $0x68] ss:$16 sps:$4 sm:$0xff]  }
 0x286   : > { %v7269_v23 = vld [vmem:[%s9511_s1 + $0x84] ss:$16 sps:$4 sm:$0xff]  }
 0x287   : > { %v2397_v32 = vor.u32 %v2395_v48, %v2394_v47  ;;  %v2402_v9 = vrot.slane %v2400_v22, 7  ;;  %v2398_v44 = vrot.slane %v2394_v47, 4  ;;  %v7272_v47 = vld [vmem:[%s9511_s1 + $0x8c] ss:$16 sps:$4 sm:$0xff]   ;;  %v7267_v48 = vld [vmem:[%s9511_s1 + $0x80] ss:$16 sps:$4 sm:$0xff]  }
 0x288   : > { %v7270_v22 = vld [vmem:[%s9511_s1 + $0x88] ss:$16 sps:$4 sm:$0xff]  }
 0x289   : > { %v2412_v59 = vsel %vm7766_vm8, %v2397_v32, %v2411_v30  ;;  %v2405_v60 = vor.u32 %v2403_v43, %v2402_v9  ;;  %v2407_v36 = vrot.slane %v2402_v9, 4  ;;  %v7275_v30 = vld [vmem:[%s9511_s1 + $0xa4] ss:$16 sps:$4 sm:$0xff]   ;;  %v7278_v32 = vld [vmem:[%s9511_s1 + $0xac] ss:$16 sps:$4 sm:$0xff]  }
 0x28a   : > { %2413 = vst [vmem:[#allocation2] sm:$0xf] %v2412_v59  ;;  %v7273_v9 = vld [vmem:[%s9511_s1 + $0xa0] ss:$16 sps:$4 sm:$0xff]   ;;  %v7276_v43 = vld [vmem:[%s9511_s1 + $0xa8] ss:$16 sps:$4 sm:$0xff]  }
 0x28b   : > { %v2406_v37 = vsel %vm7761_vm7, %v2398_v44, %v2405_v60  ;;  %v2416_v33 = vsel %vm7733_vm3, %v2407_v36, %v2415_v63  ;;  %v7281_v63 = vld [vmem:[%s9511_s1 + $0xc4] ss:$16 sps:$4 sm:$0xff]   ;;  %v7284_v44 = vld [vmem:[%s9511_s1 + $0xcc] ss:$16 sps:$4 sm:$0xff]   ;;  %v7279_v59 = vld [vmem:[%s9511_s1 + $0xc0] ss:$16 sps:$4 sm:$0xff]  }
 0x28c   : > { %2414 = vst [vmem:[#allocation2 + $0x4] sm:$0xf] %v2406_v37  ;;  %2417 = vst [vmem:[#allocation2 + $0x8] sm:$0x1] %v2416_v33  ;;  %v7282_v60 = vld [vmem:[%s9511_s1 + $0xc8] ss:$16 sps:$4 sm:$0xff]  }
 0x28d   : > { %v7287_v36 = vld [vmem:[%s9511_s1 + $0xe4] ss:$16 sps:$4 sm:$0xff]   ;;  %v7290_v37 = vld [vmem:[%s9511_s1 + $0xec] ss:$16 sps:$4 sm:$0xff]   ;;  %v7285_v33 = vld [vmem:[%s9511_s1 + $0xe0] ss:$16 sps:$4 sm:$0xff]  }
 0x291   : > { %v2426_v34 = vld [vmem:[#allocation2] sm:$0xf] }
 0x293   : > { %v8539_v27 = vld [vmem:[#allocation2 + $0x4] sm:$0xf]  ;;  %v8544_v57 = vld [vmem:[#allocation2 + $0x8] ss:$0 sps:$4 sm:$0x11]  }
 0x294   : > { %v8542_v28 = vcombine.low %v2426_v34, %v8539_v27  ;;  %v2509_v61 = vshll.u32 %v8544_v57, 16  ;;  %v7288_v34 = vld [vmem:[%s9511_s1 + $0xe8] ss:$16 sps:$4 sm:$0xff]  }
 0x296   : > { %v2504_v58 = vshll.u32 %v8542_v28, 16  ;;  %v2502_v62 = vshrl.u32 %v8542_v28, 16  ;;  %v2511_v10 = vrot.slane %v2509_v61, 1  ;;  %v7296_v61 = vld [vmem:[%s9511_s1 + $0x20c] ss:$16 sps:$4 sm:$0xff]  }
 0x298   : > { %v2506_v0 = vrot.slane %v2504_v58, 1  ;;  %v7293_v58 = vld [vmem:[%s9511_s1 + $0x204] ss:$16 sps:$4 sm:$0xff]  }
 0x29a   : > { %v2507_v6 = vor.u32 %v2506_v0, %v2502_v62  ;;  %v7291_v62 = vld [vmem:[%s9511_s1 + $0x200] ss:$16 sps:$4 sm:$0xff]   ;;  %v7294_v0 = vld [vmem:[%s9511_s1 + $0x208] ss:$16 sps:$4 sm:$0xff]  }
 0x29c   : > { %v2512_v39 = vsel %vm347_vm9, %v2507_v6, %v2511_v10  ;;  %v7297_v6 = vld [vmem:[%s9511_s1 + $0x220] ss:$16 sps:$4 sm:$0xff]   ;;  %v7300_v10 = vld [vmem:[%s9511_s1 + $0x228] ss:$16 sps:$4 sm:$0xff]  }
 0x29d   : > { %2707 = vmatmul.mubr.bf16.vlgmr.msra.gmra.mrb[16].mxu0 %v2512_v39  ;;  %2750 = vmatmul.mubr.bf16.vlgmr.msra.gmra.mrb[16].mxu1 %v2512_v39  ;;  %v7306_v39 = vld [vmem:[%s9511_s1 + $0x248] ss:$16 sps:$4 sm:$0xff]  }
 0x29e   : > { %2922 = vmatpush1.bf16.msra.mxu0 %v7241_v1  ;;  %2965 = vmatpush1.bf16.msra.mxu1 %v7244_v5  ;;  %v7299_v1 = vld [vmem:[%s9511_s1 + $0x224] ss:$16 sps:$4 sm:$0xff]   ;;  %v7302_v5 = vld [vmem:[%s9511_s1 + $0x22c] ss:$16 sps:$4 sm:$0xff]  }
 0x29f   : > { %2923 = vmatprep.subr.bf16.mxu0 %v7251_v20  ;;  %2966 = vmatprep.subr.bf16.mxu1 %v7254_v38  ;;  %v7305_v20 = vld [vmem:[%s9511_s1 + $0x244] ss:$16 sps:$4 sm:$0xff]   ;;  %v7303_v38 = vld [vmem:[%s9511_s1 + $0x240] ss:$16 sps:$4 sm:$0xff]  }
 0x2a0   : > { %2953 = vmatprep.mubr.bf16.mxu0 %v7595_v2  ;;  %2996 = vmatprep.mubr.bf16.mxu1 %v7595_v2 }
 0x2a2   : > { %2924 = vmatpush1.bf16.msra.mxu0 %v7249_v40  ;;  %2967 = vmatpush1.bf16.msra.mxu1 %v7252_v41  ;;  %v7311_v40 = vld [vmem:[%s9511_s1 + $0x264] ss:$16 sps:$4 sm:$0xff]   ;;  %v7314_v41 = vld [vmem:[%s9511_s1 + $0x26c] ss:$16 sps:$4 sm:$0xff]  }
 0x2a3   : > { %2925 = vmatprep.subr.bf16.mxu0 %v7257_v45  ;;  %2968 = vmatprep.subr.bf16.mxu1 %v7260_v46  ;;  %v7309_v45 = vld [vmem:[%s9511_s1 + $0x260] ss:$16 sps:$4 sm:$0xff]   ;;  %v7312_v46 = vld [vmem:[%s9511_s1 + $0x268] ss:$16 sps:$4 sm:$0xff]  }
 0x2a6   : > { %2926 = vmatpush1.bf16.msra.mxu0 %v7255_v50  ;;  %2969 = vmatpush1.bf16.msra.mxu1 %v7258_v51  ;;  %v7317_v50 = vld [vmem:[%s9511_s1 + $0x284] ss:$16 sps:$4 sm:$0xff]   ;;  %v7320_v51 = vld [vmem:[%s9511_s1 + $0x28c] ss:$16 sps:$4 sm:$0xff]  }
 0x2a7   : > { %2927 = vmatprep.subr.bf16.mxu0 %v7263_v52  ;;  %2970 = vmatprep.subr.bf16.mxu1 %v7266_v55  ;;  %v7315_v52 = vld [vmem:[%s9511_s1 + $0x280] ss:$16 sps:$4 sm:$0xff]   ;;  %v7318_v55 = vld [vmem:[%s9511_s1 + $0x288] ss:$16 sps:$4 sm:$0xff]  }
 0x2aa   : > { %2928 = vmatpush1.bf16.msra.mxu0 %v7261_v53  ;;  %2971 = vmatpush1.bf16.msra.mxu1 %v7264_v56  ;;  %v7323_v53 = vld [vmem:[%s9511_s1 + $0x2a4] ss:$16 sps:$4 sm:$0xff]   ;;  %v7326_v56 = vld [vmem:[%s9511_s1 + $0x2ac] ss:$16 sps:$4 sm:$0xff]  }
 0x2ab   : > { %2929 = vmatprep.subr.bf16.mxu0 %v7269_v23  ;;  %2972 = vmatprep.subr.bf16.mxu1 %v7272_v47  ;;  %v7321_v23 = vld [vmem:[%s9511_s1 + $0x2a0] ss:$16 sps:$4 sm:$0xff]   ;;  %v7324_v47 = vld [vmem:[%s9511_s1 + $0x2a8] ss:$16 sps:$4 sm:$0xff]  }
 0x2ae   : > { %2930 = vmatpush1.bf16.msra.mxu0 %v7267_v48  ;;  %2973 = vmatpush1.bf16.msra.mxu1 %v7270_v22  ;;  %v7329_v48 = vld [vmem:[%s9511_s1 + $0x2c4] ss:$16 sps:$4 sm:$0xff]   ;;  %v7332_v22 = vld [vmem:[%s9511_s1 + $0x2cc] ss:$16 sps:$4 sm:$0xff]  }
 0x2af   : > { %2931 = vmatprep.subr.bf16.mxu0 %v7275_v30  ;;  %2974 = vmatprep.subr.bf16.mxu1 %v7278_v32  ;;  %v7327_v30 = vld [vmem:[%s9511_s1 + $0x2c0] ss:$16 sps:$4 sm:$0xff]   ;;  %v7330_v32 = vld [vmem:[%s9511_s1 + $0x2c8] ss:$16 sps:$4 sm:$0xff]  }
 0x2b2   : > { %2932 = vmatpush1.bf16.msra.mxu0 %v7273_v9  ;;  %2975 = vmatpush1.bf16.msra.mxu1 %v7276_v43  ;;  %v7335_v9 = vld [vmem:[%s9511_s1 + $0x2e4] ss:$16 sps:$4 sm:$0xff]   ;;  %v7338_v43 = vld [vmem:[%s9511_s1 + $0x2ec] ss:$16 sps:$4 sm:$0xff]  }
 0x2b3   : > { %2933 = vmatprep.subr.bf16.mxu0 %v7281_v63  ;;  %2976 = vmatprep.subr.bf16.mxu1 %v7284_v44  ;;  %v3007_v63 = vld [vmem:[#allocation2] sm:$0xe] }
 0x2b4   : > { %v6153_v44 = vcombine.low %v3007_v63, %v8539_v27  ;;  %v7340_v27 = vld [vmem:[%s9512_s2 + $0x140] sm:$0xff]  }
 0x2b5   : > { %v7375_v63 = vld [vmem:[%s9512_s2 + $0xc0] sm:$0xff]  }
 0x2b6   : > { %2934 = vmatpush1.bf16.msra.mxu0 %v7279_v59  ;;  %2977 = vmatpush1.bf16.msra.mxu1 %v7282_v60  ;;  %v7333_v59 = vld [vmem:[%s9511_s1 + $0x2e0] ss:$16 sps:$4 sm:$0xff]   ;;  %v7336_v60 = vld [vmem:[%s9511_s1 + $0x2e8] ss:$16 sps:$4 sm:$0xff]  }
 0x2b7   : > { %2935 = vmatprep.subr.bf16.mxu0 %v7287_v36  ;;  %2978 = vmatprep.subr.bf16.mxu1 %v7290_v37  ;;  %v3043_v36 = vrot.slane %v6153_v44, 1  ;;  %v3044_v37 = vrot.slane %v8544_v57, 1  ;;  %v7343_v57 = vld [vmem:[%s9512_s2 + $0x180] sm:$0xff]   ;;  %v2418_v44 = vadd.f32 %v1166_v17, %v8108_v3  ;;  %v2422_v17 = vadd.f32 %v9541_v11, %v8122_v13 }
 0x2ba   : > { %2936 = vmatpush1.bf16.msra.mxu0 %v7285_v33  ;;  %2979 = vmatpush1.bf16.msra.mxu1 %v7288_v34  ;;  %v3045_v33 = vsel %vm891_vm10, %v3043_v36, %v3044_v37  ;;  %v7341_v34 = vld [vmem:[%s9512_s2 + $0x1c0] sm:$0xff]   ;;  %v9539_v37 = vmax.f32 %v8125_v14, 0.0 }
 0x2bb   : > { %3207 = vmatprep.subr.bf16.mxu0 %v7293_v58  ;;  %3250 = vmatprep.subr.bf16.mxu1 %v7296_v61  ;;  %v7342_v58 = vld [vmem:[%s9512_s2 + $0x100] sm:$0xff]   ;;  %v7344_v61 = vld [vmem:[%s9512_s2 + $0x148] sm:$0xff]  }
 0x2bd   : > { %2954 = vmatmul.mubr.bf16.vlgmr.msra.gmra.mrb[16].mxu0 %v8542_v28  ;;  %2997 = vmatmul.mubr.bf16.vlgmr.msra.gmra.mrb[16].mxu1 %v8542_v28  ;;  %v7308_v28 = vld [vmem:[%s9511_s1 + $0x24c] ss:$16 sps:$4 sm:$0xff]  }
 0x2be   : > { %3208 = vmatpush1.bf16.msra.mxu0 %v7291_v62  ;;  %3251 = vmatpush1.bf16.msra.mxu1 %v7294_v0  ;;  %v7345_v62 = vld [vmem:[%s9512_s2 + $0x1c8] sm:$0xff]  }
 0x2bf   : > { %3209 = vmatprep.subr.bf16.mxu0 %v7299_v1  ;;  %3252 = vmatprep.subr.bf16.mxu1 %v7302_v5  ;;  %v7346_v0 = vld [vmem:[%s9512_s2 + $0x108] sm:$0xff]   ;;  %v7348_v5 = vld [vmem:[%s9512_s2 + $0x150] sm:$0xff]  }
 0x2c0   : > { %3239 = vmatprep.mubr.bf16.mxu0 %v7595_v2  ;;  %3282 = vmatprep.mubr.bf16.mxu1 %v7595_v2  ;;  %v7347_v1 = vld [vmem:[%s9512_s2 + $0x188] sm:$0xff]  }
 0x2c2   : > { %3210 = vmatpush1.bf16.msra.mxu0 %v7297_v6  ;;  %3253 = vmatpush1.bf16.msra.mxu1 %v7300_v10  ;;  %v7349_v6 = vld [vmem:[%s9512_s2 + $0x1d0] sm:$0xff]  }
 0x2c3   : > { %3211 = vmatprep.subr.bf16.mxu0 %v7305_v20  ;;  %3254 = vmatprep.subr.bf16.mxu1 %v7308_v28  ;;  %v7350_v10 = vld [vmem:[%s9512_s2 + $0x110] sm:$0xff]   ;;  %v7352_v28 = vld [vmem:[%s9512_s2 + $0x158] sm:$0xff]  }
 0x2c4   : > { %v7351_v20 = vld [vmem:[%s9512_s2 + $0x190] sm:$0xff]  }
 0x2c6   : > { %3212 = vmatpush1.bf16.msra.mxu0 %v7303_v38  ;;  %3255 = vmatpush1.bf16.msra.mxu1 %v7306_v39  ;;  %v7353_v38 = vld [vmem:[%s9512_s2 + $0x1d8] sm:$0xff]  }
 0x2c7   : > { %3213 = vmatprep.subr.bf16.mxu0 %v7311_v40  ;;  %3256 = vmatprep.subr.bf16.mxu1 %v7314_v41  ;;  %v7354_v39 = vld [vmem:[%s9512_s2 + $0x118] sm:$0xff]   ;;  %v7356_v41 = vld [vmem:[%s9512_s2 + $0x160] sm:$0xff]  }
 0x2c8   : > { %v7355_v40 = vld [vmem:[%s9512_s2 + $0x198] sm:$0xff]  }
 0x2ca   : > { %3214 = vmatpush1.bf16.msra.mxu0 %v7309_v45  ;;  %3257 = vmatpush1.bf16.msra.mxu1 %v7312_v46  ;;  %v7357_v45 = vld [vmem:[%s9512_s2 + $0x1e0] sm:$0xff]  }
 0x2cb   : > { %3215 = vmatprep.subr.bf16.mxu0 %v7317_v50  ;;  %3258 = vmatprep.subr.bf16.mxu1 %v7320_v51  ;;  %v7358_v46 = vld [vmem:[%s9512_s2 + $0x120] sm:$0xff]   ;;  %v7360_v51 = vld [vmem:[%s9512_s2 + $0x168] sm:$0xff]  }
 0x2cc   : > { %v7359_v50 = vld [vmem:[%s9512_s2 + $0x1a0] sm:$0xff]  }
 0x2ce   : > { %3216 = vmatpush1.bf16.msra.mxu0 %v7315_v52  ;;  %3259 = vmatpush1.bf16.msra.mxu1 %v7318_v55  ;;  %v7361_v52 = vld [vmem:[%s9512_s2 + $0x1e8] sm:$0xff]  }
 0x2cf   : > { %3217 = vmatprep.subr.bf16.mxu0 %v7323_v53  ;;  %3260 = vmatprep.subr.bf16.mxu1 %v7326_v56  ;;  %v7362_v55 = vld [vmem:[%s9512_s2 + $0x128] sm:$0xff]   ;;  %v7364_v56 = vld [vmem:[%s9512_s2 + $0x170] sm:$0xff]  }
 0x2d0   : > { %v7363_v53 = vld [vmem:[%s9512_s2 + $0x1a8] sm:$0xff]  }
 0x2d2   : > { %3218 = vmatpush1.bf16.msra.mxu0 %v7321_v23  ;;  %3261 = vmatpush1.bf16.msra.mxu1 %v7324_v47  ;;  %v7365_v23 = vld [vmem:[%s9512_s2 + $0x1f0] sm:$0xff]  }
 0x2d3   : > { %3219 = vmatprep.subr.bf16.mxu0 %v7329_v48  ;;  %3262 = vmatprep.subr.bf16.mxu1 %v7332_v22  ;;  %v7366_v47 = vld [vmem:[%s9512_s2 + $0x130] sm:$0xff]   ;;  %v7368_v22 = vld [vmem:[%s9512_s2 + $0x178] sm:$0xff]  }
 0x2d4   : > { %v7367_v48 = vld [vmem:[%s9512_s2 + $0x1b0] sm:$0xff]  }
 0x2d6   : > { %3220 = vmatpush1.bf16.msra.mxu0 %v7327_v30  ;;  %3263 = vmatpush1.bf16.msra.mxu1 %v7330_v32  ;;  %v7369_v30 = vld [vmem:[%s9512_s2 + $0x1f8] sm:$0xff]  }
 0x2d7   : > { %3221 = vmatprep.subr.bf16.mxu0 %v7335_v9  ;;  %3264 = vmatprep.subr.bf16.mxu1 %v7338_v43  ;;  %v7370_v32 = vld [vmem:[%s9512_s2 + $0x138] sm:$0xff]   ;;  %v7374_v43 = vld [vmem:[%s9512_s2 + $0x40] sm:$0xff]  }
 0x2d8   : > { %v7371_v9 = vld [vmem:[%s9512_s2 + $0x1b8] sm:$0xff]  }
 0x2da   : > { %3222 = vmatpush1.bf16.msra.mxu0 %v7333_v59  ;;  %3265 = vmatpush1.bf16.msra.mxu1 %v7336_v60  ;;  %v2420_v60 = vadd.f32 %v1168_v18, %v8110_v4  ;;  %v2424_v18 = vadd.f32 %v9542_v12, %v8130_v16 }
 0x2db   : > { %6755 = vmatprep.subr.bf16.mxu0 %v7340_v27  ;;  %6777 = vmatprep.subr.bf16.mxu1 %v7341_v34  ;;  %v9540_v27 = vmax.f32 %v8128_v15, 0.0  ;;  %v9543_v15 = vmax.f32 %v8155_v29, 0.0 }
 0x2dd   : > { %3240 = vmatmul.mubr.bf16.vlgmr.msra.gmra.mrb[16].mxu0 %v3045_v33  ;;  %3283 = vmatmul.mubr.bf16.vlgmr.msra.gmra.mrb[16].mxu1 %v3045_v33  ;;  %v2419_v33 = vadd.f32 %v9539_v37, %v8112_v7  ;;  %v2421_v34 = vadd.f32 %v9540_v27, %v8114_v8 }
 0x2de   : > { %6756 = vmatpush3.bf16.msra.mxu0 %v7342_v58  ;;  %6778 = vmatpush3.bf16.msra.mxu1 %v7343_v57 }
 0x2df   : > { %6757 = vmatprep.subr.bf16.mxu0 %v7344_v61  ;;  %6779 = vmatprep.subr.bf16.mxu1 %v7345_v62 }
 0x2e2   : > { %6758 = vmatpush3.bf16.msra.mxu0 %v7346_v0  ;;  %6780 = vmatpush3.bf16.msra.mxu1 %v7347_v1 }
 0x2e3   : > { %6759 = vmatprep.subr.bf16.mxu0 %v7348_v5  ;;  %6781 = vmatprep.subr.bf16.mxu1 %v7349_v6  ;;  %v2423_v6 = vadd.f32 %v9543_v15, %v8142_v25 }
 0x2e6   : > { %6760 = vmatpush3.bf16.msra.mxu0 %v7350_v10  ;;  %6782 = vmatpush3.bf16.msra.mxu1 %v7351_v20  ;;  %v9544_v10 = vmax.f32 %v8160_v35, 0.0 }
 0x2e7   : > { %6761 = vmatprep.subr.bf16.mxu0 %v7352_v28  ;;  %6783 = vmatprep.subr.bf16.mxu1 %v7353_v38 }
 0x2e8   : > { %v2425_v20 = vadd.f32 %v9544_v10, %v8144_v26 }
 0x2ea   : > { %6762 = vmatpush3.bf16.msra.mxu0 %v7354_v39  ;;  %6784 = vmatpush3.bf16.msra.mxu1 %v7355_v40 }
 0x2eb   : > { %6763 = vmatprep.subr.bf16.mxu0 %v7356_v41  ;;  %6785 = vmatprep.subr.bf16.mxu1 %v7357_v45 }
 0x2ee   : > { %6764 = vmatpush3.bf16.msra.mxu0 %v7358_v46  ;;  %6786 = vmatpush3.bf16.msra.mxu1 %v7359_v50 }
 0x2ef   : > { %6765 = vmatprep.subr.bf16.mxu0 %v7360_v51  ;;  %6787 = vmatprep.subr.bf16.mxu1 %v7361_v52 }
 0x2f2   : > { %6766 = vmatpush3.bf16.msra.mxu0 %v7362_v55  ;;  %6788 = vmatpush3.bf16.msra.mxu1 %v7363_v53 }
 0x2f3   : > { %6767 = vmatprep.subr.bf16.mxu0 %v7364_v56  ;;  %6789 = vmatprep.subr.bf16.mxu1 %v7365_v23 }
 0x2f6   : > { %6768 = vmatpush3.bf16.msra.mxu0 %v7366_v47  ;;  %6790 = vmatpush3.bf16.msra.mxu1 %v7367_v48 }
 0x2f7   : > { %6769 = vmatprep.subr.bf16.mxu0 %v7368_v22  ;;  %6791 = vmatprep.subr.bf16.mxu1 %v7369_v30 }
 0x2fa   : > { %6770 = vmatpush3.bf16.msra.mxu0 %v7370_v32  ;;  %6792 = vmatpush3.bf16.msra.mxu1 %v7371_v9 }
 0x2fb   : > { %6799 = vmatprep.subr.bf16.mxu0 %v7374_v43  ;;  %6821 = vmatprep.subr.bf16.mxu1 %v7375_v63 }
 0x3b0   : > { %v3241_v59 = vpop.f32.mrb[16].mxu0  ;;  %v3284_v36 = vpop.f32.mrb[16].mxu1 }
 0x3b1   : > { %v3301_v58 = vmul.f32 0.1, %v3241_v59  ;;  %v3303_v57 = vmul.f32 0.1, %v3284_v36  ;;  %v3243_v61 = vpop.f32.mrb[17].mxu0  ;;  %v3286_v62 = vpop.f32.mrb[17].mxu1 }
 0x3b2   : > { %v3302_v0 = vmul.f32 0.1, %v3243_v61  ;;  %v3304_v1 = vmul.f32 0.1, %v3286_v62  ;;  %v3245_v14 = vpop.f32.mrb[18].mxu0  ;;  %v3288_v5 = vpop.f32.mrb[18].mxu1 }
 0x3b3   : > { %v3309_v28 = vsub.f32 %v2418_v44, %v3301_v58  ;;  %v3311_v38 = vsub.f32 %v2420_v60, %v3303_v57  ;;  %v3305_v19 = vmul.f32 0.1, %v3245_v14  ;;  %v3307_v39 = vmul.f32 0.1, %v3288_v5  ;;  %v3247_v40 = vpop.f32.mrb[19].mxu0  ;;  %v3290_v41 = vpop.f32.mrb[19].mxu1 }
 0x3b4   : > { %v3310_v24 = vsub.f32 %v2419_v33, %v3302_v0  ;;  %v3312_v45 = vsub.f32 %v2421_v34, %v3304_v1  ;;  %v3306_v46 = vmul.f32 0.1, %v3247_v40  ;;  %v3308_v50 = vmul.f32 0.1, %v3290_v41  ;;  %v3393_v14 = vld [vmem:[#allocation3] sm:$0xff]  ;;  %v3396_v5 = vld [vmem:[#allocation3 + $0x8] sm:$0xff] }
 0x3b5   : > { %v8871_v51 = vadd.f32 -0.01, %v3309_v28  ;;  %v8873_v52 = vadd.f32 -0.01, %v3311_v38  ;;  %v3313_v29 = vsub.f32 %v2422_v17, %v3305_v19  ;;  %v3315_v55 = vsub.f32 %v2424_v18, %v3307_v39 }
 0x3b6   : > { %v8875_v53 = vadd.f32 -0.01, %v3310_v24  ;;  %v8877_v35 = vadd.f32 -0.01, %v3312_v45  ;;  %v3314_v56 = vsub.f32 %v2423_v6, %v3306_v46  ;;  %v3316_v23 = vsub.f32 %v2425_v20, %v3308_v50  ;;  %v3401_v46 = vld [vmem:[#allocation3 + $0x20] sm:$0x11] }
 0x3b7   : > { %v3325_v47 = vmax.f32 %v8871_v51, 0.0  ;;  %v3327_v48 = vmax.f32 %v8873_v52, 0.0  ;;  %v8881_v22 = vadd.f32 -0.01, %v3313_v29  ;;  %v8883_v30 = vadd.f32 -0.01, %v3315_v55 }
 0x3b8   : > { %v3326_v32 = vmax.f32 %v8875_v53, 0.0  ;;  %v3328_v9 = vmax.f32 %v8877_v35, 0.0  ;;  %v8887_v43 = vadd.f32 -0.01, %v3314_v56  ;;  %v8889_v63 = vadd.f32 -0.01, %v3316_v23 }
 0x3b9   : > { %v9524_v44 = vmax.f32 %v8881_v22, 0.0  ;;  %v9523_v59 = vmax.f32 %v8883_v30, 0.0  ;;  %v3404_v50 = vld [vmem:[#allocation3 + $0x28] sm:$0x11] }
 0x3ba   : > { %v6617_v60 = vpack.c.bf16 %v3326_v32, %v3325_v47  ;;  %v6618_v36 = vpack.c.bf16 %v3328_v9, %v3327_v48  ;;  %v9522_v37 = vmax.f32 %v8887_v43, 0.0  ;;  %v9521_v33 = vmax.f32 %v8889_v63, 0.0 }
 0x3bb   : > { %v9547_v35 = vmax.f32 %v8887_v43, 0.0 }
 0x3bc   : > { %v3354_v27 = vshrl.u32 %v6617_v60, 16  ;;  %v3361_v34 = vshrl.u32 %v6618_v36, 16  ;;  %v6619_v58 = vpack.c.bf16 %v9522_v37, %v9524_v44  ;;  %v6620_v57 = vpack.c.bf16 %v9521_v33, %v9523_v59 }
 0x3bd   : > { %v3357_v62 = vshll.u32 %v6617_v60, 16  ;;  %v3364_v17 = vshll.u32 %v6618_v36, 16 }
 0x3be   : > { %v3356_v61 = vrot.slane %v3354_v27, 7  ;;  %v3363_v11 = vrot.slane %v3361_v34, 7  ;;  %v3369_v12 = vshrl.u32 %v6619_v58, 16  ;;  %v3378_v18 = vshrl.u32 %v6620_v57, 16 }
 0x3bf   : > { %v3372_v6 = vshll.u32 %v6619_v58, 16  ;;  %v3381_v20 = vshll.u32 %v6620_v57, 16 }
 0x3c0   : > { %v3359_v0 = vor.u32 %v3357_v62, %v3356_v61  ;;  %v3366_v1 = vor.u32 %v3364_v17, %v3363_v11  ;;  %v3371_v15 = vrot.slane %v3369_v12, 7  ;;  %v3380_v10 = vrot.slane %v3378_v18, 7 }
 0x3c1   : > { %v3367_v28 = vrot.slane %v3356_v61, 4  ;;  %v3376_v19 = vrot.slane %v3363_v11, 4 }
 0x3c2   : > { %v3394_v38 = vsel %vm8167_vm5, %v3359_v0, %v3393_v14  ;;  %v3397_v39 = vsel %vm8167_vm5, %v3366_v1, %v3396_v5  ;;  %v3374_v40 = vor.u32 %v3372_v6, %v3371_v15  ;;  %v3385_v41 = vrot.slane %v3371_v15, 4 }
 0x3c3   : > { %3395 = vst [vmem:[#allocation3] sm:$0xff] %v3394_v38  ;;  %3398 = vst [vmem:[#allocation3 + $0x8] sm:$0xff] %v3397_v39  ;;  %v3383_v24 = vor.u32 %v3381_v20, %v3380_v10  ;;  %v3386_v45 = vrot.slane %v3380_v10, 4 }
 0x3c4   : > { %v8917_v29 = vsel %vm7761_vm7, %v3367_v28, %v3374_v40  ;;  %v3402_v55 = vsel %vm8001_vm15, %v3385_v41, %v3401_v46 }
 0x3c5   : > { %v8923_v56 = vsel %vm7761_vm7, %v3376_v19, %v3383_v24  ;;  %v3405_v42 = vsel %vm8001_vm15, %v3386_v45, %v3404_v50  ;;  %3403 = vst [vmem:[#allocation3 + $0x20] sm:$0x11] %v3402_v55  ;;  %v6263_v23 = vcombine.high %v3394_v38, %v8917_v29  ;;  %v8930_v36 = vcombine.low %v3394_v38, %v8917_v29 }
 0x3c6   : > { %3406 = vst [vmem:[#allocation3 + $0x28] sm:$0x11] %v3405_v42  ;;  %v6265_v60 = vcombine.high %v3397_v39, %v8923_v56  ;;  %v8933_v27 = vcombine.low %v3397_v39, %v8923_v56 }
 0x3c7   : > { %v3582_v34 = vshll.u32 %v6263_v23, 16  ;;  %v3570_v57 = vshll.u32 %v8930_v36, 16  ;;  %v3580_v0 = vshrl.u32 %v6263_v23, 16  ;;  %v3568_v15 = vshrl.u32 %v8930_v36, 16 }
 0x3c8   : > { %v3606_v58 = vshll.u32 %v6265_v60, 16  ;;  %v3594_v61 = vshll.u32 %v8933_v27, 16  ;;  %v3604_v1 = vshrl.u32 %v6265_v60, 16  ;;  %v3592_v6 = vshrl.u32 %v8933_v27, 16 }
 0x3c9   : > { %v3584_v11 = vrot.slane %v3582_v34, 1  ;;  %v3572_v12 = vrot.slane %v3570_v57, 1 }
 0x3ca   : > { %v8937_v21 = vld [vmem:[#allocation3] sm:$0xee]  ;;  %v8939_v62 = vld [vmem:[#allocation3 + $0x8] sm:$0xee]  ;;  %v3608_v17 = vrot.slane %v3606_v58, 1  ;;  %v3596_v18 = vrot.slane %v3594_v61, 1 }
 0x3cb   : > { %v6398_v10 = vcombine.low %v8937_v21, %v8917_v29  ;;  %v6400_v20 = vcombine.low %v8939_v62, %v8923_v56  ;;  %v3585_v40 = vor.u32 %v3584_v11, %v3580_v0  ;;  %v3573_v24 = vor.u32 %v3572_v12, %v3568_v15  ;;  %v7378_v11 = vld [vmem:[%s9512_s2] sm:$0xff]   ;;  %v7380_v15 = vld [vmem:[%s9512_s2 + $0x48] sm:$0xff]  }
 0x3cc   : > { %v3475_v14 = vld [vmem:[#allocation3 + $0x20] sm:$0x11]  ;;  %v3609_v41 = vor.u32 %v3608_v17, %v3604_v1  ;;  %v3597_v45 = vor.u32 %v3596_v18, %v3592_v6  ;;  %v7379_v17 = vld [vmem:[%s9512_s2 + $0x80] sm:$0xff]  }
 0x3cd   : > { %v3476_v5 = vld [vmem:[#allocation3 + $0x28] sm:$0x11]  ;;  %v8947_v28 = vcombine.high %v3475_v14, %v3475_v14  ;;  %v6266_v19 = vcombine.low %v3475_v14, %v3475_v14  ;;  %v4247_v34 = vrot.slane %v6398_v10, 1  ;;  %v4253_v57 = vrot.slane %v6400_v20, 1  ;;  %v7381_v6 = vld [vmem:[%s9512_s2 + $0xc8] sm:$0xff]  }
 0x3ce   : > { %v8949_v38 = vcombine.high %v3476_v5, %v3476_v5  ;;  %v6268_v39 = vcombine.low %v3476_v5, %v3476_v5  ;;  %v7386_v10 = vld [vmem:[%s9512_s2 + $0x10] sm:$0xff]   ;;  %v7389_v20 = vld [vmem:[%s9512_s2 + $0xd8] sm:$0xff]  }
 0x3cf   : > { %v3587_v46 = vshll.u32 %v8947_v28, 16  ;;  %v3575_v55 = vshll.u32 %v6266_v19, 16  ;;  %v4248_v58 = vrot.slane %v6266_v19, 1  ;;  %v7390_v19 = vld [vmem:[%s9512_s2 + $0x18] sm:$0xff]  }
 0x3d0   : > { %v3611_v50 = vshll.u32 %v8949_v38, 16  ;;  %v3599_v42 = vshll.u32 %v6268_v39, 16  ;;  %v4254_v61 = vrot.slane %v6268_v39, 1  ;;  %v7391_v39 = vld [vmem:[%s9512_s2 + $0x98] sm:$0xff]  }
 0x3d1   : > { %v3589_v33 = vrot.slane %v3587_v46, 1  ;;  %v3577_v59 = vrot.slane %v3575_v55, 1  ;;  %v8960_v12 = vsel %vm891_vm10, %v4247_v34, %v4248_v58  ;;  %v7396_v46 = vld [vmem:[%s9512_s2 + $0x68] sm:$0xff]   ;;  %v7400_v34 = vld [vmem:[%s9512_s2 + $0x70] sm:$0xff]  }
 0x3d2   : > { %v3613_v37 = vrot.slane %v3611_v50, 1  ;;  %v3601_v44 = vrot.slane %v3599_v42, 1  ;;  %v8963_v18 = vsel %vm891_vm10, %v4253_v57, %v4254_v61  ;;  %v7397_v50 = vld [vmem:[%s9512_s2 + $0xe8] sm:$0xff]   ;;  %v7401_v58 = vld [vmem:[%s9512_s2 + $0xf0] sm:$0xff]  }
 0x3d3   : > { %v3590_v0 = vsel %vm347_vm9, %v3585_v40, %v3589_v33  ;;  %v3578_v14 = vsel %vm347_vm9, %v3573_v24, %v3577_v59  ;;  %v7382_v59 = vld [vmem:[%s9512_s2 + $0x8] sm:$0xff]   ;;  %v7385_v33 = vld [vmem:[%s9512_s2 + $0xd0] sm:$0xff]   ;;  %v7392_v40 = vld [vmem:[%s9512_s2 + $0x60] sm:$0xff]  }
 0x3d4   : > { %v3614_v1 = vsel %vm347_vm9, %v3609_v41, %v3613_v37  ;;  %v3602_v5 = vsel %vm347_vm9, %v3597_v45, %v3601_v44  ;;  %3843 = vmatprep.mubr.bf16.mxu0 %v3590_v0  ;;  %v7383_v44 = vld [vmem:[%s9512_s2 + $0x88] sm:$0xff]   ;;  %v7384_v37 = vld [vmem:[%s9512_s2 + $0x50] sm:$0xff]   ;;  %v7393_v41 = vld [vmem:[%s9512_s2 + $0xe0] sm:$0xff]  }
 0x3d5   : > { %3884 = vmatprep.mubr.bf16.mxu1 %v3614_v1  ;;  %3844 = vmatmul.mubr.bf16.vlgmr.msra.gmra.mrb[20].mxu0 %v3578_v14  ;;  %v7394_v24 = vld [vmem:[%s9512_s2 + $0x20] sm:$0xff]   ;;  %v7398_v55 = vld [vmem:[%s9512_s2 + $0x28] sm:$0xff]   ;;  %v7402_v57 = vld [vmem:[%s9512_s2 + $0x30] sm:$0xff]  }
 0x3d6   : > { %3885 = vmatmul.mubr.bf16.vlgmr.msra.gmra.mrb[20].mxu1 %v3602_v5  ;;  %6800 = vmatpush3.bf16.msra.mxu0 %v7378_v11  ;;  %v7395_v45 = vld [vmem:[%s9512_s2 + $0xa0] sm:$0xff]   ;;  %v7399_v42 = vld [vmem:[%s9512_s2 + $0xa8] sm:$0xff]   ;;  %v7403_v61 = vld [vmem:[%s9512_s2 + $0xb0] sm:$0xff]  }
 0x3d7   : > { %6822 = vmatpush3.bf16.msra.mxu1 %v7379_v17  ;;  %4121 = vmatprep.mubr.bf16.mxu0 %v6263_v23  ;;  %v7387_v23 = vld [vmem:[%s9512_s2 + $0x90] sm:$0xff]   ;;  %v7404_v11 = vld [vmem:[%s9512_s2 + $0x78] sm:$0xff]   ;;  %v7408_v14 = vld [vmem:[%s9512_s2 + $0x240] sm:$0xff]  }
 0x3d8   : > { %4162 = vmatprep.mubr.bf16.mxu1 %v6265_v60  ;;  %6801 = vmatprep.subr.bf16.mxu0 %v7380_v15  ;;  %v7388_v60 = vld [vmem:[%s9512_s2 + $0x58] sm:$0xff]   ;;  %v7409_v5 = vld [vmem:[%s9512_s2 + $0x2c0] sm:$0xff]   ;;  %v6399_v15 = vcombine.high %v8937_v21, %v8917_v29 }
 0x3d9   : > { %6823 = vmatprep.subr.bf16.mxu1 %v7381_v6  ;;  %v7405_v17 = vld [vmem:[%s9512_s2 + $0xf8] sm:$0xff]   ;;  %v6401_v6 = vcombine.high %v8939_v62, %v8923_v56  ;;  %v7411_v29 = vld [vmem:[%s9512_s2 + $0x280] sm:$0xff]   ;;  %v7412_v56 = vld [vmem:[%s9512_s2 + $0x248] sm:$0xff]  }
 0x3da   : > { %6802 = vmatpush3.bf16.msra.mxu0 %v7382_v59  ;;  %v7406_v0 = vld [vmem:[%s9512_s2 + $0x38] sm:$0xff]   ;;  %v4251_v59 = vrot.slane %v8947_v28, 1  ;;  %v7413_v62 = vld [vmem:[%s9512_s2 + $0x2c8] sm:$0xff]  }
 0x3db   : > { %6824 = vmatpush3.bf16.msra.mxu1 %v7383_v44  ;;  %6803 = vmatprep.subr.bf16.mxu0 %v7384_v37  ;;  %v7407_v1 = vld [vmem:[%s9512_s2 + $0xb8] sm:$0xff]   ;;  %v7410_v44 = vld [vmem:[%s9512_s2 + $0x200] sm:$0xff]   ;;  %v4257_v37 = vrot.slane %v8949_v38, 1  ;;  %v4256_v21 = vrot.slane %v6401_v6, 1 }
 0x3dc   : > { %6825 = vmatprep.subr.bf16.mxu1 %v7385_v33  ;;  %v4250_v33 = vrot.slane %v6399_v15, 1  ;;  %v7442_v15 = vld [vmem:[%s9511_s1 + $0x104] ss:$16 sps:$4 sm:$0xff]   ;;  %v7445_v6 = vld [vmem:[%s9511_s1 + $0x10c] ss:$16 sps:$4 sm:$0xff]  }
 0x3dd   : > { %v4258_v38 = vsel %vm891_vm10, %v4256_v21, %v4257_v37  ;;  %v7446_v37 = vld [vmem:[%s9511_s1 + $0x120] ss:$16 sps:$4 sm:$0xff]   ;;  %v7457_v21 = vld [vmem:[%s9511_s1 + $0x14c] ss:$16 sps:$4 sm:$0xff]  }
 0x3de   : > { %6804 = vmatpush3.bf16.msra.mxu0 %v7386_v10  ;;  %v4252_v28 = vsel %vm891_vm10, %v4250_v33, %v4251_v59  ;;  %v7414_v10 = vld [vmem:[%s9512_s2 + $0x208] sm:$0xff]   ;;  %v7440_v59 = vld [vmem:[%s9511_s1 + $0x100] ss:$16 sps:$4 sm:$0xff]  }
 0x3df   : > { %6826 = vmatpush3.bf16.msra.mxu1 %v7387_v23  ;;  %6805 = vmatprep.subr.bf16.mxu0 %v7388_v60  ;;  %v7415_v23 = vld [vmem:[%s9512_s2 + $0x288] sm:$0xff]   ;;  %v7418_v60 = vld [vmem:[%s9512_s2 + $0x210] sm:$0xff]  }
 0x3e0   : > { %6827 = vmatprep.subr.bf16.mxu1 %v7389_v20  ;;  %v7419_v20 = vld [vmem:[%s9512_s2 + $0x290] sm:$0xff]   ;;  %v7449_v33 = vld [vmem:[%s9511_s1 + $0x128] ss:$16 sps:$4 sm:$0xff]  }
 0x3e2   : > { %6806 = vmatpush3.bf16.msra.mxu0 %v7390_v19  ;;  %v7420_v19 = vld [vmem:[%s9512_s2 + $0x258] sm:$0xff]  }
 0x3e3   : > { %6828 = vmatpush3.bf16.msra.mxu1 %v7391_v39  ;;  %6807 = vmatprep.subr.bf16.mxu0 %v7392_v40  ;;  %v7421_v39 = vld [vmem:[%s9512_s2 + $0x2d8] sm:$0xff]  }
 0x3e4   : > { %6829 = vmatprep.subr.bf16.mxu1 %v7393_v41  ;;  %v7422_v40 = vld [vmem:[%s9512_s2 + $0x218] sm:$0xff]  }
 0x3e5   : > { %v7423_v41 = vld [vmem:[%s9512_s2 + $0x298] sm:$0xff]  }
 0x3e6   : > { %6808 = vmatpush3.bf16.msra.mxu0 %v7394_v24  ;;  %v7424_v24 = vld [vmem:[%s9512_s2 + $0x260] sm:$0xff]  }
 0x3e7   : > { %6830 = vmatpush3.bf16.msra.mxu1 %v7395_v45  ;;  %6809 = vmatprep.subr.bf16.mxu0 %v7396_v46  ;;  %v7425_v45 = vld [vmem:[%s9512_s2 + $0x2e0] sm:$0xff]  }
 0x3e8   : > { %6831 = vmatprep.subr.bf16.mxu1 %v7397_v50  ;;  %v7426_v46 = vld [vmem:[%s9512_s2 + $0x220] sm:$0xff]  }
 0x3e9   : > { %v7427_v50 = vld [vmem:[%s9512_s2 + $0x2a0] sm:$0xff]  }
 0x3ea   : > { %6810 = vmatpush3.bf16.msra.mxu0 %v7398_v55  ;;  %v7428_v55 = vld [vmem:[%s9512_s2 + $0x268] sm:$0xff]  }
 0x3eb   : > { %6832 = vmatpush3.bf16.msra.mxu1 %v7399_v42  ;;  %6811 = vmatprep.subr.bf16.mxu0 %v7400_v34  ;;  %v7429_v42 = vld [vmem:[%s9512_s2 + $0x2e8] sm:$0xff]  }
 0x3ec   : > { %6833 = vmatprep.subr.bf16.mxu1 %v7401_v58  ;;  %v7430_v34 = vld [vmem:[%s9512_s2 + $0x228] sm:$0xff]  }
 0x3ed   : > { %v7431_v58 = vld [vmem:[%s9512_s2 + $0x2a8] sm:$0xff]  }
 0x3ee   : > { %6812 = vmatpush3.bf16.msra.mxu0 %v7402_v57  ;;  %v7432_v57 = vld [vmem:[%s9512_s2 + $0x270] sm:$0xff]  }
 0x3ef   : > { %6834 = vmatpush3.bf16.msra.mxu1 %v7403_v61  ;;  %6813 = vmatprep.subr.bf16.mxu0 %v7404_v11  ;;  %v7433_v61 = vld [vmem:[%s9512_s2 + $0x2f0] sm:$0xff]  }
 0x3f0   : > { %6835 = vmatprep.subr.bf16.mxu1 %v7405_v17  ;;  %v7434_v11 = vld [vmem:[%s9512_s2 + $0x230] sm:$0xff]  }
 0x3f1   : > { %v7435_v17 = vld [vmem:[%s9512_s2 + $0x2b0] sm:$0xff]  }
 0x3f2   : > { %6814 = vmatpush3.bf16.msra.mxu0 %v7406_v0  ;;  %v7436_v0 = vld [vmem:[%s9512_s2 + $0x278] sm:$0xff]  }
 0x3f3   : > { %6836 = vmatpush3.bf16.msra.mxu1 %v7407_v1  ;;  %6843 = vmatprep.subr.bf16.mxu0 %v7408_v14  ;;  %v7437_v1 = vld [vmem:[%s9512_s2 + $0x2f8] sm:$0xff]  }
 0x3f4   : > { %6865 = vmatprep.subr.bf16.mxu1 %v7409_v5  ;;  %v7438_v14 = vld [vmem:[%s9512_s2 + $0x238] sm:$0xff]  }
 0x3f5   : > { %4122 = vmatmul.mubr.bf16.vlgmr.msra.gmra.mrb[24].mxu0 %v8930_v36  ;;  %v7416_v36 = vld [vmem:[%s9512_s2 + $0x250] sm:$0xff]   ;;  %v7439_v5 = vld [vmem:[%s9512_s2 + $0x2b8] sm:$0xff]  }
 0x3f6   : > { %4163 = vmatmul.mubr.bf16.vlgmr.msra.gmra.mrb[24].mxu1 %v8933_v27  ;;  %6844 = vmatpush3.bf16.msra.mxu0 %v7410_v44  ;;  %v7417_v27 = vld [vmem:[%s9512_s2 + $0x2d0] sm:$0xff]   ;;  %v7451_v44 = vld [vmem:[%s9511_s1 + $0x12c] ss:$16 sps:$4 sm:$0xff]  }
 0x3f7   : > { %4487 = vmatprep.mubr.bf16.mxu0 %v4252_v28  ;;  %6866 = vmatpush3.bf16.msra.mxu1 %v7411_v29  ;;  %v7454_v29 = vld [vmem:[%s9511_s1 + $0x144] ss:$16 sps:$4 sm:$0xff]  }
 0x3f8   : > { %4528 = vmatprep.mubr.bf16.mxu1 %v4258_v38  ;;  %6845 = vmatprep.subr.bf16.mxu0 %v7412_v56  ;;  %v7452_v56 = vld [vmem:[%s9511_s1 + $0x140] ss:$16 sps:$4 sm:$0xff]   ;;  %v7460_v28 = vld [vmem:[%s9511_s1 + $0x164] ss:$16 sps:$4 sm:$0xff]   ;;  %v7463_v38 = vld [vmem:[%s9511_s1 + $0x16c] ss:$16 sps:$4 sm:$0xff]  }
 0x3f9   : > { %6867 = vmatprep.subr.bf16.mxu1 %v7413_v62  ;;  %v7455_v62 = vld [vmem:[%s9511_s1 + $0x148] ss:$16 sps:$4 sm:$0xff]  }
 0x3fa   : > { %6846 = vmatpush3.bf16.msra.mxu0 %v7414_v10  ;;  %v7458_v10 = vld [vmem:[%s9511_s1 + $0x160] ss:$16 sps:$4 sm:$0xff]  }
 0x3fb   : > { %6868 = vmatpush3.bf16.msra.mxu1 %v7415_v23  ;;  %6847 = vmatprep.subr.bf16.mxu0 %v7416_v36  ;;  %v7461_v23 = vld [vmem:[%s9511_s1 + $0x168] ss:$16 sps:$4 sm:$0xff]   ;;  %v7466_v36 = vld [vmem:[%s9511_s1 + $0x184] ss:$16 sps:$4 sm:$0xff]  }
 0x3fc   : > { %6869 = vmatprep.subr.bf16.mxu1 %v7417_v27  ;;  %v7469_v27 = vld [vmem:[%s9511_s1 + $0x18c] ss:$16 sps:$4 sm:$0xff]  }
 0x3fe   : > { %6848 = vmatpush3.bf16.msra.mxu0 %v7418_v60  ;;  %v7464_v60 = vld [vmem:[%s9511_s1 + $0x180] ss:$16 sps:$4 sm:$0xff]  }
 0x3ff   : > { %6870 = vmatpush3.bf16.msra.mxu1 %v7419_v20  ;;  %6849 = vmatprep.subr.bf16.mxu0 %v7420_v19  ;;  %v7467_v20 = vld [vmem:[%s9511_s1 + $0x188] ss:$16 sps:$4 sm:$0xff]   ;;  %v7472_v19 = vld [vmem:[%s9511_s1 + $0x1a4] ss:$16 sps:$4 sm:$0xff]  }
 0x400   : > { %6871 = vmatprep.subr.bf16.mxu1 %v7421_v39  ;;  %v7470_v39 = vld [vmem:[%s9511_s1 + $0x1a0] ss:$16 sps:$4 sm:$0xff]  }
 0x402   : > { %6850 = vmatpush3.bf16.msra.mxu0 %v7422_v40  ;;  %v7473_v40 = vld [vmem:[%s9511_s1 + $0x1a8] ss:$16 sps:$4 sm:$0xff]  }
 0x403   : > { %6872 = vmatpush3.bf16.msra.mxu1 %v7423_v41  ;;  %6851 = vmatprep.subr.bf16.mxu0 %v7424_v24  ;;  %v7475_v41 = vld [vmem:[%s9511_s1 + $0x1ac] ss:$16 sps:$4 sm:$0xff]   ;;  %v7478_v24 = vld [vmem:[%s9511_s1 + $0x1c4] ss:$16 sps:$4 sm:$0xff]  }
 0x404   : > { %6873 = vmatprep.subr.bf16.mxu1 %v7425_v45  ;;  %v7481_v45 = vld [vmem:[%s9511_s1 + $0x1cc] ss:$16 sps:$4 sm:$0xff]  }
 0x406   : > { %6852 = vmatpush3.bf16.msra.mxu0 %v7426_v46  ;;  %v7476_v46 = vld [vmem:[%s9511_s1 + $0x1c0] ss:$16 sps:$4 sm:$0xff]  }
 0x407   : > { %6874 = vmatpush3.bf16.msra.mxu1 %v7427_v50  ;;  %6853 = vmatprep.subr.bf16.mxu0 %v7428_v55  ;;  %v7479_v50 = vld [vmem:[%s9511_s1 + $0x1c8] ss:$16 sps:$4 sm:$0xff]   ;;  %v7484_v55 = vld [vmem:[%s9511_s1 + $0x1e4] ss:$16 sps:$4 sm:$0xff]  }
 0x408   : > { %6875 = vmatprep.subr.bf16.mxu1 %v7429_v42  ;;  %v7487_v42 = vld [vmem:[%s9511_s1 + $0x1ec] ss:$16 sps:$4 sm:$0xff]  }
 0x40a   : > { %6854 = vmatpush3.bf16.msra.mxu0 %v7430_v34  ;;  %v7482_v34 = vld [vmem:[%s9511_s1 + $0x1e0] ss:$16 sps:$4 sm:$0xff]  }
 0x40b   : > { %6876 = vmatpush3.bf16.msra.mxu1 %v7431_v58  ;;  %6855 = vmatprep.subr.bf16.mxu0 %v7432_v57  ;;  %v7485_v58 = vld [vmem:[%s9511_s1 + $0x1e8] ss:$16 sps:$4 sm:$0xff]   ;;  %v7490_v57 = vld [vmem:[%s9511_s1 + $0x4] ss:$16 sps:$4 sm:$0xff]  }
 0x40c   : > { %6877 = vmatprep.subr.bf16.mxu1 %v7433_v61  ;;  %v7493_v61 = vld [vmem:[%s9511_s1 + $0xc] ss:$16 sps:$4 sm:$0xff]  }
 0x40e   : > { %6856 = vmatpush3.bf16.msra.mxu0 %v7434_v11 }
 0x40f   : > { %6878 = vmatpush3.bf16.msra.mxu1 %v7435_v17  ;;  %6857 = vmatprep.subr.bf16.mxu0 %v7436_v0 }
 0x410   : > { %6879 = vmatprep.subr.bf16.mxu1 %v7437_v1 }
 0x412   : > { %6858 = vmatpush3.bf16.msra.mxu0 %v7438_v14 }
 0x413   : > { %6880 = vmatpush3.bf16.msra.mxu1 %v7439_v5  ;;  %4828 = vmatprep.subr.bf16.mxu0 %v7442_v15 }
 0x414   : > { %4871 = vmatprep.subr.bf16.mxu1 %v7445_v6 }
 0x415   : > { %4488 = vmatmul.mubr.bf16.vlgmr.msra.gmra.mrb[28].mxu0 %v8960_v12  ;;  %v7443_v12 = vld [vmem:[%s9511_s1 + $0x108] ss:$16 sps:$4 sm:$0xff]  }
 0x416   : > { %4529 = vmatmul.mubr.bf16.vlgmr.msra.gmra.mrb[28].mxu1 %v8963_v18  ;;  %4860 = vmatprep.mubr.bf16.mxu0 %v7595_v2  ;;  %v7448_v18 = vld [vmem:[%s9511_s1 + $0x124] ss:$16 sps:$4 sm:$0xff]  }
 0x417   : > { %4903 = vmatprep.mubr.bf16.mxu1 %v7595_v2  ;;  %4829 = vmatpush1.bf16.msra.mxu0 %v7440_v59 }
 0x418   : > { %4872 = vmatpush1.bf16.msra.mxu1 %v7443_v12  ;;  %4830 = vmatprep.subr.bf16.mxu0 %v7448_v18 }
 0x419   : > { %4873 = vmatprep.subr.bf16.mxu1 %v7451_v44 }
 0x41b   : > { %4831 = vmatpush1.bf16.msra.mxu0 %v7446_v37 }
 0x41c   : > { %4874 = vmatpush1.bf16.msra.mxu1 %v7449_v33  ;;  %4832 = vmatprep.subr.bf16.mxu0 %v7454_v29 }
 0x41d   : > { %4875 = vmatprep.subr.bf16.mxu1 %v7457_v21 }
 0x41f   : > { %4833 = vmatpush1.bf16.msra.mxu0 %v7452_v56 }
 0x420   : > { %4876 = vmatpush1.bf16.msra.mxu1 %v7455_v62  ;;  %4834 = vmatprep.subr.bf16.mxu0 %v7460_v28 }
 0x421   : > { %4877 = vmatprep.subr.bf16.mxu1 %v7463_v38 }
 0x423   : > { %4835 = vmatpush1.bf16.msra.mxu0 %v7458_v10 }
 0x424   : > { %4878 = vmatpush1.bf16.msra.mxu1 %v7461_v23  ;;  %4836 = vmatprep.subr.bf16.mxu0 %v7466_v36 }
 0x425   : > { %4879 = vmatprep.subr.bf16.mxu1 %v7469_v27 }
 0x427   : > { %4837 = vmatpush1.bf16.msra.mxu0 %v7464_v60 }
 0x428   : > { %4880 = vmatpush1.bf16.msra.mxu1 %v7467_v20  ;;  %4838 = vmatprep.subr.bf16.mxu0 %v7472_v19 }
 0x429   : > { %4881 = vmatprep.subr.bf16.mxu1 %v7475_v41 }
 0x42b   : > { %4839 = vmatpush1.bf16.msra.mxu0 %v7470_v39 }
 0x42c   : > { %4882 = vmatpush1.bf16.msra.mxu1 %v7473_v40  ;;  %4840 = vmatprep.subr.bf16.mxu0 %v7478_v24 }
 0x42d   : > { %4883 = vmatprep.subr.bf16.mxu1 %v7481_v45 }
 0x42f   : > { %4841 = vmatpush1.bf16.msra.mxu0 %v7476_v46 }
 0x430   : > { %4884 = vmatpush1.bf16.msra.mxu1 %v7479_v50  ;;  %4842 = vmatprep.subr.bf16.mxu0 %v7484_v55 }
 0x431   : > { %4885 = vmatprep.subr.bf16.mxu1 %v7487_v42 }
 0x433   : > { %4843 = vmatpush1.bf16.msra.mxu0 %v7482_v34 }
 0x434   : > { %4886 = vmatpush1.bf16.msra.mxu1 %v7485_v58  ;;  %5075 = vmatprep.subr.bf16.mxu0 %v7490_v57 }
 0x435   : > { %5118 = vmatprep.subr.bf16.mxu1 %v7493_v61 }
 0x4a8   : > { %v6771_v11 = vpop.f32.mrb[20].mxu0 }
 0x4a9   : > { %v6793_v17 = vpop.f32.mrb[20].mxu1  ;;  %v6772_v0 = vpop.f32.mrb[21].mxu0 }
 0x4aa   : > { %v6794_v1 = vpop.f32.mrb[21].mxu1  ;;  %v6773_v14 = vadd.f32 %v6772_v0, %v6771_v11  ;;  %v6774_v15 = vpop.f32.mrb[22].mxu0 }
 0x4ab   : > { %v6795_v5 = vadd.f32 %v6794_v1, %v6793_v17  ;;  %v6796_v6 = vpop.f32.mrb[22].mxu1  ;;  %v6775_v59 = vpop.f32.mrb[23].mxu0 }
 0x4ac   : > { %v6797_v12 = vpop.f32.mrb[23].mxu1  ;;  %v6776_v44 = vadd.f32 %v6775_v59, %v6774_v15 }
 0x4ad   : > { %v3887_v18 = vadd.f32 %v6795_v5, %v6773_v14  ;;  %v6798_v37 = vadd.f32 %v6797_v12, %v6796_v6 }
 0x4af   : > { %v3890_v33 = vadd.f32 %v6798_v37, %v6776_v44 }
 0x4c8   : > { %v6815_v29 = vpop.f32.mrb[24].mxu0 }
 0x4c9   : > { %v6837_v21 = vpop.f32.mrb[24].mxu1  ;;  %v6816_v56 = vpop.f32.mrb[25].mxu0 }
 0x4ca   : > { %v6838_v62 = vpop.f32.mrb[25].mxu1  ;;  %v6817_v28 = vadd.f32 %v6816_v56, %v6815_v29  ;;  %v6818_v10 = vpop.f32.mrb[26].mxu0 }
 0x4cb   : > { %v6839_v38 = vadd.f32 %v6838_v62, %v6837_v21  ;;  %v6840_v23 = vpop.f32.mrb[26].mxu1  ;;  %v6819_v36 = vpop.f32.mrb[27].mxu0  ;;  %v4565_v21 = vld [vmem:[#allocation2] sm:$0xf] }
 0x4cc   : > { %v6841_v27 = vpop.f32.mrb[27].mxu1  ;;  %v4124_v60 = vadd.f32 %v6817_v28, %v3887_v18  ;;  %v6820_v20 = vadd.f32 %v6819_v36, %v6818_v10  ;;  %v4569_v10 = vld [vmem:[#allocation2 + $0x8] sm:$0x1] }
 0x4cd   : > { %v6842_v19 = vadd.f32 %v6841_v27, %v6840_v23 }
 0x4ce   : > { %v4165_v39 = vadd.f32 %v6839_v38, %v4124_v60  ;;  %v4127_v40 = vadd.f32 %v6820_v20, %v3890_v33 }
 0x4d0   : > { %v4168_v41 = vadd.f32 %v6842_v19, %v4127_v40 }
 0x4e8   : > { %v6859_v24 = vpop.f32.mrb[28].mxu0 }
 0x4e9   : > { %v6881_v45 = vpop.f32.mrb[28].mxu1  ;;  %v6860_v46 = vpop.f32.mrb[29].mxu0 }
 0x4ea   : > { %v6861_v50 = vadd.f32 %v6860_v46, %v6859_v24  ;;  %v6882_v55 = vpop.f32.mrb[29].mxu1  ;;  %v6862_v42 = vpop.f32.mrb[30].mxu0 }
 0x4eb   : > { %v6883_v34 = vadd.f32 %v6882_v55, %v6881_v45  ;;  %v6884_v58 = vpop.f32.mrb[30].mxu1  ;;  %v6863_v57 = vpop.f32.mrb[31].mxu0  ;;  %v7491_v55 = vld [vmem:[%s9511_s1 + $0x8] ss:$16 sps:$4 sm:$0xff]  }
 0x4ec   : > { %v6864_v61 = vadd.f32 %v6863_v57, %v6862_v42  ;;  %v6885_v11 = vpop.f32.mrb[31].mxu1  ;;  %v7501_v57 = vld [vmem:[%s9511_s1 + $0x2c] ss:$16 sps:$4 sm:$0xff]  }
 0x4ed   : > { %v4531_v17 = vadd.f32 %v6883_v34, %v6861_v50  ;;  %v6886_v0 = vadd.f32 %v6885_v11, %v6884_v58  ;;  %v7488_v50 = vld [vmem:[%s9511_s1] ss:$16 sps:$4 sm:$0xff]   ;;  %v7498_v58 = vld [vmem:[%s9511_s1 + $0x24] ss:$16 sps:$4 sm:$0xff]  }
 0x4ee   : > { %v7496_v11 = vld [vmem:[%s9511_s1 + $0x20] ss:$16 sps:$4 sm:$0xff]  }
 0x4ef   : > { %v4537_v1 = vadd.f32 %v4531_v17, %v4165_v39  ;;  %v4534_v14 = vadd.f32 %v6886_v0, %v6864_v61  ;;  %v7499_v17 = vld [vmem:[%s9511_s1 + $0x28] ss:$16 sps:$4 sm:$0xff]   ;;  %v7504_v0 = vld [vmem:[%s9511_s1 + $0x44] ss:$16 sps:$4 sm:$0xff]  }
 0x4f1   : > { %v6621_v5 = vpack.c.bf16 %v4537_v1, %v4537_v1  ;;  %v4538_v15 = vadd.f32 %v4534_v14, %v4168_v41  ;;  %v7507_v1 = vld [vmem:[%s9511_s1 + $0x4c] ss:$16 sps:$4 sm:$0xff]   ;;  %v7502_v14 = vld [vmem:[%s9511_s1 + $0x40] ss:$16 sps:$4 sm:$0xff]  }
 0x4f3   : > { %v4546_v6 = vshrl.u32 %v6621_v5, 16  ;;  %v6622_v59 = vpack.c.bf16 %v4538_v15, %v4538_v15  ;;  %v4549_v18 = vshll.u32 %v6621_v5, 16  ;;  %v7505_v5 = vld [vmem:[%s9511_s1 + $0x48] ss:$16 sps:$4 sm:$0xff]   ;;  %v7510_v15 = vld [vmem:[%s9511_s1 + $0x64] ss:$16 sps:$4 sm:$0xff]  }
 0x4f5   : > { %v4548_v12 = vrot.slane %v4546_v6, 7  ;;  %v4554_v44 = vshrl.u32 %v6622_v59, 16  ;;  %v4557_v29 = vshll.u32 %v6622_v59, 16  ;;  %v7513_v6 = vld [vmem:[%s9511_s1 + $0x6c] ss:$16 sps:$4 sm:$0xff]  }
 0x4f6   : > { %v7508_v59 = vld [vmem:[%s9511_s1 + $0x60] ss:$16 sps:$4 sm:$0xff]  }
 0x4f7   : > { %v4551_v37 = vor.u32 %v4549_v18, %v4548_v12  ;;  %v4556_v33 = vrot.slane %v4554_v44, 7  ;;  %v4552_v56 = vrot.slane %v4548_v12, 4  ;;  %v7511_v12 = vld [vmem:[%s9511_s1 + $0x68] ss:$16 sps:$4 sm:$0xff]   ;;  %v7516_v18 = vld [vmem:[%s9511_s1 + $0x84] ss:$16 sps:$4 sm:$0xff]  }
 0x4f8   : > { %v7519_v44 = vld [vmem:[%s9511_s1 + $0x8c] ss:$16 sps:$4 sm:$0xff]  }
 0x4f9   : > { %v4566_v62 = vsel %vm7766_vm8, %v4551_v37, %v4565_v21  ;;  %v4559_v28 = vor.u32 %v4557_v29, %v4556_v33  ;;  %v4561_v38 = vrot.slane %v4556_v33, 4  ;;  %v7514_v37 = vld [vmem:[%s9511_s1 + $0x80] ss:$16 sps:$4 sm:$0xff]   ;;  %v7517_v33 = vld [vmem:[%s9511_s1 + $0x88] ss:$16 sps:$4 sm:$0xff]  }
 0x4fa   : > { %4567 = vst [vmem:[#allocation2] sm:$0xf] %v4566_v62  ;;  %v7522_v29 = vld [vmem:[%s9511_s1 + $0xa4] ss:$16 sps:$4 sm:$0xff]   ;;  %v7525_v21 = vld [vmem:[%s9511_s1 + $0xac] ss:$16 sps:$4 sm:$0xff]  }
 0x4fb   : > { %v4560_v23 = vsel %vm7761_vm7, %v4552_v56, %v4559_v28  ;;  %v4570_v36 = vsel %vm7733_vm3, %v4561_v38, %v4569_v10  ;;  %v7520_v56 = vld [vmem:[%s9511_s1 + $0xa0] ss:$16 sps:$4 sm:$0xff]   ;;  %v7523_v62 = vld [vmem:[%s9511_s1 + $0xa8] ss:$16 sps:$4 sm:$0xff]   ;;  %v7528_v28 = vld [vmem:[%s9511_s1 + $0xc4] ss:$16 sps:$4 sm:$0xff]  }
 0x4fc   : > { %4568 = vst [vmem:[#allocation2 + $0x4] sm:$0xf] %v4560_v23  ;;  %4571 = vst [vmem:[#allocation2 + $0x8] sm:$0x1] %v4570_v36  ;;  %v7531_v38 = vld [vmem:[%s9511_s1 + $0xcc] ss:$16 sps:$4 sm:$0xff]  }
 0x4fd   : > { %v7526_v10 = vld [vmem:[%s9511_s1 + $0xc0] ss:$16 sps:$4 sm:$0xff]   ;;  %v7529_v23 = vld [vmem:[%s9511_s1 + $0xc8] ss:$16 sps:$4 sm:$0xff]   ;;  %v7534_v36 = vld [vmem:[%s9511_s1 + $0xe4] ss:$16 sps:$4 sm:$0xff]  }
 0x501   : > { %v4580_v27 = vld [vmem:[#allocation2] sm:$0xf] }
 0x502   : > { %v5161_v20 = vld [vmem:[#allocation2] sm:$0xe] }
 0x503   : > { %v4581_v60 = vld [vmem:[#allocation2 + $0x4] sm:$0xf]  ;;  %v7495_v39 = vld [vmem:[#allocation2 + $0x8] ss:$0 sps:$4 sm:$0x11]  }
 0x504   : > { %v9271_v19 = vcombine.low %v4580_v27, %v4581_v60  ;;  %v6566_v54 = vcombine.low %v5161_v20, %v4581_v60  ;;  %v4663_v41 = vshll.u32 %v7495_v39, 16  ;;  %v5198_v45 = vrot.slane %v7495_v39, 1  ;;  %v7537_v27 = vld [vmem:[%s9511_s1 + $0xec] ss:$16 sps:$4 sm:$0xff]   ;;  %v7532_v60 = vld [vmem:[%s9511_s1 + $0xe0] ss:$16 sps:$4 sm:$0xff]  }
 0x505   : > { %v7535_v20 = vld [vmem:[%s9511_s1 + $0xe8] ss:$16 sps:$4 sm:$0xff]   ;;  %v7540_v39 = vld [vmem:[%s9511_s1 + $0x204] ss:$16 sps:$4 sm:$0xff]  }
 0x506   : > { %v4658_v40 = vshll.u32 %v9271_v19, 16  ;;  %v5197_v24 = vrot.slane %v6566_v54, 1  ;;  %v4656_v49 = vshrl.u32 %v9271_v19, 16  ;;  %v4665_v34 = vrot.slane %v4663_v41, 1  ;;  %v7543_v54 = vld [vmem:[%s9511_s1 + $0x20c] ss:$16 sps:$4 sm:$0xff]  }
 0x507   : > { %v7541_v41 = vld [vmem:[%s9511_s1 + $0x208] ss:$16 sps:$4 sm:$0xff]  }
 0x508   : > { %v4660_v46 = vrot.slane %v4658_v40, 1  ;;  %v9276_v31 = vsel %vm891_vm10, %v5197_v24, %v5198_v45  ;;  %v7538_v40 = vld [vmem:[%s9511_s1 + $0x200] ss:$16 sps:$4 sm:$0xff]   ;;  %v7546_v24 = vld [vmem:[%s9511_s1 + $0x224] ss:$16 sps:$4 sm:$0xff]  }
 0x509   : > { %v7549_v45 = vld [vmem:[%s9511_s1 + $0x22c] ss:$16 sps:$4 sm:$0xff]  }
 0x50a   : > { %v4661_v42 = vor.u32 %v4660_v46, %v4656_v49  ;;  %v7544_v49 = vld [vmem:[%s9511_s1 + $0x220] ss:$16 sps:$4 sm:$0xff]   ;;  %v7547_v46 = vld [vmem:[%s9511_s1 + $0x228] ss:$16 sps:$4 sm:$0xff]  }
 0x50c   : > { %v4666_v61 = vsel %vm347_vm9, %v4661_v42, %v4665_v34  ;;  %v7553_v42 = vld [vmem:[%s9511_s1 + $0x248] ss:$16 sps:$4 sm:$0xff]   ;;  %v7558_v34 = vld [vmem:[%s9511_s1 + $0x264] ss:$16 sps:$4 sm:$0xff]  }
 0x50d   : > { %4861 = vmatmul.mubr.bf16.vlgmr.msra.gmra.mrb[32].mxu0 %v4666_v61  ;;  %4904 = vmatmul.mubr.bf16.vlgmr.msra.gmra.mrb[32].mxu1 %v4666_v61  ;;  %v7564_v61 = vld [vmem:[%s9511_s1 + $0x284] ss:$16 sps:$4 sm:$0xff]  }
 0x50e   : > { %5076 = vmatpush1.bf16.msra.mxu0 %v7488_v50  ;;  %5119 = vmatpush1.bf16.msra.mxu1 %v7491_v55  ;;  %v7552_v50 = vld [vmem:[%s9511_s1 + $0x244] ss:$16 sps:$4 sm:$0xff]   ;;  %v7550_v55 = vld [vmem:[%s9511_s1 + $0x240] ss:$16 sps:$4 sm:$0xff]  }
 0x50f   : > { %5077 = vmatprep.subr.bf16.mxu0 %v7498_v58  ;;  %5120 = vmatprep.subr.bf16.mxu1 %v7501_v57  ;;  %v7556_v58 = vld [vmem:[%s9511_s1 + $0x260] ss:$16 sps:$4 sm:$0xff]   ;;  %v7559_v57 = vld [vmem:[%s9511_s1 + $0x268] ss:$16 sps:$4 sm:$0xff]  }
 0x510   : > { %5107 = vmatprep.mubr.bf16.mxu0 %v7595_v2  ;;  %5150 = vmatprep.mubr.bf16.mxu1 %v7595_v2 }
 0x512   : > { %5078 = vmatpush1.bf16.msra.mxu0 %v7496_v11  ;;  %5121 = vmatpush1.bf16.msra.mxu1 %v7499_v17  ;;  %v7567_v11 = vld [vmem:[%s9511_s1 + $0x28c] ss:$16 sps:$4 sm:$0xff]   ;;  %v7562_v17 = vld [vmem:[%s9511_s1 + $0x280] ss:$16 sps:$4 sm:$0xff]  }
 0x513   : > { %5079 = vmatprep.subr.bf16.mxu0 %v7504_v0  ;;  %5122 = vmatprep.subr.bf16.mxu1 %v7507_v1  ;;  %v7565_v0 = vld [vmem:[%s9511_s1 + $0x288] ss:$16 sps:$4 sm:$0xff]   ;;  %v7570_v1 = vld [vmem:[%s9511_s1 + $0x2a4] ss:$16 sps:$4 sm:$0xff]  }
 0x516   : > { %5080 = vmatpush1.bf16.msra.mxu0 %v7502_v14  ;;  %5123 = vmatpush1.bf16.msra.mxu1 %v7505_v5  ;;  %v7573_v14 = vld [vmem:[%s9511_s1 + $0x2ac] ss:$16 sps:$4 sm:$0xff]   ;;  %v7568_v5 = vld [vmem:[%s9511_s1 + $0x2a0] ss:$16 sps:$4 sm:$0xff]  }
 0x517   : > { %5081 = vmatprep.subr.bf16.mxu0 %v7510_v15  ;;  %5124 = vmatprep.subr.bf16.mxu1 %v7513_v6  ;;  %v7571_v15 = vld [vmem:[%s9511_s1 + $0x2a8] ss:$16 sps:$4 sm:$0xff]   ;;  %v7576_v6 = vld [vmem:[%s9511_s1 + $0x2c4] ss:$16 sps:$4 sm:$0xff]  }
 0x51a   : > { %5082 = vmatpush1.bf16.msra.mxu0 %v7508_v59  ;;  %5125 = vmatpush1.bf16.msra.mxu1 %v7511_v12  ;;  %v7579_v59 = vld [vmem:[%s9511_s1 + $0x2cc] ss:$16 sps:$4 sm:$0xff]   ;;  %v7574_v12 = vld [vmem:[%s9511_s1 + $0x2c0] ss:$16 sps:$4 sm:$0xff]  }
 0x51b   : > { %5083 = vmatprep.subr.bf16.mxu0 %v7516_v18  ;;  %5126 = vmatprep.subr.bf16.mxu1 %v7519_v44  ;;  %v7577_v18 = vld [vmem:[%s9511_s1 + $0x2c8] ss:$16 sps:$4 sm:$0xff]   ;;  %v7582_v44 = vld [vmem:[%s9511_s1 + $0x2e4] ss:$16 sps:$4 sm:$0xff]  }
 0x51e   : > { %5084 = vmatpush1.bf16.msra.mxu0 %v7514_v37  ;;  %5127 = vmatpush1.bf16.msra.mxu1 %v7517_v33  ;;  %v7585_v37 = vld [vmem:[%s9511_s1 + $0x2ec] ss:$16 sps:$4 sm:$0xff]   ;;  %v7580_v33 = vld [vmem:[%s9511_s1 + $0x2e0] ss:$16 sps:$4 sm:$0xff]  }
 0x51f   : > { %5085 = vmatprep.subr.bf16.mxu0 %v7522_v29  ;;  %5128 = vmatprep.subr.bf16.mxu1 %v7525_v21  ;;  %v7583_v29 = vld [vmem:[%s9511_s1 + $0x2e8] ss:$16 sps:$4 sm:$0xff]   ;;  %v4572_v21 = vadd.f32 %v3325_v47, %v8108_v3  ;;  %v9545_v3 = vmax.f32 %v8881_v22, 0.0 }
 0x521   : > { %v4576_v51 = vadd.f32 %v9545_v3, %v8122_v13 }
 0x522   : > { %5086 = vmatpush1.bf16.msra.mxu0 %v7520_v56  ;;  %5129 = vmatpush1.bf16.msra.mxu1 %v7523_v62  ;;  %v4574_v62 = vadd.f32 %v3327_v48, %v8110_v4  ;;  %v9546_v4 = vmax.f32 %v8883_v30, 0.0 }
 0x523   : > { %5087 = vmatprep.subr.bf16.mxu0 %v7528_v28  ;;  %5130 = vmatprep.subr.bf16.mxu1 %v7531_v38  ;;  %v4573_v38 = vadd.f32 %v3326_v32, %v8112_v7  ;;  %v9548_v32 = vmax.f32 %v8889_v63, 0.0 }
 0x524   : > { %v4578_v52 = vadd.f32 %v9546_v4, %v8130_v16 }
 0x526   : > { %5088 = vmatpush1.bf16.msra.mxu0 %v7526_v10  ;;  %5131 = vmatpush1.bf16.msra.mxu1 %v7529_v23  ;;  %v4575_v10 = vadd.f32 %v3328_v9, %v8114_v8  ;;  %v4577_v8 = vadd.f32 %v9547_v35, %v8142_v25  ;;  %v4579_v9 = vadd.f32 %v9548_v32, %v8144_v26 }
 0x527   : > { %5089 = vmatprep.subr.bf16.mxu0 %v7534_v36  ;;  %5132 = vmatprep.subr.bf16.mxu1 %v7537_v27 }
 0x52a   : > { %5090 = vmatpush1.bf16.msra.mxu0 %v7532_v60  ;;  %5133 = vmatpush1.bf16.msra.mxu1 %v7535_v20 }
 0x52b   : > { %5361 = vmatprep.subr.bf16.mxu0 %v7540_v39  ;;  %5404 = vmatprep.subr.bf16.mxu1 %v7543_v54 }
 0x52d   : > { %5108 = vmatmul.mubr.bf16.vlgmr.msra.gmra.mrb[32].mxu0 %v9271_v19  ;;  %5151 = vmatmul.mubr.bf16.vlgmr.msra.gmra.mrb[32].mxu1 %v9271_v19  ;;  %v7555_v19 = vld [vmem:[%s9511_s1 + $0x24c] ss:$16 sps:$4 sm:$0xff]  }
 0x52e   : > { %5362 = vmatpush1.bf16.msra.mxu0 %v7538_v40  ;;  %5405 = vmatpush1.bf16.msra.mxu1 %v7541_v41 }
 0x52f   : > { %5363 = vmatprep.subr.bf16.mxu0 %v7546_v24  ;;  %5406 = vmatprep.subr.bf16.mxu1 %v7549_v45 }
 0x530   : > { %5393 = vmatprep.mubr.bf16.mxu0 %v7595_v2  ;;  %5436 = vmatprep.mubr.bf16.mxu1 %v7595_v2  ;;  %v7561_v2 = vld [vmem:[%s9511_s1 + $0x26c] ss:$16 sps:$4 sm:$0xff]  }
 0x532   : > { %5364 = vmatpush1.bf16.msra.mxu0 %v7544_v49  ;;  %5407 = vmatpush1.bf16.msra.mxu1 %v7547_v46 }
 0x533   : > { %5365 = vmatprep.subr.bf16.mxu0 %v7552_v50  ;;  %5408 = vmatprep.subr.bf16.mxu1 %v7555_v19 }
 0x536   : > { %5366 = vmatpush1.bf16.msra.mxu0 %v7550_v55  ;;  %5409 = vmatpush1.bf16.msra.mxu1 %v7553_v42 }
 0x537   : > { %5367 = vmatprep.subr.bf16.mxu0 %v7558_v34  ;;  %5410 = vmatprep.subr.bf16.mxu1 %v7561_v2 }
 0x53a   : > { %5368 = vmatpush1.bf16.msra.mxu0 %v7556_v58  ;;  %5411 = vmatpush1.bf16.msra.mxu1 %v7559_v57 }
 0x53b   : > { %5369 = vmatprep.subr.bf16.mxu0 %v7564_v61  ;;  %5412 = vmatprep.subr.bf16.mxu1 %v7567_v11 }
 0x53e   : > { %5370 = vmatpush1.bf16.msra.mxu0 %v7562_v17  ;;  %5413 = vmatpush1.bf16.msra.mxu1 %v7565_v0 }
 0x53f   : > { %5371 = vmatprep.subr.bf16.mxu0 %v7570_v1  ;;  %5414 = vmatprep.subr.bf16.mxu1 %v7573_v14 }
 0x542   : > { %5372 = vmatpush1.bf16.msra.mxu0 %v7568_v5  ;;  %5415 = vmatpush1.bf16.msra.mxu1 %v7571_v15 }
 0x543   : > { %5373 = vmatprep.subr.bf16.mxu0 %v7576_v6  ;;  %5416 = vmatprep.subr.bf16.mxu1 %v7579_v59 }
 0x546   : > { %5374 = vmatpush1.bf16.msra.mxu0 %v7574_v12  ;;  %5417 = vmatpush1.bf16.msra.mxu1 %v7577_v18 }
 0x547   : > { %5375 = vmatprep.subr.bf16.mxu0 %v7582_v44  ;;  %5418 = vmatprep.subr.bf16.mxu1 %v7585_v37 }
 0x54a   : > { %5376 = vmatpush1.bf16.msra.mxu0 %v7580_v33  ;;  %5419 = vmatpush1.bf16.msra.mxu1 %v7583_v29 }
 0x54d   : > { %5394 = vmatmul.mubr.bf16.vlgmr.msra.gmra.mrb[32].mxu0 %v9276_v31  ;;  %5437 = vmatmul.mubr.bf16.vlgmr.msra.gmra.mrb[32].mxu1 %v9276_v31 }
 0x620   : > { %v5395_v56 = vpop.f32.mrb[32].mxu0  ;;  %v5438_v28 = vpop.f32.mrb[32].mxu1 }
 0x621   : > { %v5455_v31 = vmul.f32 0.1, %v5395_v56  ;;  %v5457_v23 = vmul.f32 0.1, %v5438_v28  ;;  %v5397_v36 = vpop.f32.mrb[33].mxu0  ;;  %v5440_v27 = vpop.f32.mrb[33].mxu1 }
 0x622   : > { %v5456_v47 = vmul.f32 0.1, %v5397_v36  ;;  %v5458_v48 = vmul.f32 0.1, %v5440_v27  ;;  %v5399_v53 = vpop.f32.mrb[34].mxu0  ;;  %v5442_v7 = vpop.f32.mrb[34].mxu1 }
 0x623   : > { %v5463_v60 = vsub.f32 %v4572_v21, %v5455_v31  ;;  %v5465_v22 = vsub.f32 %v4574_v62, %v5457_v23  ;;  %v5459_v13 = vmul.f32 0.1, %v5399_v53  ;;  %v5461_v20 = vmul.f32 0.1, %v5442_v7  ;;  %v5401_v39 = vpop.f32.mrb[35].mxu0  ;;  %v5444_v30 = vpop.f32.mrb[35].mxu1 }
 0x624   : > { %v5464_v16 = vsub.f32 %v4573_v38, %v5456_v47  ;;  %v5466_v54 = vsub.f32 %v4575_v10, %v5458_v48  ;;  %v5460_v40 = vmul.f32 0.1, %v5401_v39  ;;  %v5462_v41 = vmul.f32 0.1, %v5444_v30 }
 0x625   : > { %v6599_v24 = vadd.f32 -0.01, %v5463_v60  ;;  %v6601_v45 = vadd.f32 -0.01, %v5465_v22  ;;  %v5467_v49 = vsub.f32 %v4576_v51, %v5459_v13  ;;  %v5469_v43 = vsub.f32 %v4578_v52, %v5461_v20 }
 0x626   : > { %v6600_v25 = vadd.f32 -0.01, %v5464_v16  ;;  %v6602_v26 = vadd.f32 -0.01, %v5466_v54  ;;  %v5468_v63 = vsub.f32 %v4577_v8, %v5460_v40  ;;  %v5470_v46 = vsub.f32 %v4579_v9, %v5462_v41 }
 0x627   : > { %v5479_v50 = vmax.f32 %v6599_v24, 0.0  ;;  %v5481_v19 = vmax.f32 %v6601_v45, 0.0  ;;  %v6603_v55 = vadd.f32 -0.01, %v5467_v49  ;;  %v6605_v42 = vadd.f32 -0.01, %v5469_v43 }
 0x628   : > { %v5480_v34 = vmax.f32 %v6600_v25, 0.0  ;;  %v5482_v2 = vmax.f32 %v6602_v26, 0.0  ;;  %v6604_v58 = vadd.f32 -0.01, %v5468_v63  ;;  %v6606_v57 = vadd.f32 -0.01, %v5470_v46 }
 0x629   : > { %5487 = vst [vmem:[%s203_s24] sm:$0xff] %v5479_v50  ;;  %v5495_v61 = vand.u32 2147483647, %v5479_v50  ;;  %5489 = vst [vmem:[%s203_s24 + $0x10] sm:$0xff] %v5481_v19  ;;  %v5483_v11 = vmax.f32 %v6603_v55, 0.0  ;;  %v5485_v17 = vmax.f32 %v6605_v42, 0.0 }
 0x62a   : > { %5488 = vst [vmem:[%s203_s24 + $0x8] sm:$0xff] %v5480_v34  ;;  %v5496_v0 = vand.u32 2147483647, %v5480_v34  ;;  %5490 = vst [vmem:[%s203_s24 + $0x18] sm:$0xff] %v5482_v2  ;;  %v5484_v1 = vmax.f32 %v6604_v58, 0.0  ;;  %v5486_v14 = vmax.f32 %v6606_v57, 0.0 }
 0x62b   : > { %5491 = vst [vmem:[%s203_s24 + $0x20] sm:$0xff] %v5483_v11  ;;  %5493 = vst [vmem:[%s203_s24 + $0x30] sm:$0xff] %v5485_v17  ;;  %v5497_v5 = vand.u32 2147483647, %v5481_v19  ;;  %v5498_v6 = vand.u32 2147483647, %v5482_v2 }
 0x62c   : > { %v5503_v15 = vadd.f32 %v5496_v0, %v5495_v61  ;;  %5492 = vst [vmem:[%s203_s24 + $0x28] sm:$0xff] %v5484_v1  ;;  %5494 = vst [vmem:[%s203_s24 + $0x38] sm:$0xff] %v5486_v14  ;;  %v5499_v18 = vand.u32 2147483647, %v5483_v11  ;;  %v5500_v44 = vand.u32 2147483647, %v5484_v1 }
 0x62d   : > { %v5501_v33 = vand.u32 2147483647, %v5485_v17  ;;  %v5502_v21 = vand.u32 2147483647, %v5486_v14 }
 0x62e   : > { %v5504_v59 = vadd.f32 %v5503_v15, %v5497_v5 }
 0x630   : > { %v5505_v12 = vadd.f32 %v5504_v59, %v5498_v6 }
 0x632   : > { %v5506_v37 = vadd.f32 %v5505_v12, %v5499_v18 }
 0x634   : > { %v5507_v29 = vadd.f32 %v5506_v37, %v5500_v44 }
 0x636   : > { %v5508_v56 = vadd.f32 %v5507_v29, %v5501_v33 }
 0x638   : > { %v5509_v62 = vadd.f32 %v5508_v56, %v5502_v21 }
 0x63a   : > { %5510 = vadd.xlane.f32.xlu0 %v5509_v62 }
 0x6c7   : > { %v5511_v28 = vpop.xlane.xlu0 %5510 }
 0x6c8   : > { %v5512_v38 = vrot.slane %v5511_v28, 4 }
 0x6ca   : > { %v5513_v10 = vadd.f32 %v5512_v38, %v5511_v28 }
 0x6cc   : > { %v5514_v31 = vrot.slane %v5513_v10, 2 }
 0x6ce   : > { %v5515_v23 = vadd.f32 %v5514_v31, %v5513_v10 }
 0x6d0   : > { %v5516_v36 = vrot.slane %v5515_v23, 1 }
 0x6d2   : > { %v5517_v27 = vadd.f32 %v5516_v36, %v5515_v23 }
 0x6d4   : > { %6935 = vpush %v5517_v27 }
 0x705   : > { %s6936_s28 = spop %6935 }
 0x706   : > { %v5519_v3 = vstv %s6936_s28 }
 0x707   : > { %5520 = vst [vmem:[%s206_s27] sm:$0x1] %v5519_v3 }
 0x708 PF: > { %s15_s15 = sadd.s32 1, %s7593_s15  }
 0x709   : > { %p12_p4 = scmp.ge.s32.totalorder %s15_s15, 4  }
 0x70b   :  { %14 = sbr.rel (!%p12_p4) target bundleno = 1 (0x1), region = 78 }

</bundles_post_ra>
